<compile_context>
chip_gen: v6e
topology: v6e:2x2x1
jax: 0.10.0
libtpu: 0.0.40
codegen_flags: <defaults>
</compile_context>

<pallas_src>
import jax
import jax.numpy as jnp
from jax.experimental import pallas as pl
from jax.experimental.pallas import tpu as pltpu


# ------------------------- model geometry (CIFAR: 3x32x32) -----------------
K = 5                                   # conv kernel size
H_IN, W_IN, C_IN = 32, 32, 3            # conv1 input
H_C1, W_C1, C_C1 = 28, 28, 6            # conv1 output (valid rows)
H_P1, W_P1 = 14, 14                     # pool1 output (valid rows)
H_C2, W_C2, C_C2 = 10, 10, 16           # conv2 output (valid rows)
H_P2, W_P2 = 5, 5                       # pool2 output (valid rows)
D_FC1, D_FC2, D_OUT = 120, 84, 10

# per-image row counts padded to multiples of 8 (sublane tile)
R1, R2, R3 = 32, 16, 8                  # conv1 stage / pool1+conv2 stage / pool2 stage

# MXU operand dtype.  f32 keeps max reference error ~1e-5; flip to
# jnp.bfloat16 on v6e/v7x for higher MXU throughput (accum stays f32).
MXU_DT = jnp.float32


# ------------------------- the fused Pallas kernel --------------------------

def _lenet_kernel(x_ref, wc1_ref, bc1_ref, pc1_ref, pr1_ref,
                  wc2_ref, bc2_ref, pc2_ref, pr2_ref,
                  w1_ref, b1_ref, w2_ref, b2_ref, w3_ref, b3_ref,
                  o_ref):
    """B images per grid step.  Activation layout: rows = image-major
    (per-image blocks of R1/R2/R3 rows), lanes = w*C + c."""
    f32 = jnp.float32
    rows1 = x_ref.shape[0]              # B * 32
    B = rows1 // R1
    rows2 = B * R2

    def mm(a, b):                        # 2-D GEMM, f32 accumulation
        return jnp.dot(a.astype(MXU_DT), b.astype(MXU_DT),
                       preferred_element_type=f32)

    def bmm(small, act):                 # batched (per-image) row mixing
        return jax.lax.dot_general(
            small.astype(MXU_DT), act.astype(MXU_DT),
            (((2,), (1,)), ((0,), (0,))), preferred_element_type=f32)

    # ---- conv1: 5 row-shifted GEMMs, M = B*32 ------------------------------
    x2 = x_ref[...]                                           # (B*32, 96)
    xp = jnp.concatenate(
        [x2, jnp.zeros((K - 1, x2.shape[1]), f32)], axis=0)   # (B*32+4, 96)
    acc = mm(x2, wc1_ref[0])
    for di in range(1, K):
        acc = acc + mm(xp[di:di + rows1, :], wc1_ref[di])
    t1 = jnp.tanh(acc + bc1_ref[...])                         # (B*32, 168)

    # ---- pool1: columns via shared GEMM, rows via batched tiny dot ---------
    p1c = mm(t1, pc1_ref[...])                                # (B*32, 84)
    p1c3 = p1c.reshape(B, R1, W_P1 * C_C1)                    # tile-aligned split
    pr1b = jnp.broadcast_to(pr1_ref[...], (B, R2, R1))
    p1 = bmm(pr1b, p1c3).reshape(rows2, W_P1 * C_C1)          # (B*16, 84)

    # ---- conv2: 5 row-shifted GEMMs, M = B*16 ------------------------------
    p1p = jnp.concatenate(
        [p1, jnp.zeros((K - 1, p1.shape[1]), f32)], axis=0)   # (B*16+4, 84)
    acc2 = mm(p1, wc2_ref[0])
    for di in range(1, K):
        acc2 = acc2 + mm(p1p[di:di + rows2, :], wc2_ref[di])
    t2 = jnp.tanh(acc2 + bc2_ref[...])                        # (B*16, 160)

    # ---- pool2 --------------------------------------------------------------
    p2c = mm(t2, pc2_ref[...])                                # (B*16, 80)
    p2c3 = p2c.reshape(B, R2, W_P2 * C_C2)
    pr2b = jnp.broadcast_to(pr2_ref[...], (B, R3, R2))
    p2 = bmm(pr2b, p2c3)                                      # (B, 8, 80); rows 0..4 valid

    # ---- FC stack (NCHW flatten folded into FC1 weight stack), M = B -------
    y = mm(p2[:, 0, :], w1_ref[0])
    for h in range(1, H_P2):
        y = y + mm(p2[:, h, :], w1_ref[h])
    y = jnp.tanh(y + b1_ref[...])                             # (B, 120)
    y = jnp.tanh(mm(y, w2_ref[...]) + b2_ref[...])            # (B, 84)
    y = mm(y, w3_ref[...]) + b3_ref[...]                      # (B, 10)
    o_ref[...] = y


# ------------------------- weight / constant preprocessing ------------------

def _conv_row_weights(w_oihw, w_in):
    """Stack of K matrices M[di] with
         M[di][w*Cin + c, j*Cout + o] = w[o, c, di, w - j]   (0 <= w-j < K)
       so that  conv_out[i, j*Cout+o] = sum_di (A[di:di+Hout, :] @ M[di])[i, .]
       for an activation laid out as A[h, w*Cin + c]."""
    c_out, c_in, kh, kw = w_oihw.shape
    w_out = w_in - kw + 1
    mats = []
    for di in range(kh):
        m = jnp.zeros((w_in * c_in, w_out * c_out), jnp.float32)
        for dj in range(kw):
            shift = jnp.eye(w_in, w_out, k=-dj, dtype=jnp.float32)
            m = m + jnp.kron(shift, w_oihw[:, :, di, dj].T.astype(jnp.float32))
        mats.append(m)
    return jnp.stack(mats, axis=0)


def _pool_mats(h_in, w_in, c):
    """AvgPool2d(2, stride=2) as  Pr @ X @ Pc  on X[h, w*C + c]."""
    hp, wp = h_in // 2, w_in // 2
    pr = jnp.kron(jnp.eye(hp, dtype=jnp.float32),
                  jnp.array([[0.5, 0.5]], jnp.float32))               # (hp, h_in)
    rc = jnp.kron(jnp.eye(wp, dtype=jnp.float32),
                  jnp.array([[0.5], [0.5]], jnp.float32))             # (w_in, wp)
    pc = jnp.kron(rc, jnp.eye(c, dtype=jnp.float32))                  # (w_in*c, wp*c)
    return pr, pc


def pack_params(params):
    """One-time weight repacking (hoisted out of the forward pass)."""
    (w1, b1, w2, b2, fw1, fb1, fw2, fb2, fw3, fb3) = params
    wc1 = _conv_row_weights(w1, W_IN)                          # (5, 96, 168)
    bc1 = jnp.tile(b1.astype(jnp.float32), W_C1)[None, :]      # (1, 168)
    wc2 = _conv_row_weights(w2, W_P1)                          # (5, 84, 160)
    bc2 = jnp.tile(b2.astype(jnp.float32), W_C2)[None, :]      # (1, 160)
    pr1, pc1 = _pool_mats(H_C1, W_C1, C_C1)                    # (14,28), (168,84)
    pr2, pc2 = _pool_mats(H_C2, W_C2, C_C2)                    # (5,10),  (160,80)
    # zero-pad the row-pooling matrices to the padded per-image heights; the
    # zero rows/cols isolate the padded junk rows from all valid outputs.
    pr1p = jnp.zeros((R2, R1), jnp.float32).at[:H_P1, :H_C1].set(pr1)  # (16,32)
    pr2p = jnp.zeros((R3, R2), jnp.float32).at[:H_P2, :H_C2].set(pr2)  # (8,16)
    # Fold PyTorch's (C,H,W) flatten into FC1: W1s[h, w*16+c, m] = fw1[m, c*25+h*5+w]
    w1s = fw1.astype(jnp.float32).reshape(D_FC1, C_C2, H_P2, W_P2)
    w1s = jnp.transpose(w1s, (2, 3, 1, 0)).reshape(H_P2, W_P2 * C_C2, D_FC1)
    return (wc1, bc1, pc1, pr1p, wc2, bc2, pc2, pr2p,
            w1s, fb1.astype(jnp.float32)[None, :],
            fw2.astype(jnp.float32).T, fb2.astype(jnp.float32)[None, :],
            fw3.astype(jnp.float32).T, fb3.astype(jnp.float32)[None, :])


# ------------------------- forward pass -------------------------------------

def _pick_block(n, batch_block):
    """Images per grid step.  Multiple of 8 (out-block sublane rule) with
    >= 2 grid steps (v7x dual TensorCore) whenever the batch allows it."""
    if n < 16:
        return n                              # single full-array block
    return min(batch_block, max(8, (n // 2) // 8 * 8))


def lenet_forward(x_nchw, packed, *, batch_block=64):
    (wc1, bc1, pc1, pr1p, wc2, bc2, pc2, pr2p,
     w1s, b1r, w2m, b2r, w3m, b3r) = packed
    n = x_nchw.shape[0]
    B = _pick_block(n, batch_block)
    n_pad = ((n + B - 1) // B) * B

    # Single small layout transform on the input (NCHW -> rows=(img,h), lanes=w*C+c).
    x = jnp.transpose(x_nchw, (0, 2, 3, 1)).reshape(n, H_IN, W_IN * C_IN)
    x = x.astype(jnp.float32)
    if n_pad != n:
        x = jnp.concatenate(
            [x, jnp.zeros((n_pad - n, H_IN, W_IN * C_IN), jnp.float32)], axis=0)
    x2d = x.reshape(n_pad * H_IN, W_IN * C_IN)

    def full(shape):
        nd = len(shape)
        return pl.BlockSpec(shape, lambda i, _n=nd: (0,) * _n)

    out = pl.pallas_call(
        _lenet_kernel,
        out_shape=jax.ShapeDtypeStruct((n_pad, D_OUT), jnp.float32),
        grid_spec=pltpu.PrefetchScalarGridSpec(
            num_scalar_prefetch=0,
            grid=(n_pad // B,),
            in_specs=[
                pl.BlockSpec((B * H_IN, W_IN * C_IN), lambda i: (i, 0)),
                full(wc1.shape), full(bc1.shape), full(pc1.shape), full(pr1p.shape),
                full(wc2.shape), full(bc2.shape), full(pc2.shape), full(pr2p.shape),
                full(w1s.shape), full(b1r.shape), full(w2m.shape), full(b2r.shape),
                full(w3m.shape), full(b3r.shape),
            ],
            out_specs=pl.BlockSpec((B, D_OUT), lambda i: (i, 0)),
        ),
        compiler_params=pltpu.CompilerParams(
            dimension_semantics=("parallel",)),
    )(x2d, wc1, bc1, pc1, pr1p, wc2, bc2, pc2, pr2p,
      w1s, b1r, w2m, b2r, w3m, b3r)
    return out[:n]


# ------------------------- pure-JAX reference -------------------------------

def _avgpool_ref_nchw(x):
    n, c, h, w = x.shape
    return x.reshape(n, c, h // 2, 2, w // 2, 2).mean(axis=(3, 5))


def lenet_reference(x, params):
    (w1, b1, w2, b2, fw1, fb1, fw2, fb2, fw3, fb3) = params
    dn = ('NCHW', 'OIHW', 'NCHW')
    y = jax.lax.conv_general_dilated(x, w1, (1, 1), 'VALID', dimension_numbers=dn)
    y = jnp.tanh(y + b1[None, :, None, None])
    y = _avgpool_ref_nchw(y)
    y = jax.lax.conv_general_dilated(y, w2, (1, 1), 'VALID', dimension_numbers=dn)
    y = jnp.tanh(y + b2[None, :, None, None])
    y = _avgpool_ref_nchw(y)
    y = y.reshape(y.shape[0], -1)
    y = jnp.tanh(y @ fw1.T + fb1)
    y = jnp.tanh(y @ fw2.T + fb2)
    y = y @ fw3.T + fb3
    return y


# ------------------------- main ----------------------------------------------

def make_params(key):
    ks = jax.random.split(key, 10)

    def rnd(k, shape, scale):
        return (scale * jax.random.normal(k, shape)).astype(jnp.float32)

    w1 = rnd(ks[0], (6, 3, 5, 5), 0.1)
    b1 = rnd(ks[1], (6,), 0.1)
    w2 = rnd(ks[2], (16, 6, 5, 5), 0.1)
    b2 = rnd(ks[3], (16,), 0.1)
    fw1 = rnd(ks[4], (120, 400), 0.05)
    fb1 = rnd(ks[5], (120,), 0.05)
    fw2 = rnd(ks[6], (84, 120), 0.05)
    fb2 = rnd(ks[7], (84,), 0.05)
    fw3 = rnd(ks[8], (10, 84), 0.05)
    fb3 = rnd(ks[9], (10,), 0.05)
    return (w1, b1, w2, b2, fw1, fb1, fw2, fb2, fw3, fb3)


if __name__ == "__main__":
    key = jax.random.PRNGKey(0)
    kx, kp = jax.random.split(key)
    # CIFAR-sized input is implied by the FC dims (16*5*5 = 400): 3x32x32.
    x = jax.random.normal(kx, (16, 3, 32, 32), dtype=jnp.float32)
    params = make_params(kp)

    packed = pack_params(params)           # one-time weight repacking (hoisted)
    fwd = jax.jit(lenet_forward)
    out = jax.block_until_ready(fwd(x, packed))
    ref = jax.block_until_ready(lenet_reference(x, params))

    assert out.shape == (16, 10), out.shape
    max_err = float(jnp.max(jnp.abs(out - ref)))
    assert max_err < 1e-2, f"mismatch vs reference: max_err={max_err}"
    print("KERNEL_OK")
</pallas_src>

<mosaic_0001>
module attributes {stable_mosaic.version = 11 : i64} {
  func.func @_lenet_kernel(%arg0: i32, %arg1: memref<256x96xf32, #tpu.memory_space<vmem>>, %arg2: memref<5x96x168xf32, #tpu.memory_space<vmem>>, %arg3: memref<1x168xf32, #tpu.memory_space<vmem>>, %arg4: memref<168x84xf32, #tpu.memory_space<vmem>>, %arg5: memref<16x32xf32, #tpu.memory_space<vmem>>, %arg6: memref<5x84x160xf32, #tpu.memory_space<vmem>>, %arg7: memref<1x160xf32, #tpu.memory_space<vmem>>, %arg8: memref<160x80xf32, #tpu.memory_space<vmem>>, %arg9: memref<8x16xf32, #tpu.memory_space<vmem>>, %arg10: memref<5x80x120xf32, #tpu.memory_space<vmem>>, %arg11: memref<1x120xf32, #tpu.memory_space<vmem>>, %arg12: memref<120x84xf32, #tpu.memory_space<vmem>>, %arg13: memref<1x84xf32, #tpu.memory_space<vmem>>, %arg14: memref<84x10xf32, #tpu.memory_space<vmem>>, %arg15: memref<1x10xf32, #tpu.memory_space<vmem>>, %arg16: memref<8x10xf32, #tpu.memory_space<vmem>>) attributes {dimension_semantics = [#tpu.dimension_semantics<parallel>], iteration_bounds = array<i64: 2>, scalar_prefetch = 0 : i64, scratch_operands = 0 : i64, tpu.core_type = #tpu.core_type<tc>, window_params = [{transform_indices = @transform_0, window_bounds = array<i64: 256, 96>}, {pipeline_mode = #tpu.pipeline_mode<synchronous>, transform_indices = @transform_1, window_bounds = array<i64: 5, 96, 168>}, {pipeline_mode = #tpu.pipeline_mode<synchronous>, transform_indices = @transform_2, window_bounds = array<i64: 1, 168>}, {pipeline_mode = #tpu.pipeline_mode<synchronous>, transform_indices = @transform_3, window_bounds = array<i64: 168, 84>}, {pipeline_mode = #tpu.pipeline_mode<synchronous>, transform_indices = @transform_4, window_bounds = array<i64: 16, 32>}, {pipeline_mode = #tpu.pipeline_mode<synchronous>, transform_indices = @transform_5, window_bounds = array<i64: 5, 84, 160>}, {pipeline_mode = #tpu.pipeline_mode<synchronous>, transform_indices = @transform_6, window_bounds = array<i64: 1, 160>}, {pipeline_mode = #tpu.pipeline_mode<synchronous>, transform_indices = @transform_7, window_bounds = array<i64: 160, 80>}, {pipeline_mode = #tpu.pipeline_mode<synchronous>, transform_indices = @transform_8, window_bounds = array<i64: 8, 16>}, {pipeline_mode = #tpu.pipeline_mode<synchronous>, transform_indices = @transform_9, window_bounds = array<i64: 5, 80, 120>}, {pipeline_mode = #tpu.pipeline_mode<synchronous>, transform_indices = @transform_10, window_bounds = array<i64: 1, 120>}, {pipeline_mode = #tpu.pipeline_mode<synchronous>, transform_indices = @transform_11, window_bounds = array<i64: 120, 84>}, {pipeline_mode = #tpu.pipeline_mode<synchronous>, transform_indices = @transform_12, window_bounds = array<i64: 1, 84>}, {pipeline_mode = #tpu.pipeline_mode<synchronous>, transform_indices = @transform_13, window_bounds = array<i64: 84, 10>}, {pipeline_mode = #tpu.pipeline_mode<synchronous>, transform_indices = @transform_14, window_bounds = array<i64: 1, 10>}, {transform_indices = @transform_15, window_bounds = array<i64: 8, 10>}]} {
    %c0 = arith.constant 0 : index
    %c0_0 = arith.constant 0 : index
    %0 = vector.load %arg1[%c0, %c0_0] : memref<256x96xf32, #tpu.memory_space<vmem>>, vector<256x96xf32>
    %cst = arith.constant 0.000000e+00 : f32
    %1 = vector.broadcast %cst : f32 to vector<4x96xf32>
    %2 = tpu.concatenate %0, %1 in 0 : vector<256x96xf32>, vector<4x96xf32> -> vector<260x96xf32>
    %c0_1 = arith.constant 0 : index
    %c0_2 = arith.constant 0 : index
    %c0_3 = arith.constant 0 : index
    %3 = vector.load %arg2[%c0_1, %c0_2, %c0_3] : memref<5x96x168xf32, #tpu.memory_space<vmem>>, vector<1x96x168xf32>
    %4 = vector.shape_cast %3 : vector<1x96x168xf32> to vector<96x168xf32>
    %cst_4 = arith.constant dense<0.000000e+00> : vector<256x168xf32>
    %5 = tpu.matmul %0, %4, %cst_4 {dimension_numbers = #tpu.dot_dimension_numbers<[1], [0], [0], [1], [0, 0, 1, 1], [], []>} : vector<256x96xf32>, vector<96x168xf32>, vector<256x168xf32> -> vector<256x168xf32>
    %6 = vector.extract_strided_slice %2 {offsets = [1, 0], sizes = [256, 96], strides = [1, 1]} : vector<260x96xf32> to vector<256x96xf32>
    %c1 = arith.constant 1 : index
    %c0_5 = arith.constant 0 : index
    %c0_6 = arith.constant 0 : index
    %7 = vector.load %arg2[%c1, %c0_5, %c0_6] : memref<5x96x168xf32, #tpu.memory_space<vmem>>, vector<1x96x168xf32>
    %8 = vector.shape_cast %7 : vector<1x96x168xf32> to vector<96x168xf32>
    %cst_7 = arith.constant dense<0.000000e+00> : vector<256x168xf32>
    %9 = tpu.matmul %6, %8, %cst_7 {dimension_numbers = #tpu.dot_dimension_numbers<[1], [0], [0], [1], [0, 0, 1, 1], [], []>} : vector<256x96xf32>, vector<96x168xf32>, vector<256x168xf32> -> vector<256x168xf32>
    %10 = arith.addf %5, %9 : vector<256x168xf32>
    %11 = vector.extract_strided_slice %2 {offsets = [2, 0], sizes = [256, 96], strides = [1, 1]} : vector<260x96xf32> to vector<256x96xf32>
    %c2 = arith.constant 2 : index
    %c0_8 = arith.constant 0 : index
    %c0_9 = arith.constant 0 : index
    %12 = vector.load %arg2[%c2, %c0_8, %c0_9] : memref<5x96x168xf32, #tpu.memory_space<vmem>>, vector<1x96x168xf32>
    %13 = vector.shape_cast %12 : vector<1x96x168xf32> to vector<96x168xf32>
    %cst_10 = arith.constant dense<0.000000e+00> : vector<256x168xf32>
    %14 = tpu.matmul %11, %13, %cst_10 {dimension_numbers = #tpu.dot_dimension_numbers<[1], [0], [0], [1], [0, 0, 1, 1], [], []>} : vector<256x96xf32>, vector<96x168xf32>, vector<256x168xf32> -> vector<256x168xf32>
    %15 = arith.addf %10, %14 : vector<256x168xf32>
    %16 = vector.extract_strided_slice %2 {offsets = [3, 0], sizes = [256, 96], strides = [1, 1]} : vector<260x96xf32> to vector<256x96xf32>
    %c3 = arith.constant 3 : index
    %c0_11 = arith.constant 0 : index
    %c0_12 = arith.constant 0 : index
    %17 = vector.load %arg2[%c3, %c0_11, %c0_12] : memref<5x96x168xf32, #tpu.memory_space<vmem>>, vector<1x96x168xf32>
    %18 = vector.shape_cast %17 : vector<1x96x168xf32> to vector<96x168xf32>
    %cst_13 = arith.constant dense<0.000000e+00> : vector<256x168xf32>
    %19 = tpu.matmul %16, %18, %cst_13 {dimension_numbers = #tpu.dot_dimension_numbers<[1], [0], [0], [1], [0, 0, 1, 1], [], []>} : vector<256x96xf32>, vector<96x168xf32>, vector<256x168xf32> -> vector<256x168xf32>
    %20 = arith.addf %15, %19 : vector<256x168xf32>
    %21 = vector.extract_strided_slice %2 {offsets = [4, 0], sizes = [256, 96], strides = [1, 1]} : vector<260x96xf32> to vector<256x96xf32>
    %c4 = arith.constant 4 : index
    %c0_14 = arith.constant 0 : index
    %c0_15 = arith.constant 0 : index
    %22 = vector.load %arg2[%c4, %c0_14, %c0_15] : memref<5x96x168xf32, #tpu.memory_space<vmem>>, vector<1x96x168xf32>
    %23 = vector.shape_cast %22 : vector<1x96x168xf32> to vector<96x168xf32>
    %cst_16 = arith.constant dense<0.000000e+00> : vector<256x168xf32>
    %24 = tpu.matmul %21, %23, %cst_16 {dimension_numbers = #tpu.dot_dimension_numbers<[1], [0], [0], [1], [0, 0, 1, 1], [], []>} : vector<256x96xf32>, vector<96x168xf32>, vector<256x168xf32> -> vector<256x168xf32>
    %25 = arith.addf %20, %24 : vector<256x168xf32>
    %c0_17 = arith.constant 0 : index
    %c0_18 = arith.constant 0 : index
    %26 = vector.load %arg3[%c0_17, %c0_18] : memref<1x168xf32, #tpu.memory_space<vmem>>, vector<1x168xf32>
    %27 = vector.broadcast %26 : vector<1x168xf32> to vector<256x168xf32>
    %28 = arith.addf %25, %27 : vector<256x168xf32>
    %29 = math.tanh %28 : vector<256x168xf32>
    %c0_19 = arith.constant 0 : index
    %c0_20 = arith.constant 0 : index
    %30 = vector.load %arg4[%c0_19, %c0_20] : memref<168x84xf32, #tpu.memory_space<vmem>>, vector<168x84xf32>
    %cst_21 = arith.constant dense<0.000000e+00> : vector<256x84xf32>
    %31 = tpu.matmul %29, %30, %cst_21 {dimension_numbers = #tpu.dot_dimension_numbers<[1], [0], [0], [1], [0, 0, 1, 1], [], []>} : vector<256x168xf32>, vector<168x84xf32>, vector<256x84xf32> -> vector<256x84xf32>
    %32 = vector.shape_cast %31 : vector<256x84xf32> to vector<8x32x84xf32>
    %c0_22 = arith.constant 0 : index
    %c0_23 = arith.constant 0 : index
    %33 = vector.load %arg5[%c0_22, %c0_23] : memref<16x32xf32, #tpu.memory_space<vmem>>, vector<16x32xf32>
    %34 = vector.shape_cast %33 : vector<16x32xf32> to vector<1x16x32xf32>
    %35 = vector.broadcast %34 : vector<1x16x32xf32> to vector<8x16x32xf32>
    %cst_24 = arith.constant dense<0.000000e+00> : vector<8x16x84xf32>
    %36 = tpu.matmul %35, %32, %cst_24 {dimension_numbers = #tpu.dot_dimension_numbers<[2], [1], [1], [2], [0, 0, 0, 1, 1, 2], [0], [0]>} : vector<8x16x32xf32>, vector<8x32x84xf32>, vector<8x16x84xf32> -> vector<8x16x84xf32>
    %37 = vector.shape_cast %36 : vector<8x16x84xf32> to vector<128x84xf32>
    %cst_25 = arith.constant 0.000000e+00 : f32
    %38 = vector.broadcast %cst_25 : f32 to vector<4x84xf32>
    %39 = tpu.concatenate %37, %38 in 0 : vector<128x84xf32>, vector<4x84xf32> -> vector<132x84xf32>
    %c0_26 = arith.constant 0 : index
    %c0_27 = arith.constant 0 : index
    %c0_28 = arith.constant 0 : index
    %40 = vector.load %arg6[%c0_26, %c0_27, %c0_28] : memref<5x84x160xf32, #tpu.memory_space<vmem>>, vector<1x84x160xf32>
    %41 = vector.shape_cast %40 : vector<1x84x160xf32> to vector<84x160xf32>
    %cst_29 = arith.constant dense<0.000000e+00> : vector<128x160xf32>
    %42 = tpu.matmul %37, %41, %cst_29 {dimension_numbers = #tpu.dot_dimension_numbers<[1], [0], [0], [1], [0, 0, 1, 1], [], []>} : vector<128x84xf32>, vector<84x160xf32>, vector<128x160xf32> -> vector<128x160xf32>
    %43 = vector.extract_strided_slice %39 {offsets = [1, 0], sizes = [128, 84], strides = [1, 1]} : vector<132x84xf32> to vector<128x84xf32>
    %c1_30 = arith.constant 1 : index
    %c0_31 = arith.constant 0 : index
    %c0_32 = arith.constant 0 : index
    %44 = vector.load %arg6[%c1_30, %c0_31, %c0_32] : memref<5x84x160xf32, #tpu.memory_space<vmem>>, vector<1x84x160xf32>
    %45 = vector.shape_cast %44 : vector<1x84x160xf32> to vector<84x160xf32>
    %cst_33 = arith.constant dense<0.000000e+00> : vector<128x160xf32>
    %46 = tpu.matmul %43, %45, %cst_33 {dimension_numbers = #tpu.dot_dimension_numbers<[1], [0], [0], [1], [0, 0, 1, 1], [], []>} : vector<128x84xf32>, vector<84x160xf32>, vector<128x160xf32> -> vector<128x160xf32>
    %47 = arith.addf %42, %46 : vector<128x160xf32>
    %48 = vector.extract_strided_slice %39 {offsets = [2, 0], sizes = [128, 84], strides = [1, 1]} : vector<132x84xf32> to vector<128x84xf32>
    %c2_34 = arith.constant 2 : index
    %c0_35 = arith.constant 0 : index
    %c0_36 = arith.constant 0 : index
    %49 = vector.load %arg6[%c2_34, %c0_35, %c0_36] : memref<5x84x160xf32, #tpu.memory_space<vmem>>, vector<1x84x160xf32>
    %50 = vector.shape_cast %49 : vector<1x84x160xf32> to vector<84x160xf32>
    %cst_37 = arith.constant dense<0.000000e+00> : vector<128x160xf32>
    %51 = tpu.matmul %48, %50, %cst_37 {dimension_numbers = #tpu.dot_dimension_numbers<[1], [0], [0], [1], [0, 0, 1, 1], [], []>} : vector<128x84xf32>, vector<84x160xf32>, vector<128x160xf32> -> vector<128x160xf32>
    %52 = arith.addf %47, %51 : vector<128x160xf32>
    %53 = vector.extract_strided_slice %39 {offsets = [3, 0], sizes = [128, 84], strides = [1, 1]} : vector<132x84xf32> to vector<128x84xf32>
    %c3_38 = arith.constant 3 : index
    %c0_39 = arith.constant 0 : index
    %c0_40 = arith.constant 0 : index
    %54 = vector.load %arg6[%c3_38, %c0_39, %c0_40] : memref<5x84x160xf32, #tpu.memory_space<vmem>>, vector<1x84x160xf32>
    %55 = vector.shape_cast %54 : vector<1x84x160xf32> to vector<84x160xf32>
    %cst_41 = arith.constant dense<0.000000e+00> : vector<128x160xf32>
    %56 = tpu.matmul %53, %55, %cst_41 {dimension_numbers = #tpu.dot_dimension_numbers<[1], [0], [0], [1], [0, 0, 1, 1], [], []>} : vector<128x84xf32>, vector<84x160xf32>, vector<128x160xf32> -> vector<128x160xf32>
    %57 = arith.addf %52, %56 : vector<128x160xf32>
    %58 = vector.extract_strided_slice %39 {offsets = [4, 0], sizes = [128, 84], strides = [1, 1]} : vector<132x84xf32> to vector<128x84xf32>
    %c4_42 = arith.constant 4 : index
    %c0_43 = arith.constant 0 : index
    %c0_44 = arith.constant 0 : index
    %59 = vector.load %arg6[%c4_42, %c0_43, %c0_44] : memref<5x84x160xf32, #tpu.memory_space<vmem>>, vector<1x84x160xf32>
    %60 = vector.shape_cast %59 : vector<1x84x160xf32> to vector<84x160xf32>
    %cst_45 = arith.constant dense<0.000000e+00> : vector<128x160xf32>
    %61 = tpu.matmul %58, %60, %cst_45 {dimension_numbers = #tpu.dot_dimension_numbers<[1], [0], [0], [1], [0, 0, 1, 1], [], []>} : vector<128x84xf32>, vector<84x160xf32>, vector<128x160xf32> -> vector<128x160xf32>
    %62 = arith.addf %57, %61 : vector<128x160xf32>
    %c0_46 = arith.constant 0 : index
    %c0_47 = arith.constant 0 : index
    %63 = vector.load %arg7[%c0_46, %c0_47] : memref<1x160xf32, #tpu.memory_space<vmem>>, vector<1x160xf32>
    %64 = vector.broadcast %63 : vector<1x160xf32> to vector<128x160xf32>
    %65 = arith.addf %62, %64 : vector<128x160xf32>
    %66 = math.tanh %65 : vector<128x160xf32>
    %c0_48 = arith.constant 0 : index
    %c0_49 = arith.constant 0 : index
    %67 = vector.load %arg8[%c0_48, %c0_49] : memref<160x80xf32, #tpu.memory_space<vmem>>, vector<160x80xf32>
    %cst_50 = arith.constant dense<0.000000e+00> : vector<128x80xf32>
    %68 = tpu.matmul %66, %67, %cst_50 {dimension_numbers = #tpu.dot_dimension_numbers<[1], [0], [0], [1], [0, 0, 1, 1], [], []>} : vector<128x160xf32>, vector<160x80xf32>, vector<128x80xf32> -> vector<128x80xf32>
    %69 = vector.shape_cast %68 : vector<128x80xf32> to vector<8x16x80xf32>
    %c0_51 = arith.constant 0 : index
    %c0_52 = arith.constant 0 : index
    %70 = vector.load %arg9[%c0_51, %c0_52] : memref<8x16xf32, #tpu.memory_space<vmem>>, vector<8x16xf32>
    %71 = vector.shape_cast %70 : vector<8x16xf32> to vector<1x8x16xf32>
    %72 = vector.broadcast %71 : vector<1x8x16xf32> to vector<8x8x16xf32>
    %cst_53 = arith.constant dense<0.000000e+00> : vector<8x8x80xf32>
    %73 = tpu.matmul %72, %69, %cst_53 {dimension_numbers = #tpu.dot_dimension_numbers<[2], [1], [1], [2], [0, 0, 0, 1, 1, 2], [0], [0]>} : vector<8x8x16xf32>, vector<8x16x80xf32>, vector<8x8x80xf32> -> vector<8x8x80xf32>
    %74 = vector.extract_strided_slice %73 {offsets = [0, 0, 0], sizes = [8, 1, 80], strides = [1, 1, 1]} : vector<8x8x80xf32> to vector<8x1x80xf32>
    %75 = vector.shape_cast %74 : vector<8x1x80xf32> to vector<8x80xf32>
    %c0_54 = arith.constant 0 : index
    %c0_55 = arith.constant 0 : index
    %c0_56 = arith.constant 0 : index
    %76 = vector.load %arg10[%c0_54, %c0_55, %c0_56] : memref<5x80x120xf32, #tpu.memory_space<vmem>>, vector<1x80x120xf32>
    %77 = vector.shape_cast %76 : vector<1x80x120xf32> to vector<80x120xf32>
    %cst_57 = arith.constant dense<0.000000e+00> : vector<8x120xf32>
    %78 = tpu.matmul %75, %77, %cst_57 {dimension_numbers = #tpu.dot_dimension_numbers<[1], [0], [0], [1], [0, 0, 1, 1], [], []>} : vector<8x80xf32>, vector<80x120xf32>, vector<8x120xf32> -> vector<8x120xf32>
    %79 = vector.extract_strided_slice %73 {offsets = [0, 1, 0], sizes = [8, 1, 80], strides = [1, 1, 1]} : vector<8x8x80xf32> to vector<8x1x80xf32>
    %80 = vector.shape_cast %79 : vector<8x1x80xf32> to vector<8x80xf32>
    %c1_58 = arith.constant 1 : index
    %c0_59 = arith.constant 0 : index
    %c0_60 = arith.constant 0 : index
    %81 = vector.load %arg10[%c1_58, %c0_59, %c0_60] : memref<5x80x120xf32, #tpu.memory_space<vmem>>, vector<1x80x120xf32>
    %82 = vector.shape_cast %81 : vector<1x80x120xf32> to vector<80x120xf32>
    %cst_61 = arith.constant dense<0.000000e+00> : vector<8x120xf32>
    %83 = tpu.matmul %80, %82, %cst_61 {dimension_numbers = #tpu.dot_dimension_numbers<[1], [0], [0], [1], [0, 0, 1, 1], [], []>} : vector<8x80xf32>, vector<80x120xf32>, vector<8x120xf32> -> vector<8x120xf32>
    %84 = arith.addf %78, %83 : vector<8x120xf32>
    %85 = vector.extract_strided_slice %73 {offsets = [0, 2, 0], sizes = [8, 1, 80], strides = [1, 1, 1]} : vector<8x8x80xf32> to vector<8x1x80xf32>
    %86 = vector.shape_cast %85 : vector<8x1x80xf32> to vector<8x80xf32>
    %c2_62 = arith.constant 2 : index
    %c0_63 = arith.constant 0 : index
    %c0_64 = arith.constant 0 : index
    %87 = vector.load %arg10[%c2_62, %c0_63, %c0_64] : memref<5x80x120xf32, #tpu.memory_space<vmem>>, vector<1x80x120xf32>
    %88 = vector.shape_cast %87 : vector<1x80x120xf32> to vector<80x120xf32>
    %cst_65 = arith.constant dense<0.000000e+00> : vector<8x120xf32>
    %89 = tpu.matmul %86, %88, %cst_65 {dimension_numbers = #tpu.dot_dimension_numbers<[1], [0], [0], [1], [0, 0, 1, 1], [], []>} : vector<8x80xf32>, vector<80x120xf32>, vector<8x120xf32> -> vector<8x120xf32>
    %90 = arith.addf %84, %89 : vector<8x120xf32>
    %91 = vector.extract_strided_slice %73 {offsets = [0, 3, 0], sizes = [8, 1, 80], strides = [1, 1, 1]} : vector<8x8x80xf32> to vector<8x1x80xf32>
    %92 = vector.shape_cast %91 : vector<8x1x80xf32> to vector<8x80xf32>
    %c3_66 = arith.constant 3 : index
    %c0_67 = arith.constant 0 : index
    %c0_68 = arith.constant 0 : index
    %93 = vector.load %arg10[%c3_66, %c0_67, %c0_68] : memref<5x80x120xf32, #tpu.memory_space<vmem>>, vector<1x80x120xf32>
    %94 = vector.shape_cast %93 : vector<1x80x120xf32> to vector<80x120xf32>
    %cst_69 = arith.constant dense<0.000000e+00> : vector<8x120xf32>
    %95 = tpu.matmul %92, %94, %cst_69 {dimension_numbers = #tpu.dot_dimension_numbers<[1], [0], [0], [1], [0, 0, 1, 1], [], []>} : vector<8x80xf32>, vector<80x120xf32>, vector<8x120xf32> -> vector<8x120xf32>
    %96 = arith.addf %90, %95 : vector<8x120xf32>
    %97 = vector.extract_strided_slice %73 {offsets = [0, 4, 0], sizes = [8, 1, 80], strides = [1, 1, 1]} : vector<8x8x80xf32> to vector<8x1x80xf32>
    %98 = vector.shape_cast %97 : vector<8x1x80xf32> to vector<8x80xf32>
    %c4_70 = arith.constant 4 : index
    %c0_71 = arith.constant 0 : index
    %c0_72 = arith.constant 0 : index
    %99 = vector.load %arg10[%c4_70, %c0_71, %c0_72] : memref<5x80x120xf32, #tpu.memory_space<vmem>>, vector<1x80x120xf32>
    %100 = vector.shape_cast %99 : vector<1x80x120xf32> to vector<80x120xf32>
    %cst_73 = arith.constant dense<0.000000e+00> : vector<8x120xf32>
    %101 = tpu.matmul %98, %100, %cst_73 {dimension_numbers = #tpu.dot_dimension_numbers<[1], [0], [0], [1], [0, 0, 1, 1], [], []>} : vector<8x80xf32>, vector<80x120xf32>, vector<8x120xf32> -> vector<8x120xf32>
    %102 = arith.addf %96, %101 : vector<8x120xf32>
    %c0_74 = arith.constant 0 : index
    %c0_75 = arith.constant 0 : index
    %103 = vector.load %arg11[%c0_74, %c0_75] : memref<1x120xf32, #tpu.memory_space<vmem>>, vector<1x120xf32>
    %104 = vector.broadcast %103 : vector<1x120xf32> to vector<8x120xf32>
    %105 = arith.addf %102, %104 : vector<8x120xf32>
    %106 = math.tanh %105 : vector<8x120xf32>
    %c0_76 = arith.constant 0 : index
    %c0_77 = arith.constant 0 : index
    %107 = vector.load %arg12[%c0_76, %c0_77] : memref<120x84xf32, #tpu.memory_space<vmem>>, vector<120x84xf32>
    %cst_78 = arith.constant dense<0.000000e+00> : vector<8x84xf32>
    %108 = tpu.matmul %106, %107, %cst_78 {dimension_numbers = #tpu.dot_dimension_numbers<[1], [0], [0], [1], [0, 0, 1, 1], [], []>} : vector<8x120xf32>, vector<120x84xf32>, vector<8x84xf32> -> vector<8x84xf32>
    %c0_79 = arith.constant 0 : index
    %c0_80 = arith.constant 0 : index
    %109 = vector.load %arg13[%c0_79, %c0_80] : memref<1x84xf32, #tpu.memory_space<vmem>>, vector<1x84xf32>
    %110 = vector.broadcast %109 : vector<1x84xf32> to vector<8x84xf32>
    %111 = arith.addf %108, %110 : vector<8x84xf32>
    %112 = math.tanh %111 : vector<8x84xf32>
    %c0_81 = arith.constant 0 : index
    %c0_82 = arith.constant 0 : index
    %113 = vector.load %arg14[%c0_81, %c0_82] : memref<84x10xf32, #tpu.memory_space<vmem>>, vector<84x10xf32>
    %cst_83 = arith.constant dense<0.000000e+00> : vector<8x10xf32>
    %114 = tpu.matmul %112, %113, %cst_83 {dimension_numbers = #tpu.dot_dimension_numbers<[1], [0], [0], [1], [0, 0, 1, 1], [], []>} : vector<8x84xf32>, vector<84x10xf32>, vector<8x10xf32> -> vector<8x10xf32>
    %c0_84 = arith.constant 0 : index
    %c0_85 = arith.constant 0 : index
    %115 = vector.load %arg15[%c0_84, %c0_85] : memref<1x10xf32, #tpu.memory_space<vmem>>, vector<1x10xf32>
    %116 = vector.broadcast %115 : vector<1x10xf32> to vector<8x10xf32>
    %117 = arith.addf %114, %116 : vector<8x10xf32>
    %c0_86 = arith.constant 0 : index
    %c0_87 = arith.constant 0 : index
    %118 = vector.load %arg16[%c0_86, %c0_87] : memref<8x10xf32, #tpu.memory_space<vmem>>, vector<8x10xf32>
    tpu.vector_store %arg16[%c0_86, %c0_87], %117 {strides = array<i32>} : memref<8x10xf32, #tpu.memory_space<vmem>>, vector<8x10xf32>,
    return
  }
  func.func @transform_0(%arg0: i32) -> (i32, i32) {
    %c0_i32 = arith.constant 0 : i32
    %c0_i32_0 = arith.constant 0 : i32
    return %arg0, %c0_i32 : i32, i32
  }
  func.func @transform_1(%arg0: i32) -> (i32, i32, i32) {
    %c0_i32 = arith.constant 0 : i32
    %c0_i32_0 = arith.constant 0 : i32
    %c0_i32_1 = arith.constant 0 : i32
    %c0_i32_2 = arith.constant 0 : i32
    return %c0_i32, %c0_i32_0, %c0_i32_1 : i32, i32, i32
  }
  func.func @transform_2(%arg0: i32) -> (i32, i32) {
    %c0_i32 = arith.constant 0 : i32
    %c0_i32_0 = arith.constant 0 : i32
    %c0_i32_1 = arith.constant 0 : i32
    return %c0_i32, %c0_i32_0 : i32, i32
  }
  func.func @transform_3(%arg0: i32) -> (i32, i32) {
    %c0_i32 = arith.constant 0 : i32
    %c0_i32_0 = arith.constant 0 : i32
    %c0_i32_1 = arith.constant 0 : i32
    return %c0_i32, %c0_i32_0 : i32, i32
  }
  func.func @transform_4(%arg0: i32) -> (i32, i32) {
    %c0_i32 = arith.constant 0 : i32
    %c0_i32_0 = arith.constant 0 : i32
    %c0_i32_1 = arith.constant 0 : i32
    return %c0_i32, %c0_i32_0 : i32, i32
  }
  func.func @transform_5(%arg0: i32) -> (i32, i32, i32) {
    %c0_i32 = arith.constant 0 : i32
    %c0_i32_0 = arith.constant 0 : i32
    %c0_i32_1 = arith.constant 0 : i32
    %c0_i32_2 = arith.constant 0 : i32
    return %c0_i32, %c0_i32_0, %c0_i32_1 : i32, i32, i32
  }
  func.func @transform_6(%arg0: i32) -> (i32, i32) {
    %c0_i32 = arith.constant 0 : i32
    %c0_i32_0 = arith.constant 0 : i32
    %c0_i32_1 = arith.constant 0 : i32
    return %c0_i32, %c0_i32_0 : i32, i32
  }
  func.func @transform_7(%arg0: i32) -> (i32, i32) {
    %c0_i32 = arith.constant 0 : i32
    %c0_i32_0 = arith.constant 0 : i32
    %c0_i32_1 = arith.constant 0 : i32
    return %c0_i32, %c0_i32_0 : i32, i32
  }
  func.func @transform_8(%arg0: i32) -> (i32, i32) {
    %c0_i32 = arith.constant 0 : i32
    %c0_i32_0 = arith.constant 0 : i32
    %c0_i32_1 = arith.constant 0 : i32
    return %c0_i32, %c0_i32_0 : i32, i32
  }
  func.func @transform_9(%arg0: i32) -> (i32, i32, i32) {
    %c0_i32 = arith.constant 0 : i32
    %c0_i32_0 = arith.constant 0 : i32
    %c0_i32_1 = arith.constant 0 : i32
    %c0_i32_2 = arith.constant 0 : i32
    return %c0_i32, %c0_i32_0, %c0_i32_1 : i32, i32, i32
  }
  func.func @transform_10(%arg0: i32) -> (i32, i32) {
    %c0_i32 = arith.constant 0 : i32
    %c0_i32_0 = arith.constant 0 : i32
    %c0_i32_1 = arith.constant 0 : i32
    return %c0_i32, %c0_i32_0 : i32, i32
  }
  func.func @transform_11(%arg0: i32) -> (i32, i32) {
    %c0_i32 = arith.constant 0 : i32
    %c0_i32_0 = arith.constant 0 : i32
    %c0_i32_1 = arith.constant 0 : i32
    return %c0_i32, %c0_i32_0 : i32, i32
  }
  func.func @transform_12(%arg0: i32) -> (i32, i32) {
    %c0_i32 = arith.constant 0 : i32
    %c0_i32_0 = arith.constant 0 : i32
    %c0_i32_1 = arith.constant 0 : i32
    return %c0_i32, %c0_i32_0 : i32, i32
  }
  func.func @transform_13(%arg0: i32) -> (i32, i32) {
    %c0_i32 = arith.constant 0 : i32
    %c0_i32_0 = arith.constant 0 : i32
    %c0_i32_1 = arith.constant 0 : i32
    return %c0_i32, %c0_i32_0 : i32, i32
  }
  func.func @transform_14(%arg0: i32) -> (i32, i32) {
    %c0_i32 = arith.constant 0 : i32
    %c0_i32_0 = arith.constant 0 : i32
    %c0_i32_1 = arith.constant 0 : i32
    return %c0_i32, %c0_i32_0 : i32, i32
  }
  func.func @transform_15(%arg0: i32) -> (i32, i32) {
    %c0_i32 = arith.constant 0 : i32
    %c0_i32_0 = arith.constant 0 : i32
    return %arg0, %c0_i32 : i32, i32
  }
}

</mosaic_0001>

<bundles_post_ra>
// kernel: lenet_forward.1
= control target key start
LH: loop header
LB: loop body
LE: loop exit
PB: predicated region body
PF: predicated region fallthrough
CT: control target
= control target key end

     0   :  { %20 = vsyncpa [#allocation3], 0  ;;  %s11976_s0 = inlined_call_operand.vmem [shape: f32[512,96], index: 0, kind: input, shape index: {}]   ;;  %s11977_s1 = inlined_call_operand.vmem [shape: f32[5,96,168], index: 1, kind: input, shape index: {}]   ;;  %s11978_s2 = inlined_call_operand.vmem [shape: f32[1,168], index: 2, kind: input, shape index: {}]   ;;  %s11979_s3 = inlined_call_operand.vmem [shape: f32[168,84], index: 3, kind: input, shape index: {}]   ;;  %s11980_s4 = inlined_call_operand.vmem [shape: f32[16,32], index: 4, kind: input, shape index: {}]   ;;  %s11981_s5 = inlined_call_operand.vmem [shape: f32[5,84,160], index: 5, kind: input, shape index: {}]   ;;  %s11982_s6 = inlined_call_operand.vmem [shape: f32[1,160], index: 6, kind: input, shape index: {}]   ;;  %s11983_s7 = inlined_call_operand.vmem [shape: f32[160,80], index: 7, kind: input, shape index: {}]   ;;  %s11984_s8 = inlined_call_operand.vmem [shape: f32[8,16], index: 8, kind: input, shape index: {}]   ;;  %s11985_s9 = inlined_call_operand.vmem [shape: f32[5,80,120], index: 9, kind: input, shape index: {}]   ;;  %s11986_s10 = inlined_call_operand.vmem [shape: f32[1,120], index: 10, kind: input, shape index: {}]   ;;  %s11987_s11 = inlined_call_operand.vmem [shape: f32[120,84], index: 11, kind: input, shape index: {}]   ;;  %s11988_s12 = inlined_call_operand.vmem [shape: f32[1,84], index: 12, kind: input, shape index: {}]   ;;  %s11989_s13 = inlined_call_operand.vmem [shape: f32[84,10], index: 13, kind: input, shape index: {}]   ;;  %s11990_s14 = inlined_call_operand.vmem [shape: f32[1,10], index: 14, kind: input, shape index: {}]   ;;  %s11991_s15 = inlined_call_operand.hbm [shape: f32[16,10], index: 15, kind: output, shape index: {}]  }
   0x1   :  { %22 = vsyncpa [#allocation3 + $0x1], 0  ;;  %s8274_s18 = smov 0   ;;  %s8276_s19 = smov 0  }
   0x2   :  { %s8278_s20 = smov 0   ;;  %s8280_s21 = smov 0  }
   0x3 LB: > { %12007 = sst [smem:[#allocation5_spill]] %s8177_s18  ;;  %s8295_s22 = sadd.s32 4294967295, %s8189_s21   ;;  %s8189_s21 = sphi %s8280_s21, %s12337_s21   ;;  %s8185_s20 = sphi %s8278_s20, %s12339_s20   ;;  %s8181_s19 = sphi %s8276_s19, %s12341_s19   ;;  %s8177_s18 = sphi %s8274_s18, %s12340_s18  }
   0x4   : > { %12008 = sst [smem:[#allocation6_spill]] %s8185_s20  ;;  %s6820_s23 = sadd.s32 4294967294, %s8189_s21  }
   0x5   : > { %12009 = sst [smem:[#allocation7_spill]] %s8189_s21  ;;  %s8299_s24 = sadd.s32 1, %s8189_s21  }
   0x6   : > { %12010 = sst [smem:[#allocation8_spill]] %s8299_s24  ;;  %s355_s25 = sadd.s32 1, %s8185_s20 }
   0x7   : > { %s352_s26 = ssub.s32 %s8189_s21, %s8299_s24  ;;  %p365_p0 = scmp.ne.s32.totalorder %s8185_s20, %s8181_s19 }
   0x8   : > { %p353_p1 = scmp.eq.s32.totalorder %s352_s26, 0  ;;  %p366_p2 = scmp.eq.s32.totalorder %s8295_s22, 1 }
   0x9   : > { %p371_p3 = scmp.ne.s32.totalorder %s8181_s19, %s8177_s18  ;;  %p372_p4 = scmp.eq.s32.totalorder %s6820_s23, 1 }
   0xa   : > { %s8310_s27 = scalar_select %p353_p1, %s8185_s20, %s355_s25  }
   0xb   : > { %p8312_p5 = por %p366_p2, %p365_p0  ;;  %p8316_p6 = por %p372_p4, %p371_p3 }
   0xc   : > { %12011 = sst [smem:[#allocation9_spill]] %s8310_s27  ;;  %p6823_p7 = scmp.ge.s32.totalorder %s8189_s21, 1 }
   0xd   : > { %s12013_s29 = scalar_select %p8316_p6, 1, 0 }
   0xe   : > { %p441_p8 = scmp.lt.s32.totalorder %s8189_s21, 3 }
   0xf   : > { %12014 = sst [smem:[#allocation10_spill]] %s12013_s29 }
  0x10   : > { %p442_p9 = pnand %p6823_p7, %p441_p8 }
  0x12   : > { %445 = sbr.rel (%p442_p9) target bundleno = 2452 (0x994), region = 80 }
  0x17   : > { %v6850_v0 = vld [vmem:[%s11977_s1 + $0x178] sm:$0xff]  ;;  %v6849_v2 = vld [vmem:[%s11977_s1 + $0x170] sm:$0xff]  ;;  %s6825_s27 = sshll.u32 %s8295_s22, 5  ;;  %v6848_v4 = vld [vmem:[%s11977_s1 + $0x168] sm:$0xff]  ;;  %vm609_vm0 = vcmask 1046528   ;;  %vm675_vm1 = vcmask 785408  }
  0x18   : > { %v550_v1 = vld [vmem:[%s11977_s1 + $0xb8] sm:$0xff]  ;;  %748 = vmatprep.subr.mxu0 %v6850_v0  ;;  %v549_v3 = vld [vmem:[%s11977_s1 + $0xb0] sm:$0xff]  ;;  %v548_v5 = vld [vmem:[%s11977_s1 + $0xa8] sm:$0xff]  ;;  %p8350_p10 = scmp.lt.s32.totalorder %s6825_s27, 63  ;;  %v12001_v55 = vmov 0.0   ;;  %vm1343_vm2 = vcmask 1045504  }
  0x19   : > { %1069 = vmatprep.subr.mxu1 %v550_v1  ;;  %749 = vmatpush1.msra.mxu0 %v6849_v2  ;;  %v6847_v6 = vld [vmem:[%s11977_s1 + $0x160] sm:$0xff]  ;;  %v6846_v8 = vld [vmem:[%s11977_s1 + $0x158] sm:$0xff]  ;;  %v6845_v10 = vld [vmem:[%s11977_s1 + $0x150] sm:$0xff]  ;;  %vm1819_vm3 = vcmask 1044480   ;;  %vm2295_vm4 = vcmask 1043456   ;;  %vm2907_vm5 = vcmask 326656  }
  0x1a   : > { %1070 = vmatpush1.msra.mxu1 %v549_v3  ;;  %v547_v7 = vld [vmem:[%s11977_s1 + $0xa0] sm:$0xff]  ;;  %750 = vmatprep.subr.mxu0 %v6848_v4  ;;  %v546_v9 = vld [vmem:[%s11977_s1 + $0x98] sm:$0xff]  ;;  %v545_v11 = vld [vmem:[%s11977_s1 + $0x90] sm:$0xff]  ;;  %s12343_s27 = smov (!%p8350_p10, %s6825_s27), 63  ;;  %vm3231_vm6 = vcmask 261120   ;;  %vm3931_vm7 = vcmask 687104  }
  0x1b   : > { %1071 = vmatprep.subr.mxu1 %v548_v5  ;;  %751 = vmatpush1.msra.mxu0 %v6847_v6  ;;  %v6844_v12 = vld [vmem:[%s11977_s1 + $0x148] sm:$0xff]  ;;  %v6843_v14 = vld [vmem:[%s11977_s1 + $0x140] sm:$0xff]  ;;  %v6842_v16 = vld [vmem:[%s11977_s1 + $0x138] sm:$0xff]  ;;  %s6826_s17 = sshll.u32 %s12343_s27, 3  ;;  %vm8192_vm8 = vmmov 0   ;;  %vm5478_vm9 = vcmask 130048  }
  0x1c   : > { %1072 = vmatpush1.msra.mxu1 %v547_v7  ;;  %v544_v13 = vld [vmem:[%s11977_s1 + $0x88] sm:$0xff]  ;;  %752 = vmatprep.subr.mxu0 %v6846_v8  ;;  %v543_v15 = vld [vmem:[%s11977_s1 + $0x80] sm:$0xff]  ;;  %v542_v17 = vld [vmem:[%s11977_s1 + $0x78] sm:$0xff]  ;;  %s8431_s26 = scalar_lea.vmem %s11976_s0, %s6826_s17  ;;  %vm6072_vm10 = vcmask 1041409   ;;  %vm6075_vm11 = vcmask 1042434   ;;  %vm6078_vm12 = vcmask 1043459  }
  0x1d   : > { %1073 = vmatprep.subr.mxu1 %v546_v9  ;;  %753 = vmatpush1.msra.mxu0 %v6845_v10  ;;  %v6841_v18 = vld [vmem:[%s11977_s1 + $0x130] sm:$0xff]  ;;  %v6840_v20 = vld [vmem:[%s11977_s1 + $0x128] sm:$0xff]  ;;  %v6839_v22 = vld [vmem:[%s11977_s1 + $0x120] sm:$0xff]  ;;  %vm6081_vm13 = vcmask 1044484   ;;  %vm6084_vm14 = vcmask 1045509   ;;  %vm6087_vm15 = vcmask 1046534  }
  0x1e   : > { %1074 = vmatpush1.msra.mxu1 %v545_v11  ;;  %754 = vmatprep.subr.mxu0 %v6844_v12  ;;  %v541_v19 = vld [vmem:[%s11977_s1 + $0x70] sm:$0xff]  ;;  %v540_v21 = vld [vmem:[%s11977_s1 + $0x68] sm:$0xff]  ;;  %v539_v23 = vld [vmem:[%s11977_s1 + $0x60] sm:$0xff]  ;;  %s486_s29 = sand.u32 1, %s8181_s19   ;;  %s7385_s16 = sshll.u32 %s8295_s22, 7 }
  0x1f   : > { %1075 = vmatprep.subr.mxu1 %v544_v13  ;;  %755 = vmatpush1.msra.mxu0 %v6843_v14  ;;  %v6838_v24 = vld [vmem:[%s11977_s1 + $0x118] sm:$0xff]  ;;  %v6837_v26 = vld [vmem:[%s11977_s1 + $0x110] sm:$0xff]  ;;  %v6836_v28 = vld [vmem:[%s11977_s1 + $0x108] sm:$0xff]  ;;  %s6824_s27 = sshll.u32 %s486_s29, 3  ;;  %s11941_s20 = scalar_lea.hbm %s11991_s15, %s7385_s16 }
  0x20   : > { %1076 = vmatpush1.msra.mxu1 %v543_v15  ;;  %756 = vmatprep.subr.mxu0 %v6842_v16  ;;  %v538_v25 = vld [vmem:[%s11977_s1 + $0x58] sm:$0xff]  ;;  %v537_v27 = vld [vmem:[%s11977_s1 + $0x50] sm:$0xff]  ;;  %v536_v29 = vld [vmem:[%s11977_s1 + $0x48] sm:$0xff]  ;;  %s488_s18 = scalar_lea.vmem [#allocation2], %s6824_s27  ;;  %s6748_s21 = scalar_lea.sflag [#allocation3], %s486_s29 }
  0x21   : > { %1077 = vmatprep.subr.mxu1 %v542_v17  ;;  %757 = vmatpush1.msra.mxu0 %v6841_v18  ;;  %v6835_v30 = vld [vmem:[%s11977_s1 + $0x100] sm:$0xff]  ;;  %v6834_v32 = vld [vmem:[%s11977_s1 + $0xf8] sm:$0xff]  ;;  %v6833_v34 = vld [vmem:[%s11977_s1 + $0xf0] sm:$0xff]  ;;  %s8193_s22 = smov [#allocation2]  }
  0x22   : > { %1078 = vmatpush1.msra.mxu1 %v541_v19  ;;  %758 = vmatprep.subr.mxu0 %v6840_v20  ;;  %v535_v31 = vld [vmem:[%s11977_s1 + $0x40] sm:$0xff]  ;;  %v534_v33 = vld [vmem:[%s11977_s1 + $0x38] sm:$0xff]  ;;  %v533_v35 = vld [vmem:[%s11977_s1 + $0x30] sm:$0xff]  ;;  %s8133_s27 = sshll.u32 %s8193_s22, 4  ;;  %s8134_s27 = int_to_ptr.vmem [resolvable:$false] %s8133_s27 }
  0x23   : > { %1079 = vmatprep.subr.mxu1 %v540_v21  ;;  %759 = vmatpush1.msra.mxu0 %v6839_v22  ;;  %v6832_v36 = vld [vmem:[%s11977_s1 + $0xe8] sm:$0xff]  ;;  %v8452_v38 = vld [vmem:[%s8431_s26] sm:$0xff]  ;;  %v6830_v42 = vld [vmem:[%s11977_s1 + $0xd8] sm:$0xff]  ;;  %s8135_s30 = scalar_lea.vmem %s8134_s27, 256 }
  0x24   : > { %1080 = vmatpush1.msra.mxu1 %v539_v23  ;;  %760 = vmatprep.subr.mxu0 %v6838_v24  ;;  %v532_v37 = vld [vmem:[%s11977_s1 + $0x28] sm:$0xff]  ;;  %v6831_v40 = vld [vmem:[%s11977_s1 + $0xe0] sm:$0xff]  ;;  %v530_v43 = vld [vmem:[%s11977_s1 + $0x18] sm:$0xff]  ;;  %v610_v46 = vrot.slane %v8452_v38, 1 }
  0x25   : > { %1081 = vmatprep.subr.mxu1 %v538_v25  ;;  %761 = vmatpush1.msra.mxu0 %v6837_v26  ;;  %v8455_v39 = vld [vmem:[%s8431_s26 + $0x8] sm:$0xff]  ;;  %v531_v41 = vld [vmem:[%s11977_s1 + $0x20] sm:$0xff]  ;;  %v6829_v44 = vld [vmem:[%s11977_s1 + $0xd0] sm:$0xff] }
  0x26   : > { %1082 = vmatpush1.msra.mxu1 %v537_v27  ;;  %762 = vmatprep.subr.mxu0 %v6836_v28  ;;  %v529_v45 = vld [vmem:[%s11977_s1 + $0x10] sm:$0xff]  ;;  %v611_v47 = vrot.slane %v8455_v39, 1  ;;  %v6828_v48 = vld [vmem:[%s11977_s1 + $0xc8] sm:$0xff]  ;;  %v6827_v51 = vld [vmem:[%s11977_s1 + $0xc0] sm:$0xff] }
  0x27   : > { %1083 = vmatprep.subr.mxu1 %v536_v29  ;;  %763 = vmatpush1.msra.mxu0 %v6835_v30  ;;  %v528_v49 = vld [vmem:[%s11977_s1 + $0x8] sm:$0xff]  ;;  %v8484_v50 = vld [vmem:[%s8431_s26 + $0x10] sm:$0xff]  ;;  %v527_v52 = vld [vmem:[%s11977_s1] sm:$0xff] }
  0x28   : > { %1084 = vmatpush1.msra.mxu1 %v535_v31  ;;  %764 = vmatprep.subr.mxu0 %v6834_v32  ;;  %v612_v53 = vsel %vm609_vm0, %v610_v46, %v611_v47  ;;  %v613_v54 = vrot.slane %v8484_v50, 1  ;;  %v8496_v56 = vld [vmem:[%s8431_s26 + $0x18] sm:$0xff]  ;;  %v6937_v58 = vld [vmem:[%s11977_s1 + $0x230] sm:$0xff]  ;;  %v8519_v63 = vld [vmem:[%s8431_s26 + $0x20] sm:$0xff] }
  0x29   : > { %1085 = vmatprep.subr.mxu1 %v534_v33  ;;  %765 = vmatpush1.msra.mxu0 %v6833_v34  ;;  %v6938_v57 = vld [vmem:[%s11977_s1 + $0x238] sm:$0xff]  ;;  %v615_v60 = vrot.slane %v8496_v56, 1  ;;  %v6993_v62 = vld [vmem:[%s11977_s1 + $0x2f0] sm:$0xff]  ;;  %v6936_v0 = vld [vmem:[%s11977_s1 + $0x228] sm:$0xff]  ;;  %v617_v5 = vrot.slane %v8519_v63, 1 }
  0x2a   : > { %1086 = vmatpush1.msra.mxu1 %v533_v35  ;;  %766 = vmatprep.subr.mxu0 %v6832_v36  ;;  %v614_v59 = vsel %vm609_vm0, %v611_v47, %v613_v54  ;;  %v6994_v61 = vld [vmem:[%s11977_s1 + $0x2f8] sm:$0xff]  ;;  %v6992_v1 = vld [vmem:[%s11977_s1 + $0x2e8] sm:$0xff]  ;;  %v6935_v2 = vld [vmem:[%s11977_s1 + $0x220] sm:$0xff] }
  0x2b   : > { %1087 = vmatprep.subr.mxu1 %v532_v37  ;;  %767 = vmatpush1.msra.mxu0 %v6831_v40  ;;  %v6991_v3 = vld [vmem:[%s11977_s1 + $0x2e0] sm:$0xff]  ;;  %v616_v4 = vsel %vm609_vm0, %v613_v54, %v615_v60  ;;  %v8541_v6 = vld [vmem:[%s8431_s26 + $0x28] sm:$0xff]  ;;  %v6934_v7 = vld [vmem:[%s11977_s1 + $0x218] sm:$0xff]  ;;  %v618_v11 = vsel %vm609_vm0, %v615_v60, %v617_v5 }
  0x2c   : > { %1088 = vmatpush1.msra.mxu1 %v531_v41  ;;  %768 = vmatprep.subr.mxu0 %v6830_v42  ;;  %v6990_v8 = vld [vmem:[%s11977_s1 + $0x2d8] sm:$0xff]  ;;  %v6933_v9 = vld [vmem:[%s11977_s1 + $0x210] sm:$0xff]  ;;  %v619_v12 = vrot.slane %v8541_v6, 1  ;;  %v6932_v14 = vld [vmem:[%s11977_s1 + $0x208] sm:$0xff] }
  0x2d   : > { %1089 = vmatprep.subr.mxu1 %v530_v43  ;;  %769 = vmatpush1.msra.mxu0 %v6829_v44  ;;  %v6989_v10 = vld [vmem:[%s11977_s1 + $0x2d0] sm:$0xff]  ;;  %v6988_v15 = vld [vmem:[%s11977_s1 + $0x2c8] sm:$0xff]  ;;  %v6931_v16 = vld [vmem:[%s11977_s1 + $0x200] sm:$0xff] }
  0x2e   : > { %1090 = vmatpush1.msra.mxu1 %v529_v45  ;;  %770 = vmatprep.subr.mxu0 %v6828_v48  ;;  %v8563_v13 = vld [vmem:[%s8431_s26 + $0x30] sm:$0xff]  ;;  %v6987_v17 = vld [vmem:[%s11977_s1 + $0x2c0] sm:$0xff]  ;;  %v620_v18 = vsel %vm609_vm0, %v617_v5, %v619_v12  ;;  %v8585_v20 = vld [vmem:[%s8431_s26 + $0x38] sm:$0xff] }
  0x2f   : > { %1091 = vmatprep.subr.mxu1 %v528_v49  ;;  %771 = vmatpush1.msra.mxu0 %v6827_v51  ;;  %v621_v19 = vrot.slane %v8563_v13, 1  ;;  %v6930_v21 = vld [vmem:[%s11977_s1 + $0x1f8] sm:$0xff]  ;;  %v6929_v23 = vld [vmem:[%s11977_s1 + $0x1f0] sm:$0xff]  ;;  %v623_v26 = vrot.slane %v8585_v20, 1  ;;  %v8607_v27 = vld [vmem:[%s8431_s26 + $0x40] sm:$0xff] }
  0x30   : > { %804 = vmatprep.mubr.f32.mxu0 %v12001_v55  ;;  %1092 = vmatpush1.msra.mxu1 %v527_v52  ;;  %v6986_v22 = vld [vmem:[%s11977_s1 + $0x2b8] sm:$0xff]  ;;  %v6985_v24 = vld [vmem:[%s11977_s1 + $0x2b0] sm:$0xff]  ;;  %v6928_v28 = vld [vmem:[%s11977_s1 + $0x1e8] sm:$0xff]  ;;  %v625_v33 = vrot.slane %v8607_v27, 1 }
  0x31   : > { %1125 = vmatprep.mubr.f32.mxu1 %v12001_v55  ;;  %6851 = vmatmul.mubr.msk.f32.vlgmr.msra.gmra.mxu0 %vm675_vm1, %v612_v53  ;;  %v622_v25 = vsel %vm609_vm0, %v619_v12, %v621_v19  ;;  %v6984_v29 = vld [vmem:[%s11977_s1 + $0x2a8] sm:$0xff]  ;;  %v6927_v30 = vld [vmem:[%s11977_s1 + $0x1e0] sm:$0xff]  ;;  %v624_v32 = vsel %vm609_vm0, %v621_v19, %v623_v26  ;;  %v6926_v35 = vld [vmem:[%s11977_s1 + $0x1d8] sm:$0xff] }
  0x32   : > { %6883 = vmatmul.mubr.msk.f32.vlgmr.msra.gmra.mxu1 %vm675_vm1, %v8452_v38  ;;  %810 = vmatprep.mubr.f32.mxu0 %v12001_v55  ;;  %v6983_v31 = vld [vmem:[%s11977_s1 + $0x2a0] sm:$0xff]  ;;  %v8629_v34 = vld [vmem:[%s8431_s26 + $0x48] sm:$0xff]  ;;  %v6982_v36 = vld [vmem:[%s11977_s1 + $0x298] sm:$0xff]  ;;  %v626_v41 = vsel %vm609_vm0, %v623_v26, %v625_v33 }
  0x33   : > { %1131 = vmatprep.mubr.f32.mxu1 %v12001_v55  ;;  %1481 = vmatprep.subr.mxu0 %v6938_v57  ;;  %v6925_v37 = vld [vmem:[%s11977_s1 + $0x1d0] sm:$0xff]  ;;  %v627_v42 = vrot.slane %v8629_v34, 1  ;;  %v6924_v44 = vld [vmem:[%s11977_s1 + $0x1c8] sm:$0xff]  ;;  %v6923_v46 = vld [vmem:[%s11977_s1 + $0x1c0] sm:$0xff] }
  0x34   : > { %1957 = vmatprep.subr.mxu1 %v6994_v61  ;;  %1482 = vmatpush1.msra.mxu0 %v6937_v58  ;;  %v6981_v40 = vld [vmem:[%s11977_s1 + $0x290] sm:$0xff]  ;;  %v6980_v45 = vld [vmem:[%s11977_s1 + $0x288] sm:$0xff]  ;;  %v6979_v47 = vld [vmem:[%s11977_s1 + $0x280] sm:$0xff] }
  0x35   : > { %1958 = vmatpush1.msra.mxu1 %v6993_v62  ;;  %6852 = vmatmul.mubr.msk.f32.gmra.mxu0 %vm675_vm1, %v614_v59  ;;  %v8651_v43 = vld [vmem:[%s8431_s26 + $0x50] sm:$0xff]  ;;  %v628_v48 = vsel %vm609_vm0, %v625_v33, %v627_v42  ;;  %v8673_v51 = vld [vmem:[%s8431_s26 + $0x58] sm:$0xff]  ;;  %v8695_v60 = vld [vmem:[%s8431_s26 + $0x60] sm:$0xff] }
  0x36   : > { %6884 = vmatmul.mubr.msk.f32.gmra.mxu1 %vm675_vm1, %v8455_v39  ;;  %816 = vmatprep.mubr.f32.mxu0 %v12001_v55  ;;  %v629_v49 = vrot.slane %v8651_v43, 1  ;;  %v6922_v52 = vld [vmem:[%s11977_s1 + $0x1b8] sm:$0xff]  ;;  %v6921_v54 = vld [vmem:[%s11977_s1 + $0x1b0] sm:$0xff]  ;;  %v631_v59 = vrot.slane %v8673_v51, 1  ;;  %v6920_v61 = vld [vmem:[%s11977_s1 + $0x1a8] sm:$0xff] }
  0x37   : > { %1137 = vmatprep.mubr.f32.mxu1 %v12001_v55  ;;  %1483 = vmatprep.subr.mxu0 %v6936_v0  ;;  %v6978_v53 = vld [vmem:[%s11977_s1 + $0x278] sm:$0xff]  ;;  %v6977_v57 = vld [vmem:[%s11977_s1 + $0x270] sm:$0xff]  ;;  %v6976_v62 = vld [vmem:[%s11977_s1 + $0x268] sm:$0xff] }
  0x38   : > { %1959 = vmatprep.subr.mxu1 %v6992_v1  ;;  %1484 = vmatpush1.msra.mxu0 %v6935_v2  ;;  %v630_v58 = vsel %vm609_vm0, %v627_v42, %v629_v49  ;;  %v6919_v0 = vld [vmem:[%s11977_s1 + $0x1a0] sm:$0xff]  ;;  %v632_v2 = vsel %vm609_vm0, %v629_v49, %v631_v59  ;;  %v6918_v5 = vld [vmem:[%s11977_s1 + $0x198] sm:$0xff]  ;;  %v8739_v12 = vld [vmem:[%s8431_s26 + $0x70] sm:$0xff] }
  0x39   : > { %1960 = vmatpush1.msra.mxu1 %v6991_v3  ;;  %6853 = vmatmul.mubr.msk.f32.gmra.mxu0 %vm675_vm1, %v616_v4  ;;  %v6975_v1 = vld [vmem:[%s11977_s1 + $0x260] sm:$0xff]  ;;  %v633_v3 = vrot.slane %v8695_v60, 1  ;;  %v8717_v4 = vld [vmem:[%s8431_s26 + $0x68] sm:$0xff]  ;;  %v637_v19 = vrot.slane %v8739_v12, 1 }
  0x3a   : > { %6885 = vmatmul.mubr.msk.f32.gmra.mxu1 %vm675_vm1, %v8484_v50  ;;  %822 = vmatprep.mubr.f32.mxu0 %v12001_v55 }
  0x3b   : > { %1143 = vmatprep.mubr.f32.mxu1 %v12001_v55  ;;  %1485 = vmatprep.subr.mxu0 %v6934_v7  ;;  %v6974_v7 = vld [vmem:[%s11977_s1 + $0x258] sm:$0xff] }
  0x3c   : > { %1961 = vmatprep.subr.mxu1 %v6990_v8  ;;  %1486 = vmatpush1.msra.mxu0 %v6933_v9  ;;  %v6917_v8 = vld [vmem:[%s11977_s1 + $0x190] sm:$0xff] }
  0x3d   : > { %1962 = vmatpush1.msra.mxu1 %v6989_v10  ;;  %6854 = vmatmul.mubr.msk.f32.gmra.mxu0 %vm675_vm1, %v618_v11  ;;  %v6973_v9 = vld [vmem:[%s11977_s1 + $0x250] sm:$0xff]  ;;  %v634_v10 = vsel %vm609_vm0, %v631_v59, %v633_v3  ;;  %v635_v11 = vrot.slane %v8717_v4, 1 }
  0x3e   : > { %6886 = vmatmul.mubr.msk.f32.gmra.mxu1 %vm675_vm1, %v8496_v56  ;;  %828 = vmatprep.mubr.f32.mxu0 %v12001_v55 }
  0x3f   : > { %1149 = vmatprep.mubr.f32.mxu1 %v12001_v55  ;;  %1487 = vmatprep.subr.mxu0 %v6932_v14  ;;  %v6916_v14 = vld [vmem:[%s11977_s1 + $0x188] sm:$0xff] }
  0x40   : > { %1963 = vmatprep.subr.mxu1 %v6988_v15  ;;  %1488 = vmatpush1.msra.mxu0 %v6931_v16  ;;  %v6972_v15 = vld [vmem:[%s11977_s1 + $0x248] sm:$0xff]  ;;  %v6915_v16 = vld [vmem:[%s11977_s1 + $0x180] sm:$0xff] }
  0x41   : > { %1964 = vmatpush1.msra.mxu1 %v6987_v17  ;;  %6855 = vmatmul.mubr.msk.f32.gmra.mxu0 %vm675_vm1, %v620_v18  ;;  %v6971_v17 = vld [vmem:[%s11977_s1 + $0x240] sm:$0xff]  ;;  %v636_v18 = vsel %vm609_vm0, %v633_v3, %v635_v11 }
  0x42   : > { %6887 = vmatmul.mubr.msk.f32.gmra.mxu1 %vm675_vm1, %v8519_v63  ;;  %834 = vmatprep.mubr.f32.mxu0 %v12001_v55 }
  0x43   : > { %1155 = vmatprep.mubr.f32.mxu1 %v12001_v55  ;;  %1489 = vmatprep.subr.mxu0 %v6930_v21  ;;  %v8761_v21 = vld [vmem:[%s8431_s26 + $0x78] sm:$0xff] }
  0x44   : > { %1965 = vmatprep.subr.mxu1 %v6986_v22  ;;  %1490 = vmatpush1.msra.mxu0 %v6929_v23  ;;  %v638_v22 = vsel %vm609_vm0, %v635_v11, %v637_v19  ;;  %v639_v23 = vrot.slane %v8761_v21, 1 }
  0x45   : > { %1966 = vmatpush1.msra.mxu1 %v6985_v24  ;;  %6856 = vmatmul.mubr.msk.f32.gmra.mxu0 %vm675_vm1, %v622_v25  ;;  %v8771_v24 = vld [vmem:[%s8431_s26 + $0x80] sm:$0xff] }
  0x46   : > { %6888 = vmatmul.mubr.msk.f32.gmra.mxu1 %vm675_vm1, %v8541_v6  ;;  %840 = vmatprep.mubr.f32.mxu0 %v12001_v55  ;;  %v640_v25 = vsel %vm609_vm0, %v637_v19, %v639_v23  ;;  %v641_v26 = vrot.slane %v8771_v24, 1 }
  0x47   : > { %1161 = vmatprep.mubr.f32.mxu1 %v12001_v55  ;;  %1491 = vmatprep.subr.mxu0 %v6928_v28  ;;  %v8782_v28 = vld [vmem:[%s8431_s26 + $0x88] sm:$0xff] }
  0x48   : > { %1967 = vmatprep.subr.mxu1 %v6984_v29  ;;  %1492 = vmatpush1.msra.mxu0 %v6927_v30  ;;  %v642_v29 = vsel %vm609_vm0, %v639_v23, %v641_v26  ;;  %v643_v30 = vrot.slane %v8782_v28, 1  ;;  %v8925_v23 = vld [vmem:[%s8431_s26 + $0xf8] sm:$0xff] }
  0x49   : > { %1968 = vmatpush1.msra.mxu1 %v6983_v31  ;;  %6857 = vmatmul.mubr.msk.f32.gmra.mxu0 %vm675_vm1, %v624_v32  ;;  %v8792_v31 = vld [vmem:[%s8431_s26 + $0x90] sm:$0xff] }
  0x4a   : > { %6889 = vmatmul.mubr.msk.f32.gmra.mxu1 %vm675_vm1, %v8563_v13  ;;  %846 = vmatprep.mubr.f32.mxu0 %v12001_v55  ;;  %v644_v32 = vsel %vm609_vm0, %v641_v26, %v643_v30  ;;  %v645_v33 = vrot.slane %v8792_v31, 1  ;;  %v671_v26 = vrot.slane %v8925_v23, 1 }
  0x4b   : > { %1167 = vmatprep.mubr.f32.mxu1 %v12001_v55  ;;  %1493 = vmatprep.subr.mxu0 %v6926_v35  ;;  %v8802_v35 = vld [vmem:[%s8431_s26 + $0x98] sm:$0xff] }
  0x4c   : > { %1969 = vmatprep.subr.mxu1 %v6982_v36  ;;  %1494 = vmatpush1.msra.mxu0 %v6925_v37  ;;  %v646_v36 = vsel %vm609_vm0, %v643_v30, %v645_v33  ;;  %v647_v37 = vrot.slane %v8802_v35, 1  ;;  %v8941_v30 = vrot.slane %v12001_v55, 1 }
  0x4d   : > { %1970 = vmatpush1.msra.mxu1 %v6981_v40  ;;  %6858 = vmatmul.mubr.msk.f32.gmra.mxu0 %vm675_vm1, %v626_v41  ;;  %v8812_v40 = vld [vmem:[%s8431_s26 + $0xa0] sm:$0xff] }
  0x4e   : > { %6890 = vmatmul.mubr.msk.f32.gmra.mxu1 %vm675_vm1, %v8585_v20  ;;  %852 = vmatprep.mubr.f32.mxu0 %v12001_v55  ;;  %v648_v41 = vsel %vm609_vm0, %v645_v33, %v647_v37  ;;  %v649_v42 = vrot.slane %v8812_v40, 1  ;;  %12016 = vst [vmem:[#allocation11_spill] sm:$0xff] %v8941_v30  ;;  %v674_v33 = vsel %vm609_vm0, %v671_v26, %v8941_v30 }
  0x4f   : > { %1173 = vmatprep.mubr.f32.mxu1 %v12001_v55  ;;  %1495 = vmatprep.subr.mxu0 %v6924_v44  ;;  %v8822_v44 = vld [vmem:[%s8431_s26 + $0xa8] sm:$0xff] }
  0x50   : > { %1971 = vmatprep.subr.mxu1 %v6980_v45  ;;  %1496 = vmatpush1.msra.mxu0 %v6923_v46  ;;  %v650_v45 = vsel %vm609_vm0, %v647_v37, %v649_v42  ;;  %v651_v46 = vrot.slane %v8822_v44, 1  ;;  %v1820_v37 = vrot.slane %v8452_v38, 3 }
  0x51   : > { %1972 = vmatpush1.msra.mxu1 %v6979_v47  ;;  %6859 = vmatmul.mubr.msk.f32.gmra.mxu0 %vm675_vm1, %v628_v48  ;;  %v8832_v47 = vld [vmem:[%s8431_s26 + $0xb0] sm:$0xff] }
  0x52   : > { %6891 = vmatmul.mubr.msk.f32.gmra.mxu1 %vm675_vm1, %v8607_v27  ;;  %858 = vmatprep.mubr.f32.mxu0 %v12001_v55  ;;  %v652_v48 = vsel %vm609_vm0, %v649_v42, %v651_v46  ;;  %v653_v49 = vrot.slane %v8832_v47, 1 }
  0x53   : > { %1179 = vmatprep.mubr.f32.mxu1 %v12001_v55  ;;  %1497 = vmatprep.subr.mxu0 %v6922_v52  ;;  %v8842_v52 = vld [vmem:[%s8431_s26 + $0xb8] sm:$0xff] }
  0x54   : > { %1973 = vmatprep.subr.mxu1 %v6978_v53  ;;  %1498 = vmatpush1.msra.mxu0 %v6921_v54  ;;  %v654_v53 = vsel %vm609_vm0, %v651_v46, %v653_v49  ;;  %v655_v54 = vrot.slane %v8842_v52, 1  ;;  %v1347_v46 = vrot.slane %v8484_v50, 2 }
  0x55   : > { %1974 = vmatpush1.msra.mxu1 %v6977_v57  ;;  %6860 = vmatmul.mubr.msk.f32.gmra.mxu0 %vm675_vm1, %v630_v58  ;;  %v7050_v57 = vld [vmem:[%s11977_s1 + $0x3b8] sm:$0xff]  ;;  %v8855_v58 = vld [vmem:[%s8431_s26 + $0xc0] sm:$0xff] }
  0x56   : > { %6892 = vmatmul.mubr.msk.f32.gmra.mxu1 %vm675_vm1, %v8629_v34  ;;  %864 = vmatprep.mubr.f32.mxu0 %v12001_v55  ;;  %v656_v59 = vsel %vm609_vm0, %v653_v49, %v655_v54 }
  0x57   : > { %1185 = vmatprep.mubr.f32.mxu1 %v12001_v55  ;;  %1499 = vmatprep.subr.mxu0 %v6920_v61  ;;  %v657_v61 = vrot.slane %v8855_v58, 1 }
  0x58   : > { %1975 = vmatprep.subr.mxu1 %v6976_v62  ;;  %1500 = vmatpush1.msra.mxu0 %v6919_v0  ;;  %v8865_v62 = vld [vmem:[%s8431_s26 + $0xc8] sm:$0xff] }
  0x59   : > { %1976 = vmatpush1.msra.mxu1 %v6975_v1  ;;  %6861 = vmatmul.mubr.msk.f32.gmra.mxu0 %vm675_vm1, %v632_v2  ;;  %v658_v0 = vsel %vm609_vm0, %v655_v54, %v657_v61  ;;  %v659_v1 = vrot.slane %v8865_v62, 1  ;;  %v8875_v2 = vld [vmem:[%s8431_s26 + $0xd0] sm:$0xff]  ;;  %v1825_v54 = vrot.slane %v8496_v56, 3 }
  0x5a   : > { %6893 = vmatmul.mubr.msk.f32.gmra.mxu1 %vm675_vm1, %v8651_v43  ;;  %870 = vmatprep.mubr.f32.mxu0 %v12001_v55 }
  0x5b   : > { %1191 = vmatprep.mubr.f32.mxu1 %v12001_v55  ;;  %1501 = vmatprep.subr.mxu0 %v6918_v5  ;;  %v660_v3 = vsel %vm609_vm0, %v657_v61, %v659_v1  ;;  %v661_v5 = vrot.slane %v8875_v2, 1 }
  0x5c   : > { %1977 = vmatprep.subr.mxu1 %v6974_v7  ;;  %1502 = vmatpush1.msra.mxu0 %v6917_v8  ;;  %v8885_v7 = vld [vmem:[%s8431_s26 + $0xd8] sm:$0xff] }
  0x5d   : > { %1978 = vmatpush1.msra.mxu1 %v6973_v9  ;;  %6862 = vmatmul.mubr.msk.f32.gmra.mxu0 %vm675_vm1, %v634_v10  ;;  %v662_v8 = vsel %vm609_vm0, %v659_v1, %v661_v5  ;;  %v663_v9 = vrot.slane %v8885_v7, 1  ;;  %v8895_v10 = vld [vmem:[%s8431_s26 + $0xe0] sm:$0xff]  ;;  %v1827_v1 = vrot.slane %v8519_v63, 3 }
  0x5e   : > { %6894 = vmatmul.mubr.msk.f32.gmra.mxu1 %vm675_vm1, %v8673_v51  ;;  %876 = vmatprep.mubr.f32.mxu0 %v12001_v55 }
  0x5f   : > { %1197 = vmatprep.mubr.f32.mxu1 %v12001_v55  ;;  %1503 = vmatprep.subr.mxu0 %v6916_v14  ;;  %v664_v11 = vsel %vm609_vm0, %v661_v5, %v663_v9  ;;  %v665_v14 = vrot.slane %v8895_v10, 1  ;;  %v7044_v5 = vld [vmem:[%s11977_s1 + $0x388] sm:$0xff] }
  0x60   : > { %1979 = vmatprep.subr.mxu1 %v6972_v15  ;;  %1504 = vmatpush1.msra.mxu0 %v6915_v16  ;;  %v8905_v15 = vld [vmem:[%s8431_s26 + $0xe8] sm:$0xff] }
  0x61   : > { %1980 = vmatpush1.msra.mxu1 %v6971_v17  ;;  %6863 = vmatmul.mubr.msk.f32.gmra.mxu0 %vm675_vm1, %v636_v18  ;;  %v666_v16 = vsel %vm609_vm0, %v663_v9, %v665_v14  ;;  %v667_v17 = vrot.slane %v8905_v15, 1  ;;  %v8915_v18 = vld [vmem:[%s8431_s26 + $0xf0] sm:$0xff]  ;;  %v1353_v9 = vrot.slane %v8541_v6, 2 }
  0x62   : > { %6895 = vmatmul.mubr.msk.f32.gmra.mxu1 %vm675_vm1, %v8695_v60  ;;  %882 = vmatprep.mubr.f32.mxu0 %v12001_v55 }
  0x63   : > { %1203 = vmatprep.mubr.f32.mxu1 %v12001_v55  ;;  %3004 = vmatprep.subr.mxu1 %v12001_v55  ;;  %v668_v19 = vsel %vm609_vm0, %v665_v14, %v667_v17  ;;  %v7043_v14 = vld [vmem:[%s11977_s1 + $0x380] sm:$0xff] }
  0x64   : > { %2433 = vmatprep.subr.mxu0 %v7050_v57  ;;  %v7047_v57 = vld [vmem:[%s11977_s1 + $0x3a0] sm:$0xff] }
  0x65   : > { %6864 = vmatmul.mubr.msk.f32.gmra.mxu0 %vm675_vm1, %v638_v22  ;;  %v669_v22 = vrot.slane %v8915_v18, 1 }
  0x66   : > { %6896 = vmatmul.mubr.msk.f32.gmra.mxu1 %vm675_vm1, %v8717_v4  ;;  %888 = vmatprep.mubr.f32.mxu0 %v12001_v55 }
  0x67   : > { %1209 = vmatprep.mubr.f32.mxu1 %v12001_v55 }
  0x69   : > { %6865 = vmatmul.mubr.msk.f32.gmra.mxu0 %vm675_vm1, %v640_v25  ;;  %v670_v25 = vsel %vm609_vm0, %v667_v17, %v669_v22 }
  0x6a   : > { %6897 = vmatmul.mubr.msk.f32.gmra.mxu1 %vm675_vm1, %v8739_v12  ;;  %894 = vmatprep.mubr.f32.mxu0 %v12001_v55 }
  0x6b   : > { %1215 = vmatprep.mubr.f32.mxu1 %v12001_v55 }
  0x6d   : > { %6866 = vmatmul.mubr.msk.f32.gmra.mxu0 %vm675_vm1, %v642_v29  ;;  %v672_v29 = vsel %vm609_vm0, %v669_v22, %v671_v26  ;;  %v1831_v22 = vrot.slane %v8563_v13, 3  ;;  %v7040_v26 = vld [vmem:[%s11977_s1 + $0x368] sm:$0xff] }
  0x6e   : > { %6898 = vmatmul.mubr.msk.f32.gmra.mxu1 %vm675_vm1, %v8761_v21  ;;  %900 = vmatprep.mubr.f32.mxu0 %v12001_v55 }
  0x6f   : > { %1221 = vmatprep.mubr.f32.mxu1 %v12001_v55 }
  0x71   : > { %6867 = vmatmul.mubr.msk.f32.gmra.mxu0 %vm675_vm1, %v644_v32  ;;  %v1344_v32 = vrot.slane %v8452_v38, 2  ;;  %v1823_v38 = vrot.slane %v8484_v50, 3 }
  0x72   : > { %6899 = vmatmul.mubr.msk.f32.gmra.mxu1 %vm675_vm1, %v8771_v24  ;;  %906 = vmatprep.mubr.f32.mxu0 %v12001_v55 }
  0x73   : > { %1227 = vmatprep.mubr.f32.mxu1 %v12001_v55 }
  0x75   : > { %6868 = vmatmul.mubr.msk.f32.gmra.mxu0 %vm675_vm1, %v646_v36  ;;  %v1345_v36 = vrot.slane %v8455_v39, 2 }
  0x76   : > { %6900 = vmatmul.mubr.msk.f32.gmra.mxu1 %vm675_vm1, %v8782_v28  ;;  %912 = vmatprep.mubr.f32.mxu0 %v12001_v55 }
  0x77   : > { %1233 = vmatprep.mubr.f32.mxu1 %v12001_v55  ;;  %v1346_v42 = vsel %vm1343_vm2, %v1344_v32, %v1345_v36  ;;  %v1348_v49 = vsel %vm1343_vm2, %v1345_v36, %v1347_v46  ;;  %v1357_v32 = vrot.slane %v8585_v20, 2  ;;  %v7039_v36 = vld [vmem:[%s11977_s1 + $0x360] sm:$0xff] }
  0x79   : > { %6869 = vmatmul.mubr.msk.f32.gmra.mxu0 %vm675_vm1, %v648_v41  ;;  %v1821_v41 = vrot.slane %v8455_v39, 3  ;;  %v7049_v39 = vld [vmem:[%s11977_s1 + $0x3b0] sm:$0xff] }
  0x7a   : > { %6901 = vmatmul.mubr.msk.f32.gmra.mxu1 %vm675_vm1, %v8792_v31  ;;  %918 = vmatprep.mubr.f32.mxu0 %v12001_v55 }
  0x7b   : > { %1239 = vmatprep.mubr.f32.mxu1 %v12001_v55  ;;  %v1824_v50 = vsel %vm1819_vm3, %v1821_v41, %v1823_v38 }
  0x7d   : > { %6870 = vmatmul.mubr.msk.f32.gmra.mxu0 %vm675_vm1, %v650_v45  ;;  %v1822_v45 = vsel %vm1819_vm3, %v1820_v37, %v1821_v41  ;;  %v7038_v37 = vld [vmem:[%s11977_s1 + $0x358] sm:$0xff] }
  0x7e   : > { %6902 = vmatmul.mubr.msk.f32.gmra.mxu1 %vm675_vm1, %v8802_v35  ;;  %924 = vmatprep.mubr.f32.mxu0 %v12001_v55 }
  0x7f   : > { %1245 = vmatprep.mubr.f32.mxu1 %v12001_v55 }
  0x81   : > { %6871 = vmatmul.mubr.msk.f32.gmra.mxu0 %vm675_vm1, %v652_v48  ;;  %v7048_v48 = vld [vmem:[%s11977_s1 + $0x3a8] sm:$0xff] }
  0x82   : > { %6903 = vmatmul.mubr.msk.f32.gmra.mxu1 %vm675_vm1, %v8812_v40  ;;  %930 = vmatprep.mubr.f32.mxu0 %v12001_v55 }
  0x83   : > { %1251 = vmatprep.mubr.f32.mxu1 %v12001_v55 }
  0x85   : > { %6872 = vmatmul.mubr.msk.f32.gmra.mxu0 %vm675_vm1, %v654_v53  ;;  %v1349_v53 = vrot.slane %v8496_v56, 2  ;;  %v1826_v56 = vsel %vm1819_vm3, %v1823_v38, %v1825_v54  ;;  %v7036_v38 = vld [vmem:[%s11977_s1 + $0x348] sm:$0xff] }
  0x86   : > { %6904 = vmatmul.mubr.msk.f32.gmra.mxu1 %vm675_vm1, %v8822_v44  ;;  %936 = vmatprep.mubr.f32.mxu0 %v12001_v55 }
  0x87   : > { %1257 = vmatprep.mubr.f32.mxu1 %v12001_v55  ;;  %v1350_v61 = vsel %vm1343_vm2, %v1347_v46, %v1349_v53  ;;  %v7037_v46 = vld [vmem:[%s11977_s1 + $0x350] sm:$0xff] }
  0x89   : > { %6873 = vmatmul.mubr.msk.f32.gmra.mxu0 %vm675_vm1, %v656_v59  ;;  %v7046_v59 = vld [vmem:[%s11977_s1 + $0x398] sm:$0xff] }
  0x8a   : > { %6905 = vmatmul.mubr.msk.f32.gmra.mxu1 %vm675_vm1, %v8832_v47  ;;  %942 = vmatprep.mubr.f32.mxu0 %v12001_v55 }
  0x8b   : > { %1263 = vmatprep.mubr.f32.mxu1 %v12001_v55 }
  0x8d   : > { %6874 = vmatmul.mubr.msk.f32.gmra.mxu0 %vm675_vm1, %v658_v0  ;;  %v1351_v0 = vrot.slane %v8519_v63, 2  ;;  %v1828_v63 = vsel %vm1819_vm3, %v1825_v54, %v1827_v1 }
  0x8e   : > { %6906 = vmatmul.mubr.msk.f32.gmra.mxu1 %vm675_vm1, %v8842_v52  ;;  %948 = vmatprep.mubr.f32.mxu0 %v12001_v55 }
  0x8f   : > { %1269 = vmatprep.mubr.f32.mxu1 %v12001_v55  ;;  %v1354_v17 = vsel %vm1343_vm2, %v1351_v0, %v1353_v9 }
  0x91   : > { %6875 = vmatmul.mubr.msk.f32.gmra.mxu0 %vm675_vm1, %v660_v3  ;;  %v7045_v3 = vld [vmem:[%s11977_s1 + $0x390] sm:$0xff] }
  0x92   : > { %6907 = vmatmul.mubr.msk.f32.gmra.mxu1 %vm675_vm1, %v8855_v58  ;;  %954 = vmatprep.mubr.f32.mxu0 %v12001_v55 }
  0x93   : > { %1275 = vmatprep.mubr.f32.mxu1 %v12001_v55 }
  0x95   : > { %6876 = vmatmul.mubr.msk.f32.gmra.mxu0 %vm675_vm1, %v662_v8  ;;  %v1352_v8 = vsel %vm1343_vm2, %v1349_v53, %v1351_v0  ;;  %v7034_v53 = vld [vmem:[%s11977_s1 + $0x338] sm:$0xff] }
  0x96   : > { %6908 = vmatmul.mubr.msk.f32.gmra.mxu1 %vm675_vm1, %v8865_v62  ;;  %960 = vmatprep.mubr.f32.mxu0 %v12001_v55 }
  0x97   : > { %1281 = vmatprep.mubr.f32.mxu1 %v12001_v55 }
  0x99   : > { %6877 = vmatmul.mubr.msk.f32.gmra.mxu0 %vm675_vm1, %v664_v11  ;;  %v1829_v11 = vrot.slane %v8541_v6, 3 }
  0x9a   : > { %6909 = vmatmul.mubr.msk.f32.gmra.mxu1 %vm675_vm1, %v8875_v2  ;;  %966 = vmatprep.mubr.f32.mxu0 %v12001_v55 }
  0x9b   : > { %1287 = vmatprep.mubr.f32.mxu1 %v12001_v55  ;;  %v1830_v6 = vsel %vm1819_vm3, %v1827_v1, %v1829_v11  ;;  %v1365_v1 = vrot.slane %v8673_v51, 2 }
  0x9d   : > { %6878 = vmatmul.mubr.msk.f32.gmra.mxu0 %vm675_vm1, %v666_v16  ;;  %v7042_v16 = vld [vmem:[%s11977_s1 + $0x378] sm:$0xff] }
  0x9e   : > { %6910 = vmatmul.mubr.msk.f32.gmra.mxu1 %vm675_vm1, %v8885_v7  ;;  %972 = vmatprep.mubr.f32.mxu0 %v12001_v55 }
  0x9f   : > { %1293 = vmatprep.mubr.f32.mxu1 %v12001_v55 }
  0xa1   : > { %6879 = vmatmul.mubr.msk.f32.gmra.mxu0 %vm675_vm1, %v668_v19  ;;  %v1355_v19 = vrot.slane %v8563_v13, 2  ;;  %v1832_v13 = vsel %vm1819_vm3, %v1829_v11, %v1831_v22  ;;  %v1843_v11 = vrot.slane %v8695_v60, 3 }
  0xa2   : > { %6911 = vmatmul.mubr.msk.f32.gmra.mxu1 %vm675_vm1, %v8895_v10  ;;  %978 = vmatprep.mubr.f32.mxu0 %v12001_v55 }
  0xa3   : > { %1299 = vmatprep.mubr.f32.mxu1 %v12001_v55  ;;  %v1358_v41 = vsel %vm1343_vm2, %v1355_v19, %v1357_v32 }
  0xa5   : > { %6880 = vmatmul.mubr.msk.f32.gmra.mxu0 %vm675_vm1, %v670_v25  ;;  %v7041_v25 = vld [vmem:[%s11977_s1 + $0x370] sm:$0xff] }
  0xa6   : > { %6912 = vmatmul.mubr.msk.f32.gmra.mxu1 %vm675_vm1, %v8905_v15  ;;  %984 = vmatprep.mubr.f32.mxu0 %v12001_v55 }
  0xa7   : > { %1305 = vmatprep.mubr.f32.mxu1 %v12001_v55 }
  0xa9   : > { %6881 = vmatmul.mubr.msk.f32.gmra.mxu0 %vm675_vm1, %v672_v29  ;;  %v1356_v29 = vsel %vm1343_vm2, %v1353_v9, %v1355_v19  ;;  %v1367_v9 = vrot.slane %v8695_v60, 2  ;;  %v1845_v19 = vrot.slane %v8717_v4, 3 }
  0xaa   : > { %6913 = vmatmul.mubr.msk.f32.gmra.mxu1 %vm675_vm1, %v8915_v18  ;;  %990 = vmatprep.mubr.f32.mxu0 %v12001_v55 }
  0xab   : > { %1311 = vmatprep.mubr.f32.mxu1 %v12001_v55 }
  0xad   : > { %6882 = vmatmul.mubr.msk.f32.gmra.mxu0 %vm675_vm1, %v674_v33  ;;  %v1833_v33 = vrot.slane %v8585_v20, 3 }
  0xae   : > { %6914 = vmatmul.mubr.msk.f32.gmra.mxu1 %vm675_vm1, %v8925_v23  ;;  %1537 = vmatprep.mubr.f32.mxu0 %v12001_v55 }
  0xaf   : > { %2013 = vmatprep.mubr.f32.mxu1 %v12001_v55  ;;  %v1834_v20 = vsel %vm1819_vm3, %v1831_v22, %v1833_v33  ;;  %v7027_v22 = vld [vmem:[%s11977_s1 + $0x300] sm:$0xff] }
  0xb1   : > { %6939 = vmatmul.mubr.msk.f32.vlgmr.msra.gmra.mxu0 %vm675_vm1, %v1346_v42  ;;  %v1359_v42 = vrot.slane %v8607_v27, 2 }
  0xb2   : > { %6995 = vmatmul.mubr.msk.f32.vlgmr.msra.gmra.mxu1 %vm675_vm1, %v1822_v45  ;;  %1543 = vmatprep.mubr.f32.mxu0 %v12001_v55  ;;  %v1835_v45 = vrot.slane %v8607_v27, 3 }
  0xb3   : > { %2019 = vmatprep.mubr.f32.mxu1 %v12001_v55  ;;  %2434 = vmatpush1.msra.mxu0 %v7049_v39  ;;  %v1360_v39 = vsel %vm1343_vm2, %v1357_v32, %v1359_v42 }
  0xb4   : > { %2435 = vmatprep.subr.mxu0 %v7048_v48  ;;  %v1836_v27 = vsel %vm1819_vm3, %v1833_v33, %v1835_v45  ;;  %v1361_v48 = vrot.slane %v8629_v34, 2  ;;  %v1373_v33 = vrot.slane %v8761_v21, 2 }
  0xb5   : > { %6940 = vmatmul.mubr.msk.f32.gmra.mxu0 %vm675_vm1, %v1348_v49  ;;  %v1837_v49 = vrot.slane %v8629_v34, 3 }
  0xb6   : > { %6996 = vmatmul.mubr.msk.f32.gmra.mxu1 %vm675_vm1, %v1824_v50  ;;  %1549 = vmatprep.mubr.f32.mxu0 %v12001_v55  ;;  %v7035_v50 = vld [vmem:[%s11977_s1 + $0x340] sm:$0xff]  ;;  %v1362_v54 = vsel %vm1343_vm2, %v1359_v42, %v1361_v48 }
  0xb7   : > { %2025 = vmatprep.mubr.f32.mxu1 %v12001_v55  ;;  %2436 = vmatpush1.msra.mxu0 %v7047_v57  ;;  %v1838_v34 = vsel %vm1819_vm3, %v1835_v45, %v1837_v49  ;;  %v1363_v57 = vrot.slane %v8651_v43, 2  ;;  %v1377_v45 = vrot.slane %v8782_v28, 2 }
  0xb8   : > { %2437 = vmatprep.subr.mxu0 %v7046_v59  ;;  %v1839_v59 = vrot.slane %v8651_v43, 3 }
  0xb9   : > { %6941 = vmatmul.mubr.msk.f32.gmra.mxu0 %vm675_vm1, %v1350_v61  ;;  %v7033_v61 = vld [vmem:[%s11977_s1 + $0x330] sm:$0xff]  ;;  %v1364_v0 = vsel %vm1343_vm2, %v1361_v48, %v1363_v57 }
  0xba   : > { %6997 = vmatmul.mubr.msk.f32.gmra.mxu1 %vm675_vm1, %v1826_v56  ;;  %1555 = vmatprep.mubr.f32.mxu0 %v12001_v55  ;;  %v7032_v56 = vld [vmem:[%s11977_s1 + $0x328] sm:$0xff]  ;;  %v1840_v43 = vsel %vm1819_vm3, %v1837_v49, %v1839_v59 }
  0xbb   : > { %2031 = vmatprep.mubr.f32.mxu1 %v12001_v55  ;;  %2438 = vmatpush1.msra.mxu0 %v7045_v3  ;;  %v1841_v3 = vrot.slane %v8673_v51, 3 }
  0xbc   : > { %2439 = vmatprep.subr.mxu0 %v7044_v5  ;;  %v7031_v5 = vld [vmem:[%s11977_s1 + $0x320] sm:$0xff] }
  0xbd   : > { %6942 = vmatmul.mubr.msk.f32.gmra.mxu0 %vm675_vm1, %v1352_v8  ;;  %v7030_v8 = vld [vmem:[%s11977_s1 + $0x318] sm:$0xff]  ;;  %v1842_v51 = vsel %vm1819_vm3, %v1839_v59, %v1841_v3  ;;  %v1844_v60 = vsel %vm1819_vm3, %v1841_v3, %v1843_v11  ;;  %v1859_v3 = vrot.slane %v8812_v40, 3 }
  0xbe   : > { %6998 = vmatmul.mubr.msk.f32.gmra.mxu1 %vm675_vm1, %v1828_v63  ;;  %1561 = vmatprep.mubr.f32.mxu0 %v12001_v55  ;;  %v1366_v63 = vsel %vm1343_vm2, %v1363_v57, %v1365_v1 }
  0xbf   : > { %2037 = vmatprep.mubr.f32.mxu1 %v12001_v55  ;;  %2440 = vmatpush1.msra.mxu0 %v7043_v14  ;;  %v7029_v14 = vld [vmem:[%s11977_s1 + $0x310] sm:$0xff] }
  0xc0   : > { %2441 = vmatprep.subr.mxu0 %v7042_v16  ;;  %v7028_v16 = vld [vmem:[%s11977_s1 + $0x308] sm:$0xff] }
  0xc1   : > { %6943 = vmatmul.mubr.msk.f32.gmra.mxu0 %vm675_vm1, %v1354_v17  ;;  %v1368_v17 = vsel %vm1343_vm2, %v1365_v1, %v1367_v9 }
  0xc2   : > { %6999 = vmatmul.mubr.msk.f32.gmra.mxu1 %vm675_vm1, %v1830_v6  ;;  %1567 = vmatprep.mubr.f32.mxu0 %v12001_v55  ;;  %v1369_v6 = vrot.slane %v8717_v4, 2  ;;  %v1371_v4 = vrot.slane %v8739_v12, 2 }
  0xc3   : > { %2043 = vmatprep.mubr.f32.mxu1 %v12001_v55  ;;  %2442 = vmatpush1.msra.mxu0 %v7041_v25 }
  0xc4   : > { %2443 = vmatprep.subr.mxu0 %v7040_v26  ;;  %v1370_v25 = vsel %vm1343_vm2, %v1367_v9, %v1369_v6  ;;  %v1846_v26 = vsel %vm1819_vm3, %v1843_v11, %v1845_v19 }
  0xc5   : > { %6944 = vmatmul.mubr.msk.f32.gmra.mxu0 %vm675_vm1, %v1356_v29  ;;  %v1847_v29 = vrot.slane %v8739_v12, 3  ;;  %v1374_v12 = vsel %vm1343_vm2, %v1371_v4, %v1373_v33 }
  0xc6   : > { %7000 = vmatmul.mubr.msk.f32.gmra.mxu1 %vm675_vm1, %v1832_v13  ;;  %1573 = vmatprep.mubr.f32.mxu0 %v12001_v55  ;;  %v1372_v13 = vsel %vm1343_vm2, %v1369_v6, %v1371_v4 }
  0xc7   : > { %2049 = vmatprep.mubr.f32.mxu1 %v12001_v55  ;;  %2444 = vmatpush1.msra.mxu0 %v7039_v36  ;;  %v1848_v32 = vsel %vm1819_vm3, %v1845_v19, %v1847_v29  ;;  %v1849_v36 = vrot.slane %v8761_v21, 3 }
  0xc8   : > { %2445 = vmatprep.subr.mxu0 %v7038_v37 }
  0xc9   : > { %6945 = vmatmul.mubr.msk.f32.gmra.mxu0 %vm675_vm1, %v1358_v41  ;;  %v1850_v37 = vsel %vm1819_vm3, %v1847_v29, %v1849_v36  ;;  %v1375_v41 = vrot.slane %v8771_v24, 2 }
  0xca   : > { %7001 = vmatmul.mubr.msk.f32.gmra.mxu1 %vm675_vm1, %v1834_v20  ;;  %1579 = vmatprep.mubr.f32.mxu0 %v12001_v55  ;;  %v1851_v20 = vrot.slane %v8771_v24, 3  ;;  %v1379_v24 = vrot.slane %v8792_v31, 2 }
  0xcb   : > { %2055 = vmatprep.mubr.f32.mxu1 %v12001_v55  ;;  %2446 = vmatpush1.msra.mxu0 %v7037_v46  ;;  %v1376_v21 = vsel %vm1343_vm2, %v1373_v33, %v1375_v41  ;;  %v1853_v46 = vrot.slane %v8782_v28, 3 }
  0xcc   : > { %2447 = vmatprep.subr.mxu0 %v7036_v38  ;;  %v1852_v42 = vsel %vm1819_vm3, %v1849_v36, %v1851_v20  ;;  %v1378_v38 = vsel %vm1343_vm2, %v1375_v41, %v1377_v45  ;;  %v1380_v28 = vsel %vm1343_vm2, %v1377_v45, %v1379_v24 }
  0xcd   : > { %6946 = vmatmul.mubr.msk.f32.gmra.mxu0 %vm675_vm1, %v1360_v39  ;;  %v1854_v39 = vsel %vm1819_vm3, %v1851_v20, %v1853_v46 }
  0xce   : > { %7002 = vmatmul.mubr.msk.f32.gmra.mxu1 %vm675_vm1, %v1836_v27  ;;  %1585 = vmatprep.mubr.f32.mxu0 %v12001_v55  ;;  %v1855_v27 = vrot.slane %v8792_v31, 3  ;;  %v1857_v31 = vrot.slane %v8802_v35, 3 }
  0xcf   : > { %2061 = vmatprep.mubr.f32.mxu1 %v12001_v55  ;;  %2448 = vmatpush1.msra.mxu0 %v7035_v50 }
  0xd0   : > { %2449 = vmatprep.subr.mxu0 %v7034_v53  ;;  %v1856_v53 = vsel %vm1819_vm3, %v1853_v46, %v1855_v27 }
  0xd1   : > { %6947 = vmatmul.mubr.msk.f32.gmra.mxu0 %vm675_vm1, %v1362_v54  ;;  %v1381_v54 = vrot.slane %v8802_v35, 2  ;;  %v1858_v35 = vsel %vm1819_vm3, %v1855_v27, %v1857_v31  ;;  %v1391_v27 = vrot.slane %v8855_v58, 2 }
  0xd2   : > { %7003 = vmatmul.mubr.msk.f32.gmra.mxu1 %vm675_vm1, %v1838_v34  ;;  %1591 = vmatprep.mubr.f32.mxu0 %v12001_v55 }
  0xd3   : > { %2067 = vmatprep.mubr.f32.mxu1 %v12001_v55  ;;  %2450 = vmatpush1.msra.mxu0 %v7033_v61  ;;  %v1382_v1 = vsel %vm1343_vm2, %v1379_v24, %v1381_v54 }
  0xd4   : > { %2451 = vmatprep.subr.mxu0 %v7032_v56 }
  0xd5   : > { %6948 = vmatmul.mubr.msk.f32.gmra.mxu0 %vm675_vm1, %v1364_v0  ;;  %v1383_v0 = vrot.slane %v8812_v40, 2  ;;  %v1860_v40 = vsel %vm1819_vm3, %v1857_v31, %v1859_v3 }
  0xd6   : > { %7004 = vmatmul.mubr.msk.f32.gmra.mxu1 %vm675_vm1, %v1840_v43  ;;  %1597 = vmatprep.mubr.f32.mxu0 %v12001_v55 }
  0xd7   : > { %2073 = vmatprep.mubr.f32.mxu1 %v12001_v55  ;;  %2452 = vmatpush1.msra.mxu0 %v7031_v5  ;;  %v1384_v11 = vsel %vm1343_vm2, %v1381_v54, %v1383_v0 }
  0xd8   : > { %2453 = vmatprep.subr.mxu0 %v7030_v8 }
  0xd9   : > { %6949 = vmatmul.mubr.msk.f32.gmra.mxu0 %vm675_vm1, %v1366_v63 }
  0xda   : > { %7005 = vmatmul.mubr.msk.f32.gmra.mxu1 %vm675_vm1, %v1842_v51  ;;  %1603 = vmatprep.mubr.f32.mxu0 %v12001_v55 }
  0xdb   : > { %2079 = vmatprep.mubr.f32.mxu1 %v12001_v55  ;;  %2454 = vmatpush1.msra.mxu0 %v7029_v14 }
  0xdc   : > { %2455 = vmatprep.subr.mxu0 %v7028_v16  ;;  %v1385_v16 = vrot.slane %v8822_v44, 2 }
  0xdd   : > { %6950 = vmatmul.mubr.msk.f32.gmra.mxu0 %vm675_vm1, %v1368_v17  ;;  %v1861_v17 = vrot.slane %v8822_v44, 3 }
  0xde   : > { %7006 = vmatmul.mubr.msk.f32.gmra.mxu1 %vm675_vm1, %v1844_v60  ;;  %1609 = vmatprep.mubr.f32.mxu0 %v12001_v55  ;;  %v1386_v29 = vsel %vm1343_vm2, %v1383_v0, %v1385_v16  ;;  %v1393_v0 = vrot.slane %v8865_v62, 2 }
  0xdf   : > { %2085 = vmatprep.mubr.f32.mxu1 %v12001_v55  ;;  %2456 = vmatpush1.msra.mxu0 %v7027_v22  ;;  %v1862_v44 = vsel %vm1819_vm3, %v1859_v3, %v1861_v17 }
  0xe1   : > { %6951 = vmatmul.mubr.msk.f32.gmra.mxu0 %vm675_vm1, %v1370_v25 }
  0xe2   : > { %7007 = vmatmul.mubr.msk.f32.gmra.mxu1 %vm675_vm1, %v1846_v26  ;;  %1615 = vmatprep.mubr.f32.mxu0 %v12001_v55  ;;  %v1387_v26 = vrot.slane %v8832_v47, 2 }
  0xe3   : > { %2091 = vmatprep.mubr.f32.mxu1 %v12001_v55 }
  0xe4   : > { %v1388_v41 = vsel %vm1343_vm2, %v1385_v16, %v1387_v26  ;;  %v1871_v16 = vrot.slane %v8875_v2, 3 }
  0xe5   : > { %6952 = vmatmul.mubr.msk.f32.gmra.mxu0 %vm675_vm1, %v1372_v13  ;;  %v1863_v13 = vrot.slane %v8832_v47, 3 }
  0xe6   : > { %7008 = vmatmul.mubr.msk.f32.gmra.mxu1 %vm675_vm1, %v1848_v32  ;;  %1621 = vmatprep.mubr.f32.mxu0 %v12001_v55 }
  0xe7   : > { %2097 = vmatprep.mubr.f32.mxu1 %v12001_v55  ;;  %v1864_v47 = vsel %vm1819_vm3, %v1861_v17, %v1863_v13 }
  0xe9   : > { %6953 = vmatmul.mubr.msk.f32.gmra.mxu0 %vm675_vm1, %v1374_v12 }
  0xea   : > { %7009 = vmatmul.mubr.msk.f32.gmra.mxu1 %vm675_vm1, %v1850_v37  ;;  %1627 = vmatprep.mubr.f32.mxu0 %v12001_v55 }
  0xeb   : > { %2103 = vmatprep.mubr.f32.mxu1 %v12001_v55 }
  0xed   : > { %6954 = vmatmul.mubr.msk.f32.gmra.mxu0 %vm675_vm1, %v1376_v21  ;;  %v1389_v21 = vrot.slane %v8842_v52, 2 }
  0xee   : > { %7010 = vmatmul.mubr.msk.f32.gmra.mxu1 %vm675_vm1, %v1852_v42  ;;  %1633 = vmatprep.mubr.f32.mxu0 %v12001_v55  ;;  %v1865_v42 = vrot.slane %v8842_v52, 3 }
  0xef   : > { %2109 = vmatprep.mubr.f32.mxu1 %v12001_v55 }
  0xf0   : > { %v1866_v52 = vsel %vm1819_vm3, %v1863_v13, %v1865_v42  ;;  %v1873_v13 = vrot.slane %v8885_v7, 3 }
  0xf1   : > { %v806_v48 = vpop.f32.mrf.mxu0  ;;  %6955 = vmatmul.mubr.msk.f32.gmra.mxu0 %vm675_vm1, %v1378_v38 }
  0xf2   : > { %v1127_v49 = vpop.f32.mrf.mxu1  ;;  %7011 = vmatmul.mubr.msk.f32.gmra.mxu1 %vm675_vm1, %v1854_v39  ;;  %1639 = vmatprep.mubr.f32.mxu0 %v12001_v55 }
  0xf3   : > { %v9163_v50 = vadd.f32 %v1127_v49, %v806_v48  ;;  %2115 = vmatprep.mubr.f32.mxu1 %v12001_v55  ;;  %v808_v34 = vpop.f32.mrf.mxu0  ;;  %v1390_v49 = vsel %vm1343_vm2, %v1387_v26, %v1389_v21 }
  0xf4   : > { %v1129_v57 = vpop.f32.mrf.mxu1 }
  0xf5   : > { %v9170_v59 = vadd.f32 %v1129_v57, %v808_v34  ;;  %v812_v61 = vpop.f32.mrf.mxu0  ;;  %6956 = vmatmul.mubr.msk.f32.gmra.mxu0 %vm675_vm1, %v1380_v28  ;;  %v1867_v28 = vrot.slane %v8855_v58, 3 }
  0xf6   : > { %v1133_v56 = vpop.f32.mrf.mxu1  ;;  %7012 = vmatmul.mubr.msk.f32.gmra.mxu1 %vm675_vm1, %v1856_v53  ;;  %1645 = vmatprep.mubr.f32.mxu0 %v12001_v55 }
  0xf7   : > { %v9175_v43 = vadd.f32 %v1133_v56, %v812_v61  ;;  %2121 = vmatprep.mubr.f32.mxu1 %v12001_v55  ;;  %v814_v5 = vpop.f32.mrf.mxu0  ;;  %v1392_v61 = vsel %vm1343_vm2, %v1389_v21, %v1391_v27  ;;  %v1868_v58 = vsel %vm1819_vm3, %v1865_v42, %v1867_v28  ;;  %v1875_v42 = vrot.slane %v8895_v10, 3 }
  0xf8   : > { %v1135_v8 = vpop.f32.mrf.mxu1 }
  0xf9   : > { %v9182_v63 = vadd.f32 %v1135_v8, %v814_v5  ;;  %v818_v51 = vpop.f32.mrf.mxu0  ;;  %6957 = vmatmul.mubr.msk.f32.gmra.mxu0 %vm675_vm1, %v1382_v1  ;;  %v1869_v1 = vrot.slane %v8865_v62, 3 }
  0xfa   : > { %v1139_v9 = vpop.f32.mrf.mxu1  ;;  %7013 = vmatmul.mubr.msk.f32.gmra.mxu1 %vm675_vm1, %v1858_v35  ;;  %1651 = vmatprep.mubr.f32.mxu0 %v12001_v55 }
  0xfb   : > { %v9187_v14 = vadd.f32 %v1139_v9, %v818_v51  ;;  %2127 = vmatprep.mubr.f32.mxu1 %v12001_v55  ;;  %v820_v60 = vpop.f32.mrf.mxu0  ;;  %v1395_v9 = vrot.slane %v8875_v2, 2  ;;  %v1870_v62 = vsel %vm1819_vm3, %v1867_v28, %v1869_v1  ;;  %v1872_v2 = vsel %vm1819_vm3, %v1869_v1, %v1871_v16 }
  0xfc   : > { %v1141_v6 = vpop.f32.mrf.mxu1  ;;  %v1877_v28 = vrot.slane %v8905_v15, 3  ;;  %v1879_v1 = vrot.slane %v8915_v18, 3 }
  0xfd   : > { %v9194_v19 = vadd.f32 %v1141_v6, %v820_v60  ;;  %v824_v22 = vpop.f32.mrf.mxu0  ;;  %6958 = vmatmul.mubr.msk.f32.gmra.mxu0 %vm675_vm1, %v1384_v11  ;;  %v1396_v26 = vsel %vm1343_vm2, %v1393_v0, %v1395_v9 }
  0xfe   : > { %v1145_v25 = vpop.f32.mrf.mxu1  ;;  %7014 = vmatmul.mubr.msk.f32.gmra.mxu1 %vm675_vm1, %v1860_v40  ;;  %1657 = vmatprep.mubr.f32.mxu0 %v12001_v55  ;;  %v1394_v40 = vsel %vm1343_vm2, %v1391_v27, %v1393_v0 }
  0xff   : > { %v9199_v4 = vadd.f32 %v1145_v25, %v824_v22  ;;  %2133 = vmatprep.mubr.f32.mxu1 %v12001_v55  ;;  %v826_v32 = vpop.f32.mrf.mxu0 }
 0x100   : > { %v1147_v33 = vpop.f32.mrf.mxu1 }
 0x101   : > { %v9206_v36 = vadd.f32 %v1147_v33, %v826_v32  ;;  %v830_v12 = vpop.f32.mrf.mxu0  ;;  %6959 = vmatmul.mubr.msk.f32.gmra.mxu0 %vm675_vm1, %v1386_v29 }
 0x102   : > { %v1151_v37 = vpop.f32.mrf.mxu1  ;;  %7015 = vmatmul.mubr.msk.f32.gmra.mxu1 %vm675_vm1, %v1862_v44  ;;  %1663 = vmatprep.mubr.f32.mxu0 %v12001_v55  ;;  %v1397_v44 = vrot.slane %v8885_v7, 2  ;;  %v1874_v7 = vsel %vm1819_vm3, %v1871_v16, %v1873_v13  ;;  %v1881_v16 = vrot.slane %v8925_v23, 3 }
 0x103   : > { %v9211_v20 = vadd.f32 %v1151_v37, %v830_v12  ;;  %2139 = vmatprep.mubr.f32.mxu1 %v12001_v55  ;;  %v832_v45 = vpop.f32.mrf.mxu0 }
 0x104   : > { %v1153_v46 = vpop.f32.mrf.mxu1  ;;  %v1398_v21 = vsel %vm1343_vm2, %v1395_v9, %v1397_v44 }
 0x105   : > { %v9218_v24 = vadd.f32 %v1153_v46, %v832_v45  ;;  %v836_v38 = vpop.f32.mrf.mxu0  ;;  %6960 = vmatmul.mubr.msk.f32.gmra.mxu0 %vm675_vm1, %v1388_v41  ;;  %v1399_v41 = vrot.slane %v8895_v10, 2  ;;  %v1876_v10 = vsel %vm1819_vm3, %v1873_v13, %v1875_v42  ;;  %v9338_v13 = vrot.slane %v12001_v55, 3 }
 0x106   : > { %v1157_v39 = vpop.f32.mrf.mxu1  ;;  %7016 = vmatmul.mubr.msk.f32.gmra.mxu1 %vm675_vm1, %v1864_v47  ;;  %1669 = vmatprep.mubr.f32.mxu0 %v12001_v55 }
 0x107   : > { %v9223_v48 = vadd.f32 %v1157_v39, %v836_v38  ;;  %2145 = vmatprep.mubr.f32.mxu1 %v12001_v55  ;;  %v838_v53 = vpop.f32.mrf.mxu0  ;;  %v1400_v27 = vsel %vm1343_vm2, %v1397_v44, %v1399_v41  ;;  %v1882_v44 = vsel %vm1819_vm3, %v1879_v1, %v1881_v16  ;;  %12026 = vst [vmem:[#allocation21_spill] sm:$0xff] %v9338_v13 }
 0x108   : > { %v1159_v54 = vpop.f32.mrf.mxu1 }
 0x109   : > { %v9230_v31 = vadd.f32 %v1159_v54, %v838_v53  ;;  %v842_v34 = vpop.f32.mrf.mxu0  ;;  %6961 = vmatmul.mubr.msk.f32.gmra.mxu0 %vm675_vm1, %v1390_v49 }
 0x10a   : > { %v1163_v57 = vpop.f32.mrf.mxu1  ;;  %7017 = vmatmul.mubr.msk.f32.gmra.mxu1 %vm675_vm1, %v1866_v52  ;;  %1675 = vmatprep.mubr.f32.mxu0 %v12001_v55  ;;  %v1401_v52 = vrot.slane %v8905_v15, 2  ;;  %v1878_v15 = vsel %vm1819_vm3, %v1875_v42, %v1877_v28 }
 0x10b   : > { %v9235_v56 = vadd.f32 %v1163_v57, %v842_v34  ;;  %2151 = vmatprep.mubr.f32.mxu1 %v12001_v55  ;;  %v844_v35 = vpop.f32.mrf.mxu0 }
 0x10c   : > { %v1165_v3 = vpop.f32.mrf.mxu1  ;;  %v1402_v0 = vsel %vm1343_vm2, %v1399_v41, %v1401_v52 }
 0x10d   : > { %v9242_v5 = vadd.f32 %v1165_v3, %v844_v35  ;;  %v848_v8 = vpop.f32.mrf.mxu0  ;;  %6962 = vmatmul.mubr.msk.f32.gmra.mxu0 %vm675_vm1, %v1392_v61  ;;  %v1403_v61 = vrot.slane %v8915_v18, 2  ;;  %v1880_v18 = vsel %vm1819_vm3, %v1877_v28, %v1879_v1  ;;  %v8099_v1 = vld [vmem:[%s8431_s26 + $0x10] sm:$0xff] }
 0x10e   : > { %v1169_v51 = vpop.f32.mrf.mxu1  ;;  %7018 = vmatmul.mubr.msk.f32.gmra.mxu1 %vm675_vm1, %v1868_v58  ;;  %1681 = vmatprep.mubr.f32.mxu0 %v12001_v55 }
 0x10f   : > { %v9247_v11 = vadd.f32 %v1169_v51, %v848_v8  ;;  %2157 = vmatprep.mubr.f32.mxu1 %v12001_v55  ;;  %v850_v17 = vpop.f32.mrf.mxu0  ;;  %v1404_v9 = vsel %vm1343_vm2, %v1401_v52, %v1403_v61 }
 0x110   : > { %v1171_v60 = vpop.f32.mrf.mxu1 }
 0x111   : > { %v9254_v6 = vadd.f32 %v1171_v60, %v850_v17  ;;  %v854_v22 = vpop.f32.mrf.mxu0  ;;  %6963 = vmatmul.mubr.msk.f32.gmra.mxu0 %vm675_vm1, %v1394_v40 }
 0x112   : > { %v1175_v25 = vpop.f32.mrf.mxu1  ;;  %7019 = vmatmul.mubr.msk.f32.gmra.mxu1 %vm675_vm1, %v1870_v62  ;;  %1687 = vmatprep.mubr.f32.mxu0 %v12001_v55  ;;  %v1405_v62 = vrot.slane %v8925_v23, 2 }
 0x113   : > { %v9259_v29 = vadd.f32 %v1175_v25, %v854_v22  ;;  %2163 = vmatprep.mubr.f32.mxu1 %v12001_v55  ;;  %v9266_v32 = vpop.f32.mrf.mxu0 }
 0x114   : > { %v9268_v33 = vpop.f32.mrf.mxu1  ;;  %v1406_v23 = vsel %vm1343_vm2, %v1403_v61, %v1405_v62 }
 0x115   : > { %v860_v12 = vpop.f32.mrf.mxu0  ;;  %6964 = vmatmul.mubr.msk.f32.gmra.mxu0 %vm675_vm1, %v1396_v26  ;;  %v9329_v26 = vrot.slane %v12001_v55, 2 }
 0x116   : > { %v1181_v37 = vpop.f32.mrf.mxu1  ;;  %7020 = vmatmul.mubr.msk.f32.gmra.mxu1 %vm675_vm1, %v1872_v2  ;;  %1693 = vmatprep.mubr.f32.mxu0 %v12001_v55 }
 0x117   : > { %v9273_v47 = vadd.f32 %v1181_v37, %v860_v12  ;;  %2169 = vmatprep.mubr.f32.mxu1 %v12001_v55  ;;  %v9280_v45 = vpop.f32.mrf.mxu0  ;;  %12025 = vst [vmem:[#allocation20_spill] sm:$0xff] %v9329_v26 }
 0x118   : > { %12017 = vst [vmem:[#allocation12_spill] sm:$0xff] %v9280_v45  ;;  %v9282_v46 = vpop.f32.mrf.mxu1 }
 0x119   : > { %12018 = vst [vmem:[#allocation13_spill] sm:$0xff] %v9282_v46  ;;  %v866_v38 = vpop.f32.mrf.mxu0  ;;  %6965 = vmatmul.mubr.msk.f32.gmra.mxu0 %vm675_vm1, %v1398_v21 }
 0x11a   : > { %v1187_v39 = vpop.f32.mrf.mxu1  ;;  %7021 = vmatmul.mubr.msk.f32.gmra.mxu1 %vm675_vm1, %v1874_v7  ;;  %1699 = vmatprep.mubr.f32.mxu0 %v12001_v55  ;;  %v1408_v7 = vsel %vm1343_vm2, %v1405_v62, %v9329_v26 }
 0x11b   : > { %v9287_v49 = vadd.f32 %v1187_v39, %v866_v38  ;;  %2175 = vmatprep.mubr.f32.mxu1 %v12001_v55  ;;  %v9294_v53 = vpop.f32.mrf.mxu0  ;;  %v1884_v38 = vsel %vm1819_vm3, %v1881_v16, %v9338_v13  ;;  %v8097_v39 = vld [vmem:[%s8431_s26] sm:$0xff] }
 0x11c   : > { %12019 = vst [vmem:[#allocation14_spill] sm:$0xff] %v9294_v53  ;;  %v9296_v54 = vpop.f32.mrf.mxu1 }
 0x11d   : > { %12020 = vst [vmem:[#allocation15_spill] sm:$0xff] %v9296_v54  ;;  %v872_v34 = vpop.f32.mrf.mxu0  ;;  %6966 = vmatmul.mubr.msk.f32.gmra.mxu0 %vm675_vm1, %v1400_v27  ;;  %v2296_v27 = vrot.slane %v8097_v39, 4 }
 0x11e   : > { %v1193_v57 = vpop.f32.mrf.mxu1  ;;  %7022 = vmatmul.mubr.msk.f32.gmra.mxu1 %vm675_vm1, %v1876_v10  ;;  %1705 = vmatprep.mubr.f32.mxu0 %v12001_v55  ;;  %v8098_v10 = vld [vmem:[%s8431_s26 + $0x8] sm:$0xff] }
 0x11f   : > { %v9301_v58 = vadd.f32 %v1193_v57, %v872_v34  ;;  %2181 = vmatprep.mubr.f32.mxu1 %v12001_v55  ;;  %v9308_v35 = vpop.f32.mrf.mxu0  ;;  %v2297_v52 = vrot.slane %v8098_v10, 4 }
 0x120   : > { %12021 = vst [vmem:[#allocation16_spill] sm:$0xff] %v9308_v35  ;;  %v9310_v3 = vpop.f32.mrf.mxu1 }
 0x121   : > { %12022 = vst [vmem:[#allocation17_spill] sm:$0xff] %v9310_v3  ;;  %v878_v8 = vpop.f32.mrf.mxu0  ;;  %6967 = vmatmul.mubr.msk.f32.gmra.mxu0 %vm675_vm1, %v1402_v0  ;;  %v8120_v3 = vld [vmem:[%s8431_s26 + $0xb8] sm:$0xff] }
 0x122   : > { %v1199_v51 = vpop.f32.mrf.mxu1  ;;  %7023 = vmatmul.mubr.msk.f32.gmra.mxu1 %vm675_vm1, %v1878_v15  ;;  %1711 = vmatprep.mubr.f32.mxu0 %v12001_v55  ;;  %v2298_v15 = vsel %vm2295_vm4, %v2296_v27, %v2297_v52  ;;  %v8101_v27 = vld [vmem:[%s8431_s26 + $0x20] sm:$0xff] }
 0x123   : > { %v9315_v40 = vadd.f32 %v1199_v51, %v878_v8  ;;  %2187 = vmatprep.mubr.f32.mxu1 %v12001_v55  ;;  %v9322_v17 = vpop.f32.mrf.mxu0  ;;  %v2299_v8 = vrot.slane %v8099_v1, 4  ;;  %v2303_v10 = vrot.slane %v8101_v27, 4 }
 0x124   : > { %12023 = vst [vmem:[#allocation18_spill] sm:$0xff] %v9322_v17  ;;  %v9324_v60 = vpop.f32.mrf.mxu1  ;;  %v8119_v17 = vld [vmem:[%s8431_s26 + $0xb0] sm:$0xff] }
 0x125   : > { %12024 = vst [vmem:[#allocation19_spill] sm:$0xff] %v9324_v60  ;;  %v884_v22 = vpop.f32.mrf.mxu0  ;;  %6968 = vmatmul.mubr.msk.f32.gmra.mxu0 %vm675_vm1, %v1404_v9  ;;  %v8118_v60 = vld [vmem:[%s8431_s26 + $0xa8] sm:$0xff] }
 0x126   : > { %v1205_v25 = vpop.f32.mrf.mxu1  ;;  %7024 = vmatmul.mubr.msk.f32.gmra.mxu1 %vm675_vm1, %v1880_v18  ;;  %1717 = vmatprep.mubr.f32.mxu0 %v12001_v55 }
 0x127   : > { %v9331_v2 = vadd.f32 %v1205_v25, %v884_v22  ;;  %2193 = vmatprep.mubr.f32.mxu1 %v12001_v55  ;;  %v9340_v12 = vpop.f32.mrf.mxu0  ;;  %v2300_v22 = vsel %vm2295_vm4, %v2297_v52, %v2299_v8  ;;  %v8100_v25 = vld [vmem:[%s8431_s26 + $0x18] sm:$0xff] }
 0x128   : > { %12027 = vst [vmem:[#allocation22_spill] sm:$0xff] %v9340_v12  ;;  %v9342_v37 = vpop.f32.mrf.mxu1  ;;  %v8117_v12 = vld [vmem:[%s8431_s26 + $0xa0] sm:$0xff] }
 0x129   : > { %12028 = vst [vmem:[#allocation23_spill] sm:$0xff] %v9342_v37  ;;  %v890_v41 = vpop.f32.mrf.mxu0  ;;  %6969 = vmatmul.mubr.msk.f32.gmra.mxu0 %vm675_vm1, %v1406_v23  ;;  %v2301_v23 = vrot.slane %v8100_v25, 4  ;;  %v2890_v37 = vld [vmem:[%s11979_s3 + $0x20] sm:$0xff] }
 0x12a   : > { %v1211_v21 = vpop.f32.mrf.mxu1  ;;  %7025 = vmatmul.mubr.msk.f32.gmra.mxu1 %vm675_vm1, %v1882_v44  ;;  %1723 = vmatprep.mubr.f32.mxu0 %v12001_v55 }
 0x12b   : > { %v9348_v42 = vadd.f32 %v1211_v21, %v890_v41  ;;  %2199 = vmatprep.mubr.f32.mxu1 %v12001_v55  ;;  %v9356_v28 = vpop.f32.mrf.mxu0  ;;  %v2302_v39 = vsel %vm2295_vm4, %v2299_v8, %v2301_v23 }
 0x12c   : > { %12029 = vst [vmem:[#allocation24_spill] sm:$0xff] %v9356_v28  ;;  %v9358_v34 = vpop.f32.mrf.mxu1 }
 0x12d   : > { %12030 = vst [vmem:[#allocation25_spill] sm:$0xff] %v9358_v34  ;;  %v896_v57 = vpop.f32.mrf.mxu0  ;;  %6970 = vmatmul.mubr.msk.f32.gmra.mxu0 %vm675_vm1, %v1408_v7 }
 0x12e   : > { %v1217_v61 = vpop.f32.mrf.mxu1  ;;  %7026 = vmatmul.mubr.msk.f32.gmra.mxu1 %vm675_vm1, %v1884_v38  ;;  %2489 = vmatprep.mubr.f32.mxu0 %v12001_v55 }
 0x12f   : > { %v9362_v0 = vadd.f32 %v1217_v61, %v896_v57  ;;  %v9367_v51 = vpop.f32.mrf.mxu0 }
 0x130   : > { %12031 = vst [vmem:[#allocation26_spill] sm:$0xff] %v9367_v51  ;;  %v9369_v9 = vpop.f32.mrf.mxu1 }
 0x131   : > { %12032 = vst [vmem:[#allocation27_spill] sm:$0xff] %v9369_v9  ;;  %v902_v18 = vpop.f32.mrf.mxu0  ;;  %7051 = vmatmul.mubr.msk.f32.vlgmr.msra.gmra.mxu0 %vm675_vm1, %v2298_v15 }
 0x132   : > { %v1223_v62 = vpop.f32.mrf.mxu1  ;;  %2495 = vmatprep.mubr.f32.mxu0 %v12001_v55 }
 0x133   : > { %v9372_v16 = vadd.f32 %v1223_v62, %v902_v18  ;;  %v9377_v44 = vpop.f32.mrf.mxu0  ;;  %v2304_v18 = vsel %vm2295_vm4, %v2301_v23, %v2303_v10  ;;  %v8102_v62 = vld [vmem:[%s8431_s26 + $0x28] sm:$0xff] }
 0x134   : > { %12033 = vst [vmem:[#allocation28_spill] sm:$0xff] %v9377_v44  ;;  %v9379_v41 = vpop.f32.mrf.mxu1 }
 0x135   : > { %12034 = vst [vmem:[#allocation29_spill] sm:$0xff] %v9379_v41  ;;  %v908_v21 = vpop.f32.mrf.mxu0  ;;  %7052 = vmatmul.mubr.msk.f32.gmra.mxu0 %vm675_vm1, %v2300_v22  ;;  %v2305_v22 = vrot.slane %v8102_v62, 4 }
 0x136   : > { %v1229_v7 = vpop.f32.mrf.mxu1  ;;  %2501 = vmatprep.mubr.f32.mxu0 %v12001_v55 }
 0x137   : > { %v9382_v38 = vadd.f32 %v1229_v7, %v908_v21  ;;  %v9387_v52 = vpop.f32.mrf.mxu0 }
 0x138   : > { %12035 = vst [vmem:[#allocation30_spill] sm:$0xff] %v9387_v52  ;;  %v9389_v57 = vpop.f32.mrf.mxu1 }
 0x139   : > { %12036 = vst [vmem:[#allocation31_spill] sm:$0xff] %v9389_v57  ;;  %v914_v61 = vpop.f32.mrf.mxu0  ;;  %7053 = vmatmul.mubr.msk.f32.gmra.mxu0 %vm675_vm1, %v2302_v39  ;;  %v2306_v39 = vsel %vm2295_vm4, %v2303_v10, %v2305_v22 }
 0x13a   : > { %v1235_v15 = vpop.f32.mrf.mxu1  ;;  %2507 = vmatprep.mubr.f32.mxu0 %v12001_v55 }
 0x13b   : > { %v9392_v1 = vadd.f32 %v1235_v15, %v914_v61  ;;  %v9397_v8 = vpop.f32.mrf.mxu0  ;;  %v8103_v61 = vld [vmem:[%s8431_s26 + $0x30] sm:$0xff] }
 0x13c   : > { %12037 = vst [vmem:[#allocation32_spill] sm:$0xff] %v9397_v8  ;;  %v9399_v25 = vpop.f32.mrf.mxu1  ;;  %v2307_v15 = vrot.slane %v8103_v61, 4 }
 0x13d   : > { %12038 = vst [vmem:[#allocation33_spill] sm:$0xff] %v9399_v25  ;;  %v920_v21 = vpop.f32.mrf.mxu0  ;;  %7054 = vmatmul.mubr.msk.f32.gmra.mxu0 %vm675_vm1, %v2304_v18 }
 0x13e   : > { %v1241_v7 = vpop.f32.mrf.mxu1  ;;  %2513 = vmatprep.mubr.f32.mxu0 %v12001_v55  ;;  %v2308_v18 = vsel %vm2295_vm4, %v2305_v22, %v2307_v15 }
 0x13f   : > { %v9402_v27 = vadd.f32 %v1241_v7, %v920_v21  ;;  %v9407_v23 = vpop.f32.mrf.mxu0  ;;  %v8104_v21 = vld [vmem:[%s8431_s26 + $0x38] sm:$0xff] }
 0x140   : > { %12039 = vst [vmem:[#allocation34_spill] sm:$0xff] %v9407_v23  ;;  %v9409_v62 = vpop.f32.mrf.mxu1  ;;  %v2309_v7 = vrot.slane %v8104_v21, 4 }
 0x141   : > { %12040 = vst [vmem:[#allocation35_spill] sm:$0xff] %v9409_v62  ;;  %v926_v26 = vpop.f32.mrf.mxu0  ;;  %7055 = vmatmul.mubr.msk.f32.gmra.mxu0 %vm675_vm1, %v2306_v39 }
 0x142   : > { %v1247_v13 = vpop.f32.mrf.mxu1  ;;  %2519 = vmatprep.mubr.f32.mxu0 %v12001_v55 }
 0x143   : > { %v9412_v30 = vadd.f32 %v1247_v13, %v926_v26  ;;  %v9417_v10 = vpop.f32.mrf.mxu0  ;;  %v2310_v26 = vsel %vm2295_vm4, %v2307_v15, %v2309_v7  ;;  %v8105_v13 = vld [vmem:[%s8431_s26 + $0x40] sm:$0xff] }
 0x144   : > { %12041 = vst [vmem:[#allocation36_spill] sm:$0xff] %v9417_v10  ;;  %v9419_v61 = vpop.f32.mrf.mxu1  ;;  %v2311_v39 = vrot.slane %v8105_v13, 4 }
 0x145   : > { %12042 = vst [vmem:[#allocation37_spill] sm:$0xff] %v9419_v61  ;;  %v932_v23 = vpop.f32.mrf.mxu0  ;;  %7056 = vmatmul.mubr.msk.f32.gmra.mxu0 %vm675_vm1, %v2308_v18 }
 0x146   : > { %v1253_v62 = vpop.f32.mrf.mxu1  ;;  %2525 = vmatprep.mubr.f32.mxu0 %v12001_v55 }
 0x147   : > { %v9422_v25 = vadd.f32 %v1253_v62, %v932_v23  ;;  %v9427_v22 = vpop.f32.mrf.mxu0  ;;  %v2312_v23 = vsel %vm2295_vm4, %v2309_v7, %v2311_v39  ;;  %v8106_v62 = vld [vmem:[%s8431_s26 + $0x48] sm:$0xff] }
 0x148   : > { %12043 = vst [vmem:[#allocation38_spill] sm:$0xff] %v9427_v22  ;;  %v9429_v21 = vpop.f32.mrf.mxu1  ;;  %v2313_v18 = vrot.slane %v8106_v62, 4 }
 0x149   : > { %12044 = vst [vmem:[#allocation39_spill] sm:$0xff] %v9429_v21  ;;  %v938_v10 = vpop.f32.mrf.mxu0  ;;  %7057 = vmatmul.mubr.msk.f32.gmra.mxu0 %vm675_vm1, %v2310_v26 }
 0x14a   : > { %v1259_v61 = vpop.f32.mrf.mxu1  ;;  %2531 = vmatprep.mubr.f32.mxu0 %v12001_v55 }
 0x14b   : > { %v9432_v8 = vadd.f32 %v1259_v61, %v938_v10  ;;  %v9437_v15 = vpop.f32.mrf.mxu0  ;;  %v2314_v10 = vsel %vm2295_vm4, %v2311_v39, %v2313_v18  ;;  %v8107_v61 = vld [vmem:[%s8431_s26 + $0x50] sm:$0xff] }
 0x14c   : > { %12045 = vst [vmem:[#allocation40_spill] sm:$0xff] %v9437_v15  ;;  %v9439_v13 = vpop.f32.mrf.mxu1  ;;  %v2315_v26 = vrot.slane %v8107_v61, 4 }
 0x14d   : > { %12046 = vst [vmem:[#allocation41_spill] sm:$0xff] %v9439_v13  ;;  %v944_v22 = vpop.f32.mrf.mxu0  ;;  %7058 = vmatmul.mubr.msk.f32.gmra.mxu0 %vm675_vm1, %v2312_v23 }
 0x14e   : > { %v1265_v21 = vpop.f32.mrf.mxu1  ;;  %2537 = vmatprep.mubr.f32.mxu0 %v12001_v55 }
 0x14f   : > { %v9442_v57 = vadd.f32 %v1265_v21, %v944_v22  ;;  %v9447_v7 = vpop.f32.mrf.mxu0  ;;  %v2316_v22 = vsel %vm2295_vm4, %v2313_v18, %v2315_v26  ;;  %v8108_v21 = vld [vmem:[%s8431_s26 + $0x58] sm:$0xff] }
 0x150   : > { %12047 = vst [vmem:[#allocation42_spill] sm:$0xff] %v9447_v7  ;;  %v9449_v62 = vpop.f32.mrf.mxu1  ;;  %v2317_v23 = vrot.slane %v8108_v21, 4 }
 0x151   : > { %12048 = vst [vmem:[#allocation43_spill] sm:$0xff] %v9449_v62  ;;  %v950_v15 = vpop.f32.mrf.mxu0  ;;  %7059 = vmatmul.mubr.msk.f32.gmra.mxu0 %vm675_vm1, %v2314_v10 }
 0x152   : > { %v1271_v13 = vpop.f32.mrf.mxu1  ;;  %2543 = vmatprep.mubr.f32.mxu0 %v12001_v55 }
 0x153   : > { %v9452_v52 = vadd.f32 %v1271_v13, %v950_v15  ;;  %v9457_v39 = vpop.f32.mrf.mxu0  ;;  %v2318_v15 = vsel %vm2295_vm4, %v2315_v26, %v2317_v23  ;;  %v8109_v13 = vld [vmem:[%s8431_s26 + $0x60] sm:$0xff] }
 0x154   : > { %12049 = vst [vmem:[#allocation44_spill] sm:$0xff] %v9457_v39  ;;  %v9459_v61 = vpop.f32.mrf.mxu1  ;;  %v2319_v10 = vrot.slane %v8109_v13, 4 }
 0x155   : > { %12050 = vst [vmem:[#allocation45_spill] sm:$0xff] %v9459_v61  ;;  %v956_v7 = vpop.f32.mrf.mxu0  ;;  %7060 = vmatmul.mubr.msk.f32.gmra.mxu0 %vm675_vm1, %v2316_v22  ;;  %v2901_v61 = vld [vmem:[%s11979_s3 + $0x78] sm:$0xff] }
 0x156   : > { %v1277_v41 = vpop.f32.mrf.mxu1  ;;  %2549 = vmatprep.mubr.f32.mxu0 %v12001_v55  ;;  %3005 = vmatpush1.msra.mxu1 %v2901_v61  ;;  %v2320_v26 = vsel %vm2295_vm4, %v2317_v23, %v2319_v10  ;;  %v8111_v23 = vld [vmem:[%s8431_s26 + $0x70] sm:$0xff] }
 0x157   : > { %v9462_v62 = vadd.f32 %v1277_v41, %v956_v7  ;;  %v9467_v18 = vpop.f32.mrf.mxu0  ;;  %v8110_v7 = vld [vmem:[%s8431_s26 + $0x68] sm:$0xff]  ;;  %3006 = vmatprep.subr.mxu1 %v12001_v55 }
 0x158   : > { %12051 = vst [vmem:[#allocation46_spill] sm:$0xff] %v9467_v18  ;;  %v9469_v21 = vpop.f32.mrf.mxu1  ;;  %v2321_v22 = vrot.slane %v8110_v7, 4 }
 0x159   : > { %12052 = vst [vmem:[#allocation47_spill] sm:$0xff] %v9469_v21  ;;  %v962_v39 = vpop.f32.mrf.mxu0  ;;  %7061 = vmatmul.mubr.msk.f32.gmra.mxu0 %vm675_vm1, %v2318_v15 }
 0x15a   : > { %v1283_v44 = vpop.f32.mrf.mxu1  ;;  %2555 = vmatprep.mubr.f32.mxu0 %v12001_v55 }
 0x15b   : > { %v9475_v41 = vadd.f32 %v1283_v44, %v962_v39  ;;  %v9481_v13 = vpop.f32.mrf.mxu0  ;;  %v2322_v44 = vsel %vm2295_vm4, %v2319_v10, %v2321_v22  ;;  %v2323_v39 = vrot.slane %v8111_v23, 4  ;;  %v8112_v23 = vld [vmem:[%s8431_s26 + $0x78] sm:$0xff] }
 0x15c   : > { %12053 = vst [vmem:[#allocation48_spill] sm:$0xff] %v9481_v13  ;;  %v9483_v21 = vpop.f32.mrf.mxu1 }
 0x15d   : > { %12054 = vst [vmem:[#allocation49_spill] sm:$0xff] %v9483_v21  ;;  %v968_v18 = vpop.f32.mrf.mxu0  ;;  %7062 = vmatmul.mubr.msk.f32.gmra.mxu0 %vm675_vm1, %v2320_v26  ;;  %v2900_v21 = vld [vmem:[%s11979_s3 + $0x70] sm:$0xff] }
 0x15e   : > { %v1289_v9 = vpop.f32.mrf.mxu1  ;;  %2561 = vmatprep.mubr.f32.mxu0 %v12001_v55  ;;  %3007 = vmatpush1.msra.mxu1 %v2900_v21 }
 0x15f   : > { %v9486_v15 = vadd.f32 %v1289_v9, %v968_v18  ;;  %v9491_v61 = vpop.f32.mrf.mxu0  ;;  %3008 = vmatprep.subr.mxu1 %v12001_v55  ;;  %v2899_v9 = vld [vmem:[%s11979_s3 + $0x68] sm:$0xff]  ;;  %v2324_v18 = vsel %vm2295_vm4, %v2321_v22, %v2323_v39  ;;  %v2897_v22 = vld [vmem:[%s11979_s3 + $0x58] sm:$0xff] }
 0x160   : > { %12055 = vst [vmem:[#allocation50_spill] sm:$0xff] %v9491_v61  ;;  %v9493_v7 = vpop.f32.mrf.mxu1  ;;  %3009 = vmatpush1.msra.mxu1 %v2899_v9 }
 0x161   : > { %12056 = vst [vmem:[#allocation51_spill] sm:$0xff] %v9493_v7  ;;  %v974_v13 = vpop.f32.mrf.mxu0  ;;  %7063 = vmatmul.mubr.msk.f32.gmra.mxu0 %vm675_vm1, %v2322_v44  ;;  %v2325_v7 = vrot.slane %v8112_v23, 4  ;;  %3010 = vmatprep.subr.mxu1 %v12001_v55  ;;  %v2898_v44 = vld [vmem:[%s11979_s3 + $0x60] sm:$0xff] }
 0x162   : > { %v1295_v26 = vpop.f32.mrf.mxu1  ;;  %2567 = vmatprep.mubr.f32.mxu0 %v12001_v55  ;;  %3011 = vmatpush1.msra.mxu1 %v2898_v44 }
 0x163   : > { %v9503_v10 = vadd.f32 %v1295_v26, %v974_v13  ;;  %v9508_v21 = vpop.f32.mrf.mxu0  ;;  %3012 = vmatprep.subr.mxu1 %v12001_v55  ;;  %v2326_v23 = vsel %vm2295_vm4, %v2323_v39, %v2325_v7  ;;  %v2895_v39 = vld [vmem:[%s11979_s3 + $0x48] sm:$0xff] }
 0x164   : > { %12057 = vst [vmem:[#allocation52_spill] sm:$0xff] %v9508_v21  ;;  %v9510_v61 = vpop.f32.mrf.mxu1  ;;  %3013 = vmatpush1.msra.mxu1 %v2897_v22 }
 0x165   : > { %12058 = vst [vmem:[#allocation53_spill] sm:$0xff] %v9510_v61  ;;  %v980_v13 = vpop.f32.mrf.mxu0  ;;  %7064 = vmatmul.mubr.msk.f32.gmra.mxu0 %vm675_vm1, %v2324_v18  ;;  %v8113_v61 = vld [vmem:[%s8431_s26 + $0x80] sm:$0xff]  ;;  %3014 = vmatprep.subr.mxu1 %v12001_v55  ;;  %v2896_v18 = vld [vmem:[%s11979_s3 + $0x50] sm:$0xff] }
 0x166   : > { %v1301_v26 = vpop.f32.mrf.mxu1  ;;  %2573 = vmatprep.mubr.f32.mxu0 %v12001_v55  ;;  %v2327_v21 = vrot.slane %v8113_v61, 4  ;;  %3015 = vmatpush1.msra.mxu1 %v2896_v18 }
 0x167   : > { %v9521_v9 = vadd.f32 %v1301_v26, %v980_v13  ;;  %v9526_v44 = vpop.f32.mrf.mxu0  ;;  %3016 = vmatprep.subr.mxu1 %v12001_v55 }
 0x168   : > { %12059 = vst [vmem:[#allocation54_spill] sm:$0xff] %v9526_v44  ;;  %v9528_v51 = vpop.f32.mrf.mxu1  ;;  %v2328_v22 = vsel %vm2295_vm4, %v2325_v7, %v2327_v21  ;;  %3017 = vmatpush1.msra.mxu1 %v2895_v39 }
 0x169   : > { %12060 = vst [vmem:[#allocation55_spill] sm:$0xff] %v9528_v51  ;;  %v986_v13 = vpop.f32.mrf.mxu0  ;;  %7065 = vmatmul.mubr.msk.f32.gmra.mxu0 %vm675_vm1, %v2326_v23  ;;  %v8114_v51 = vld [vmem:[%s8431_s26 + $0x88] sm:$0xff]  ;;  %3018 = vmatprep.subr.mxu1 %v12001_v55  ;;  %v2894_v23 = vld [vmem:[%s11979_s3 + $0x40] sm:$0xff] }
 0x16a   : > { %v1307_v26 = vpop.f32.mrf.mxu1  ;;  %2579 = vmatprep.mubr.f32.mxu0 %v12001_v55  ;;  %v2329_v44 = vrot.slane %v8114_v51, 4  ;;  %3019 = vmatpush1.msra.mxu1 %v2894_v23  ;;  %v2893_v51 = vld [vmem:[%s11979_s3 + $0x38] sm:$0xff] }
 0x16b   : > { %v9539_v61 = vadd.f32 %v1307_v26, %v986_v13  ;;  %v9544_v18 = vpop.f32.mrf.mxu0  ;;  %3020 = vmatprep.subr.mxu1 %v12001_v55 }
 0x16c   : > { %12061 = vst [vmem:[#allocation56_spill] sm:$0xff] %v9544_v18  ;;  %v9546_v34 = vpop.f32.mrf.mxu1  ;;  %v2330_v39 = vsel %vm2295_vm4, %v2327_v21, %v2329_v44  ;;  %3021 = vmatpush1.msra.mxu1 %v2893_v51 }
 0x16d   : > { %12062 = vst [vmem:[#allocation57_spill] sm:$0xff] %v9546_v34  ;;  %v992_v13 = vpop.f32.mrf.mxu0  ;;  %7066 = vmatmul.mubr.msk.f32.gmra.mxu0 %vm675_vm1, %v2328_v22  ;;  %v8115_v34 = vld [vmem:[%s8431_s26 + $0x90] sm:$0xff]  ;;  %3022 = vmatprep.subr.mxu1 %v12001_v55 }
 0x16e   : > { %v1313_v26 = vpop.f32.mrf.mxu1  ;;  %2585 = vmatprep.mubr.f32.mxu0 %v12001_v55  ;;  %v2331_v18 = vrot.slane %v8115_v34, 4  ;;  %v2892_v22 = vld [vmem:[%s11979_s3 + $0x30] sm:$0xff]  ;;  %v2891_v34 = vld [vmem:[%s11979_s3 + $0x28] sm:$0xff] }
 0x16f   : > { %v9557_v7 = vadd.f32 %v1313_v26, %v992_v13  ;;  %v9562_v23 = vpop.f32.mrf.mxu0  ;;  %3023 = vmatpush1.msra.mxu1 %v2892_v22 }
 0x170   : > { %12063 = vst [vmem:[#allocation58_spill] sm:$0xff] %v9562_v23  ;;  %v9564_v28 = vpop.f32.mrf.mxu1  ;;  %3024 = vmatprep.subr.mxu1 %v12001_v55  ;;  %v2332_v51 = vsel %vm2295_vm4, %v2329_v44, %v2331_v18 }
 0x171   : > { %12064 = vst [vmem:[#allocation59_spill] sm:$0xff] %v9564_v28  ;;  %v1539_v13 = vpop.f32.mrf.mxu0  ;;  %7067 = vmatmul.mubr.msk.f32.gmra.mxu0 %vm675_vm1, %v2330_v39  ;;  %v8116_v28 = vld [vmem:[%s8431_s26 + $0x98] sm:$0xff]  ;;  %3025 = vmatpush1.msra.mxu1 %v2891_v34 }
 0x172   : > { %v9571_v26 = vpop.f32.mrf.mxu1  ;;  %v9578_v21 = vadd.f32 %v1539_v13, %v9163_v50  ;;  %2591 = vmatprep.mubr.f32.mxu0 %v12001_v55  ;;  %v2333_v22 = vrot.slane %v8116_v28, 4  ;;  %3026 = vmatprep.subr.mxu1 %v12001_v55  ;;  %v2889_v28 = vld [vmem:[%s11979_s3 + $0x18] sm:$0xff] }
 0x173   : > { %v1541_v39 = vpop.f32.mrf.mxu0  ;;  %3027 = vmatpush1.msra.mxu1 %v2890_v37 }
 0x174   : > { %v9583_v23 = vpop.f32.mrf.mxu1  ;;  %v9590_v50 = vadd.f32 %v1541_v39, %v9170_v59  ;;  %3028 = vmatprep.subr.mxu1 %v12001_v55  ;;  %v2334_v34 = vsel %vm2295_vm4, %v2331_v18, %v2333_v22  ;;  %v2335_v59 = vrot.slane %v8117_v12, 4  ;;  %v2887_v12 = vld [vmem:[%s11979_s3 + $0x8] sm:$0xff] }
 0x175   : > { %v1545_v13 = vpop.f32.mrf.mxu0  ;;  %7068 = vmatmul.mubr.msk.f32.gmra.mxu0 %vm675_vm1, %v2332_v51  ;;  %3029 = vmatpush1.msra.mxu1 %v2889_v28  ;;  %v2888_v51 = vld [vmem:[%s11979_s3 + $0x10] sm:$0xff] }
 0x176   : > { %v9598_v44 = vadd.f32 %v1545_v13, %v9175_v43  ;;  %2597 = vmatprep.mubr.f32.mxu0 %v12001_v55  ;;  %v9603_v39 = vpop.f32.mrf.mxu1  ;;  %3030 = vmatprep.subr.mxu1 %v12001_v55  ;;  %v2336_v28 = vsel %vm2295_vm4, %v2333_v22, %v2335_v59 }
 0x177   : > { %v1547_v37 = vpop.f32.mrf.mxu0  ;;  %3031 = vmatpush1.msra.mxu1 %v2888_v51  ;;  %v2886_v51 = vld [vmem:[%s11979_s3] sm:$0xff] }
 0x178   : > { %v9610_v43 = vadd.f32 %v1547_v37, %v9182_v63  ;;  %3032 = vmatprep.subr.mxu1 %v12001_v55  ;;  %v2337_v63 = vrot.slane %v8118_v60, 4  ;;  %v9623_v37 = vpop.f32.mrf.mxu1  ;;  %v2906_v60 = vld [vmem:[%s11979_s3 + $0xa0] sm:$0xff] }
 0x179   : > { %v1551_v13 = vpop.f32.mrf.mxu0  ;;  %7069 = vmatmul.mubr.msk.f32.gmra.mxu0 %vm675_vm1, %v2334_v34  ;;  %3033 = vmatpush1.msra.mxu1 %v2887_v12 }
 0x17a   : > { %v9618_v18 = vadd.f32 %v1551_v13, %v9187_v14  ;;  %2603 = vmatprep.mubr.f32.mxu0 %v12001_v55  ;;  %3034 = vmatprep.subr.mxu1 %v12001_v55  ;;  %v2338_v12 = vsel %vm2295_vm4, %v2335_v59, %v2337_v63 }
 0x17b   : > { %v1553_v34 = vpop.f32.mrf.mxu0  ;;  %3035 = vmatpush1.msra.mxu1 %v2886_v51  ;;  %v2905_v51 = vld [vmem:[%s11979_s3 + $0x98] sm:$0xff] }
 0x17c   : > { %v9630_v14 = vadd.f32 %v1553_v34, %v9194_v19  ;;  %3058 = vmatprep.subr.mxu1 %v12001_v55  ;;  %v2339_v19 = vrot.slane %v8119_v17, 4  ;;  %v9643_v34 = vpop.f32.mrf.mxu1  ;;  %v2904_v17 = vld [vmem:[%s11979_s3 + $0x90] sm:$0xff] }
 0x17d   : > { %v1557_v13 = vpop.f32.mrf.mxu0  ;;  %7070 = vmatmul.mubr.msk.f32.gmra.mxu0 %vm675_vm1, %v2336_v28  ;;  %3059 = vmatpush2.msra.mxu1 %v2906_v60 }
 0x17e   : > { %v9638_v22 = vadd.f32 %v1557_v13, %v9199_v4  ;;  %2609 = vmatprep.mubr.f32.mxu0 %v12001_v55  ;;  %3060 = vmatprep.subr.mxu1 %v12001_v55  ;;  %v2340_v60 = vsel %vm2295_vm4, %v2337_v63, %v2339_v19 }
 0x17f   : > { %v1559_v28 = vpop.f32.mrf.mxu0  ;;  %3061 = vmatpush2.msra.mxu1 %v2905_v51  ;;  %v2903_v51 = vld [vmem:[%s11979_s3 + $0x88] sm:$0xff] }
 0x180   : > { %v9650_v4 = vadd.f32 %v1559_v28, %v9206_v36  ;;  %3062 = vmatprep.subr.mxu1 %v12001_v55  ;;  %v2341_v36 = vrot.slane %v8120_v3, 4  ;;  %v9663_v28 = vpop.f32.mrf.mxu1  ;;  %v2902_v3 = vld [vmem:[%s11979_s3 + $0x80] sm:$0xff] }
 0x181   : > { %v1563_v13 = vpop.f32.mrf.mxu0  ;;  %7071 = vmatmul.mubr.msk.f32.gmra.mxu0 %vm675_vm1, %v2338_v12  ;;  %3063 = vmatpush2.msra.mxu1 %v2904_v17 }
 0x182   : > { %v9658_v59 = vadd.f32 %v1563_v13, %v9211_v20  ;;  %2615 = vmatprep.mubr.f32.mxu0 %v12001_v55  ;;  %3064 = vmatprep.subr.mxu1 %v12001_v55  ;;  %v2342_v17 = vsel %vm2295_vm4, %v2339_v19, %v2341_v36 }
 0x183   : > { %v1565_v12 = vpop.f32.mrf.mxu0  ;;  %3065 = vmatpush2.msra.mxu1 %v2903_v51  ;;  %v9683_v51 = vpop.f32.mrf.mxu1 }
 0x184   : > { %v9670_v20 = vadd.f32 %v1565_v12, %v9218_v24  ;;  %3066 = vmatprep.subr.mxu1 %v12001_v55  ;;  %v8121_v24 = vld [vmem:[%s8431_s26 + $0xc0] sm:$0xff] }
 0x185   : > { %v1569_v13 = vpop.f32.mrf.mxu0  ;;  %7072 = vmatmul.mubr.msk.f32.gmra.mxu0 %vm675_vm1, %v2340_v60  ;;  %v2343_v12 = vrot.slane %v8121_v24, 4  ;;  %3067 = vmatpush2.msra.mxu1 %v2902_v3  ;;  %v9695_v3 = vpop.f32.mrf.mxu1 }
 0x186   : > { %v9678_v63 = vadd.f32 %v1569_v13, %v9223_v48  ;;  %2621 = vmatprep.mubr.f32.mxu0 %v12001_v55  ;;  %v8122_v13 = vld [vmem:[%s8431_s26 + $0xc8] sm:$0xff] }
 0x187   : > { %v1571_v60 = vpop.f32.mrf.mxu0  ;;  %v2344_v19 = vsel %vm2295_vm4, %v2341_v36, %v2343_v12  ;;  %v2345_v24 = vrot.slane %v8122_v13, 4 }
 0x188   : > { %v9686_v35 = vadd.f32 %v1571_v60, %v9230_v31  ;;  %v9707_v60 = vpop.f32.mrf.mxu1 }
 0x189   : > { %v1575_v54 = vpop.f32.mrf.mxu0  ;;  %7073 = vmatmul.mubr.msk.f32.gmra.mxu0 %vm675_vm1, %v2342_v17 }
 0x18a   : > { %v9690_v48 = vadd.f32 %v1575_v54, %v9235_v56  ;;  %2627 = vmatprep.mubr.f32.mxu0 %v12001_v55  ;;  %v2346_v56 = vsel %vm2295_vm4, %v2343_v12, %v2345_v24  ;;  %v8123_v54 = vld [vmem:[%s8431_s26 + $0xd0] sm:$0xff]  ;;  %v8124_v12 = vld [vmem:[%s8431_s26 + $0xd8] sm:$0xff] }
 0x18b   : > { %v1577_v53 = vpop.f32.mrf.mxu0  ;;  %v2347_v36 = vrot.slane %v8123_v54, 4  ;;  %v9719_v54 = vpop.f32.mrf.mxu1 }
 0x18c   : > { %v9698_v46 = vadd.f32 %v1577_v53, %v9242_v5 }
 0x18d   : > { %v1581_v31 = vpop.f32.mrf.mxu0  ;;  %7074 = vmatmul.mubr.msk.f32.gmra.mxu0 %vm675_vm1, %v2344_v19 }
 0x18e   : > { %v9702_v17 = vadd.f32 %v1581_v31, %v9247_v11  ;;  %2633 = vmatprep.mubr.f32.mxu0 %v12001_v55  ;;  %v2348_v11 = vsel %vm2295_vm4, %v2345_v24, %v2347_v36  ;;  %v2349_v31 = vrot.slane %v8124_v12, 4  ;;  %v9730_v24 = vpop.f32.mrf.mxu1 }
 0x18f   : > { %v1583_v13 = vpop.f32.mrf.mxu0 }
 0x190   : > { %12065 = vst [vmem:[#allocation60_spill] sm:$0xff] %v9702_v17  ;;  %v9710_v5 = vadd.f32 %v1583_v13, %v9254_v6 }
 0x191   : > { %v1587_v53 = vpop.f32.mrf.mxu0  ;;  %7075 = vmatmul.mubr.msk.f32.gmra.mxu0 %vm675_vm1, %v2346_v56  ;;  %v8125_v56 = vld [vmem:[%s8431_s26 + $0xe0] sm:$0xff] }
 0x192   : > { %v9714_v19 = vadd.f32 %v1587_v53, %v9259_v29  ;;  %2639 = vmatprep.mubr.f32.mxu0 %v12001_v55  ;;  %v2350_v29 = vsel %vm2295_vm4, %v2347_v36, %v2349_v31  ;;  %v2351_v13 = vrot.slane %v8125_v56, 4  ;;  %v9741_v36 = vpop.f32.mrf.mxu1 }
 0x193   : > { %v9721_v45 = vpop.f32.mrf.mxu0 }
 0x194   : > { %12066 = vst [vmem:[#allocation61_spill] sm:$0xff] %v9714_v19 }
 0x195   : > { %v1593_v17 = vpop.f32.mrf.mxu0  ;;  %7076 = vmatmul.mubr.msk.f32.gmra.mxu0 %vm675_vm1, %v2348_v11 }
 0x196   : > { %v9725_v6 = vadd.f32 %v1593_v17, %v9273_v47  ;;  %2645 = vmatprep.mubr.f32.mxu0 %v12001_v55  ;;  %v2352_v47 = vsel %vm2295_vm4, %v2349_v31, %v2351_v13  ;;  %v8126_v17 = vld [vmem:[%s8431_s26 + $0xe8] sm:$0xff]  ;;  %v9752_v31 = vpop.f32.mrf.mxu1 }
 0x197   : > { %v9732_v53 = vpop.f32.mrf.mxu0  ;;  %v2353_v11 = vrot.slane %v8126_v17, 4 }
 0x198   : > { %12067 = vst [vmem:[#allocation62_spill] sm:$0xff] %v9725_v6  ;;  %12068 = vst [vmem:[#allocation63_spill] sm:$0xff] %v9732_v53 }
 0x199   : > { %v1599_v12 = vpop.f32.mrf.mxu0  ;;  %7077 = vmatmul.mubr.msk.f32.gmra.mxu0 %vm675_vm1, %v2350_v29  ;;  %v8127_v29 = vld [vmem:[%s8431_s26 + $0xf0] sm:$0xff] }
 0x19a   : > { %v9736_v19 = vadd.f32 %v1599_v12, %v9287_v49  ;;  %2651 = vmatprep.mubr.f32.mxu0 %v12001_v55  ;;  %v2354_v49 = vsel %vm2295_vm4, %v2351_v13, %v2353_v11  ;;  %v2355_v12 = vrot.slane %v8127_v29, 4 }
 0x19b   : > { %v9743_v56 = vpop.f32.mrf.mxu0 }
 0x19c   : > { %12069 = vst [vmem:[#allocation64_spill] sm:$0xff] %v9736_v19  ;;  %12070 = vst [vmem:[#allocation65_spill] sm:$0xff] %v9743_v56 }
 0x19d   : > { %v1605_v6 = vpop.f32.mrf.mxu0  ;;  %7078 = vmatmul.mubr.msk.f32.gmra.mxu0 %vm675_vm1, %v2352_v47 }
 0x19e   : > { %v9747_v53 = vadd.f32 %v1605_v6, %v9301_v58  ;;  %2657 = vmatprep.mubr.f32.mxu0 %v12001_v55  ;;  %v2356_v58 = vsel %vm2295_vm4, %v2353_v11, %v2355_v12  ;;  %v8128_v6 = vld [vmem:[%s8431_s26 + $0xf8] sm:$0xff]  ;;  %s6761_s26 = sshll.u32 %s488_s18, 4  ;;  %s6762_s26 = int_to_ptr.vmem [resolvable:$true] %s6761_s26 }
 0x19f   : > { %v9754_v17 = vpop.f32.mrf.mxu0  ;;  %v2357_v47 = vrot.slane %v8128_v6, 4  ;;  %s8129_s24 = scalar_lea.vmem %s6762_s26, 128  ;;  %p8136_p0 = scmp.lt.s32.totalorder %s6762_s26, %s8134_s27 }
 0x1a0   : > { %12071 = vst [vmem:[#allocation66_spill] sm:$0xff] %v9747_v53  ;;  %12072 = vst [vmem:[#allocation67_spill] sm:$0xff] %v9754_v17  ;;  %v9763_v53 = vpop.f32.mrf.mxu1  ;;  %p8130_p11 = scmp.ne.s32.totalorder %s6762_s26, %s8129_s24  ;;  %p8137_p1 = scmp.lt.s32.totalorder %s8135_s30, %s8129_s24 }
 0x1a1   : > { %v1611_v19 = vpop.f32.mrf.mxu0  ;;  %7079 = vmatmul.mubr.msk.f32.gmra.mxu0 %vm675_vm1, %v2354_v49 }
 0x1a2   : > { %v9758_v56 = vadd.f32 %v1611_v19, %v9315_v40  ;;  %2663 = vmatprep.mubr.f32.mxu0 %v12001_v55  ;;  %v2358_v40 = vsel %vm2295_vm4, %v2355_v12, %v2357_v47  ;;  %v9774_v19 = vrot.slane %v12001_v55, 4  ;;  %v9776_v11 = vpop.f32.mrf.mxu1  ;;  %p8131_p12 = pnand %p8130_p11, %p8312_p5  ;;  %p8138_p2 = por %p8137_p1, %p8136_p0 }
 0x1a3   : > { %v9765_v13 = vpop.f32.mrf.mxu0 }
 0x1a4   : > { %12073 = vst [vmem:[#allocation68_spill] sm:$0xff] %v9758_v56  ;;  %12075 = vst [vmem:[#allocation70_spill] sm:$0xff] %v9774_v19  ;;  %p8132_p13 = pneg %p8131_p12 }
 0x1a5   : > { %v1617_v29 = vpop.f32.mrf.mxu0  ;;  %7080 = vmatmul.mubr.msk.f32.gmra.mxu0 %vm675_vm1, %v2356_v58  ;;  %v9787_v58 = vpop.f32.mrf.mxu1 }
 0x1a6   : > { %v9769_v17 = vadd.f32 %v1617_v29, %v9331_v2  ;;  %2669 = vmatprep.mubr.f32.mxu0 %v12001_v55  ;;  %v2360_v2 = vsel %vm2295_vm4, %v2357_v47, %v9774_v19  ;;  %p8139_p3 = pnand %p8138_p2, %p8132_p13 }
 0x1a7   : > { %v9778_v49 = vpop.f32.mrf.mxu0 }
 0x1a8   : > { %12074 = vst [vmem:[#allocation69_spill] sm:$0xff] %v9769_v17  ;;  %12076 = vst [vmem:[#allocation71_spill] sm:$0xff] %v9778_v49  ;;  %v9795_v49 = vpop.f32.mrf.mxu1 }
 0x1a9   : > { %v1623_v6 = vpop.f32.mrf.mxu0  ;;  %7081 = vmatmul.mubr.msk.f32.gmra.mxu0 %vm675_vm1, %v2358_v40 }
 0x1aa   : > { %v9782_v56 = vadd.f32 %v1623_v6, %v9348_v42  ;;  %2675 = vmatprep.mubr.f32.mxu0 %v12001_v55  ;;  %v9802_v55 = vpop.f32.mrf.mxu1 }
 0x1ab   : > { %v9789_v12 = vpop.f32.mrf.mxu0 }
 0x1ac   : > { %12077 = vst [vmem:[#allocation72_spill] sm:$0xff] %v9782_v56  ;;  %12078 = vst [vmem:[#allocation73_spill] sm:$0xff] %v9789_v12 }
 0x1ad   : > { %v1629_v29 = vpop.f32.mrf.mxu0  ;;  %7082 = vmatmul.mubr.msk.f32.gmra.mxu0 %vm675_vm1, %v2360_v2  ;;  %v9809_v2 = vpop.f32.mrf.mxu1  ;;  %vm6092_vm1 = vcmask 654336  }
 0x1ae   : > { %v9793_v17 = vadd.f32 %v1629_v29, %v9362_v0 }
 0x1af   : > { %v9797_v40 = vpop.f32.mrf.mxu0 }
 0x1b0   : > { %12079 = vst [vmem:[#allocation74_spill] sm:$0xff] %v9793_v17  ;;  %12080 = vst [vmem:[#allocation75_spill] sm:$0xff] %v9797_v40  ;;  %v9816_v40 = vpop.f32.mrf.mxu1 }
 0x1b1   : > { %v1635_v42 = vpop.f32.mrf.mxu0 }
 0x1b2   : > { %v9800_v6 = vadd.f32 %v1635_v42, %v9372_v16 }
 0x1b3   : > { %v9804_v47 = vpop.f32.mrf.mxu0 }
 0x1b4   : > { %12081 = vst [vmem:[#allocation76_spill] sm:$0xff] %v9800_v6  ;;  %12082 = vst [vmem:[#allocation77_spill] sm:$0xff] %v9804_v47  ;;  %v9823_v47 = vpop.f32.mrf.mxu1 }
 0x1b5   : > { %v1641_v19 = vpop.f32.mrf.mxu0 }
 0x1b6   : > { %v9807_v56 = vadd.f32 %v1641_v19, %v9382_v38 }
 0x1b7   : > { %v9811_v0 = vpop.f32.mrf.mxu0 }
 0x1b8   : > { %12083 = vst [vmem:[#allocation78_spill] sm:$0xff] %v9807_v56  ;;  %12084 = vst [vmem:[#allocation79_spill] sm:$0xff] %v9811_v0  ;;  %v9830_v0 = vpop.f32.mrf.mxu1 }
 0x1b9   : > { %v1647_v29 = vpop.f32.mrf.mxu0 }
 0x1ba   : > { %v9814_v17 = vadd.f32 %v1647_v29, %v9392_v1 }
 0x1bb   : > { %v9818_v16 = vpop.f32.mrf.mxu0 }
 0x1bc   : > { %12085 = vst [vmem:[#allocation80_spill] sm:$0xff] %v9814_v17  ;;  %12086 = vst [vmem:[#allocation81_spill] sm:$0xff] %v9818_v16  ;;  %v9837_v16 = vpop.f32.mrf.mxu1 }
 0x1bd   : > { %v1653_v42 = vpop.f32.mrf.mxu0 }
 0x1be   : > { %v9821_v6 = vadd.f32 %v1653_v42, %v9402_v27 }
 0x1bf   : > { %v9825_v38 = vpop.f32.mrf.mxu0 }
 0x1c0   : > { %12087 = vst [vmem:[#allocation82_spill] sm:$0xff] %v9821_v6  ;;  %12088 = vst [vmem:[#allocation83_spill] sm:$0xff] %v9825_v38  ;;  %v9844_v38 = vpop.f32.mrf.mxu1 }
 0x1c1   : > { %v1659_v19 = vpop.f32.mrf.mxu0 }
 0x1c2   : > { %v9828_v56 = vadd.f32 %v1659_v19, %v9412_v30 }
 0x1c3   : > { %v9832_v1 = vpop.f32.mrf.mxu0 }
 0x1c4   : > { %12089 = vst [vmem:[#allocation84_spill] sm:$0xff] %v9828_v56  ;;  %12090 = vst [vmem:[#allocation85_spill] sm:$0xff] %v9832_v1  ;;  %v9851_v1 = vpop.f32.mrf.mxu1 }
 0x1c5   : > { %v1665_v29 = vpop.f32.mrf.mxu0 }
 0x1c6   : > { %v9835_v17 = vadd.f32 %v1665_v29, %v9422_v25 }
 0x1c7   : > { %v9839_v27 = vpop.f32.mrf.mxu0 }
 0x1c8   : > { %12091 = vst [vmem:[#allocation86_spill] sm:$0xff] %v9835_v17  ;;  %12092 = vst [vmem:[#allocation87_spill] sm:$0xff] %v9839_v27  ;;  %v9858_v27 = vpop.f32.mrf.mxu1 }
 0x1c9   : > { %v1671_v42 = vpop.f32.mrf.mxu0 }
 0x1ca   : > { %v9842_v6 = vadd.f32 %v1671_v42, %v9432_v8 }
 0x1cb   : > { %v9846_v30 = vpop.f32.mrf.mxu0 }
 0x1cc   : > { %12093 = vst [vmem:[#allocation88_spill] sm:$0xff] %v9842_v6  ;;  %12094 = vst [vmem:[#allocation89_spill] sm:$0xff] %v9846_v30  ;;  %v9865_v30 = vpop.f32.mrf.mxu1 }
 0x1cd   : > { %v1677_v19 = vpop.f32.mrf.mxu0 }
 0x1ce   : > { %v9849_v56 = vadd.f32 %v1677_v19, %v9442_v57 }
 0x1cf   : > { %v9853_v25 = vpop.f32.mrf.mxu0 }
 0x1d0   : > { %12095 = vst [vmem:[#allocation90_spill] sm:$0xff] %v9849_v56  ;;  %12096 = vst [vmem:[#allocation91_spill] sm:$0xff] %v9853_v25  ;;  %v9872_v25 = vpop.f32.mrf.mxu1 }
 0x1d1   : > { %v1683_v29 = vpop.f32.mrf.mxu0 }
 0x1d2   : > { %v9856_v17 = vadd.f32 %v1683_v29, %v9452_v52 }
 0x1d3   : > { %v9860_v8 = vpop.f32.mrf.mxu0 }
 0x1d4   : > { %12097 = vst [vmem:[#allocation92_spill] sm:$0xff] %v9856_v17  ;;  %12098 = vst [vmem:[#allocation93_spill] sm:$0xff] %v9860_v8  ;;  %v9879_v8 = vpop.f32.mrf.mxu1 }
 0x1d5   : > { %v1689_v42 = vpop.f32.mrf.mxu0 }
 0x1d6   : > { %v9863_v6 = vadd.f32 %v1689_v42, %v9462_v62 }
 0x1d7   : > { %v9867_v57 = vpop.f32.mrf.mxu0 }
 0x1d8   : > { %12099 = vst [vmem:[#allocation94_spill] sm:$0xff] %v9863_v6  ;;  %12100 = vst [vmem:[#allocation95_spill] sm:$0xff] %v9867_v57  ;;  %v9886_v57 = vpop.f32.mrf.mxu1 }
 0x1d9   : > { %v1695_v19 = vpop.f32.mrf.mxu0 }
 0x1da   : > { %v9870_v56 = vadd.f32 %v1695_v19, %v9475_v41  ;;  %v9893_v12 = vpop.f32.mrf.mxu1 }
 0x1db   : > { %v9874_v52 = vpop.f32.mrf.mxu0 }
 0x1dc   : > { %12101 = vst [vmem:[#allocation96_spill] sm:$0xff] %v9870_v56  ;;  %12102 = vst [vmem:[#allocation97_spill] sm:$0xff] %v9874_v52  ;;  %v2748_v56 = vlaneseq }
 0x1dd   : > { %v1701_v29 = vpop.f32.mrf.mxu0 }
 0x1de   : > { %v9877_v17 = vadd.f32 %v1701_v29, %v9486_v15 }
 0x1df   : > { %v9881_v62 = vpop.f32.mrf.mxu0 }
 0x1e0   : > { %12103 = vst [vmem:[#allocation98_spill] sm:$0xff] %v9877_v17  ;;  %12104 = vst [vmem:[#allocation99_spill] sm:$0xff] %v9881_v62  ;;  %v9897_v17 = vshrl.u32 %v2748_v56, 7 }
 0x1e1   : > { %v1707_v42 = vpop.f32.mrf.mxu0 }
 0x1e2   : > { %v9884_v6 = vadd.f32 %v1707_v42, %v9503_v10  ;;  %v9902_v10 = vpop.f32.mrf.mxu1  ;;  %v12005_v56 = vsub.s32 1, %v9897_v17 }
 0x1e3   : > { %v9888_v41 = vpop.f32.mrf.mxu0  ;;  %12110 = vst [vmem:[#allocation105_spill] sm:$0xff] %v9902_v10 }
 0x1e4   : > { %12105 = vst [vmem:[#allocation100_spill] sm:$0xff] %v9884_v6  ;;  %12106 = vst [vmem:[#allocation101_spill] sm:$0xff] %v9888_v41  ;;  %v12004_v41 = vsub.s32 0, %v9897_v17 }
 0x1e5   : > { %v1713_v19 = vpop.f32.mrf.mxu0 }
 0x1e6   : > { %v9891_v52 = vadd.f32 %v1713_v19, %v9521_v9  ;;  %v2746_v19 = vld [vmem:[%s11978_s2] sm:$0x3] }
 0x1e7   : > { %v9895_v15 = vpop.f32.mrf.mxu0 }
 0x1e8   : > { %12107 = vst [vmem:[#allocation102_spill] sm:$0xff] %v9891_v52  ;;  %12108 = vst [vmem:[#allocation103_spill] sm:$0xff] %v9895_v15  ;;  %v9914_v52 = vpop.f32.mrf.mxu1 }
 0x1e9   : > { %v1719_v29 = vpop.f32.mrf.mxu0  ;;  %12113 = vst [vmem:[#allocation108_spill] sm:$0xff] %v9914_v52 }
 0x1ea   : > { %v9900_v62 = vadd.f32 %v1719_v29, %v9539_v61  ;;  %v2206_v29 = vadd.f32 %v9571_v26, %v9578_v21  ;;  %v9930_v15 = vpop.f32.mrf.mxu1 }
 0x1eb   : > { %v9904_v42 = vpop.f32.mrf.mxu0 }
 0x1ec   : > { %12109 = vst [vmem:[#allocation104_spill] sm:$0xff] %v9900_v62  ;;  %12111 = vst [vmem:[#allocation106_spill] sm:$0xff] %v9904_v42  ;;  %v9922_v42 = vrot.slane %v2746_v19, %v12004_v41  ;;  %v2209_v41 = vadd.f32 %v9623_v37, %v9610_v43 }
 0x1ed   : > { %v1725_v6 = vpop.f32.mrf.mxu0 }
 0x1ee   : > { %v9908_v9 = vadd.f32 %v1725_v6, %v9557_v7  ;;  %v2207_v7 = vadd.f32 %v9583_v23, %v9590_v50 }
 0x1ef   : > { %v9916_v61 = vpop.f32.mrf.mxu0 }
 0x1f0   : > { %12112 = vst [vmem:[#allocation107_spill] sm:$0xff] %v9908_v9  ;;  %12114 = vst [vmem:[#allocation109_spill] sm:$0xff] %v9916_v61  ;;  %v9928_v9 = vrot.slane %v2746_v19, %v12005_v56  ;;  %v2208_v61 = vadd.f32 %v9603_v39, %v9598_v44 }
 0x1f1   : > { %v2491_v62 = vpop.f32.mrf.mxu0 }
 0x1f2   : > { %v2682_v6 = vadd.f32 %v2491_v62, %v2206_v29  ;;  %v9938_v62 = vpop.f32.mrf.mxu1  ;;  %v2210_v29 = vadd.f32 %v9643_v34, %v9618_v18 }
 0x1f3   : > { %v2493_v52 = vpop.f32.mrf.mxu0 }
 0x1f4   : > { %v2683_v26 = vadd.f32 %v2493_v52, %v2207_v7  ;;  %v2758_v21 = vadd.f32 %v9922_v42, %v2682_v6  ;;  %v2211_v52 = vadd.f32 %v9663_v28, %v9630_v14  ;;  %v9946_v7 = vpop.f32.mrf.mxu1  ;;  %v2213_v6 = vadd.f32 %v9695_v3, %v9650_v4 }
 0x1f5   : > { %v2497_v10 = vpop.f32.mrf.mxu0 }
 0x1f6   : > { %v2759_v23 = vadd.f32 %v9928_v9, %v2683_v26  ;;  %v2684_v50 = vadd.f32 %v2497_v10, %v2208_v61  ;;  %v2212_v61 = vadd.f32 %v9683_v51, %v9638_v22 }
 0x1f7   : > { %v2499_v19 = vpop.f32.mrf.mxu0 }
 0x1f8   : > { %7901 = vtanh.f32 %v2759_v23  ;;  %v2685_v56 = vadd.f32 %v2499_v19, %v2209_v41  ;;  %v2760_v44 = vadd.f32 %v9922_v42, %v2684_v50  ;;  %v2215_v50 = vadd.f32 %v9719_v54, %v9670_v20 }
 0x1f9   : > { %7903 = vtanh.f32 %v2758_v21  ;;  %v2503_v39 = vpop.f32.mrf.mxu0  ;;  %v2214_v21 = vadd.f32 %v9707_v60, %v9658_v59  ;;  %v2217_v20 = vadd.f32 %v9741_v36, %v9686_v35  ;;  %v2219_v36 = vadd.f32 %v9763_v53, %v9698_v46 }
 0x1fa   : > { %v2761_v43 = vadd.f32 %v9928_v9, %v2685_v56  ;;  %v2686_v37 = vadd.f32 %v2503_v39, %v2210_v29  ;;  %v9954_v56 = vpop.f32.mrf.mxu1 }
 0x1fb   : > { %v2505_v10 = vpop.f32.mrf.mxu0 }
 0x1fc   : > { %7905 = vtanh.f32 %v2761_v43  ;;  %v2687_v18 = vadd.f32 %v2505_v10, %v2211_v52  ;;  %v2762_v34 = vadd.f32 %v9922_v42, %v2686_v37  ;;  %v9962_v19 = vpop.f32.mrf.mxu1 }
 0x1fd   : > { %7907 = vtanh.f32 %v2760_v44  ;;  %v2509_v41 = vpop.f32.mrf.mxu0  ;;  %v2216_v44 = vadd.f32 %v9730_v24, %v9678_v63  ;;  %v2218_v63 = vadd.f32 %v9752_v31, %v9690_v48  ;;  %v1178_v48 = vadd.f32 %v9268_v33, %v9266_v32  ;;  %v12115_v31 = vld [vmem:[#allocation60_spill] sm:$0xff] }
 0x1fe   : > { %v2763_v14 = vadd.f32 %v9928_v9, %v2687_v18  ;;  %v2688_v28 = vadd.f32 %v2509_v41, %v2212_v61  ;;  %v9971_v10 = vpop.f32.mrf.mxu1 }
 0x1ff   : > { %v2511_v26 = vpop.f32.mrf.mxu0 }
 0x200   : > { %7909 = vtanh.f32 %v2763_v14  ;;  %v2689_v22 = vadd.f32 %v2511_v26, %v2213_v6  ;;  %v2764_v51 = vadd.f32 %v9922_v42, %v2688_v28  ;;  %v9980_v28 = vpop.f32.mrf.mxu1 }
 0x201   : > { %7911 = vtanh.f32 %v2762_v34  ;;  %v2515_v23 = vpop.f32.mrf.mxu0 }
 0x202   : > { %v2765_v4 = vadd.f32 %v9928_v9, %v2689_v22  ;;  %v2690_v3 = vadd.f32 %v2515_v23, %v2214_v21  ;;  %v2220_v21 = vadd.f32 %v9776_v11, %v12115_v31  ;;  %v9992_v32 = vpop.f32.mrf.mxu1  ;;  %v12116_v11 = vld [vmem:[#allocation12_spill] sm:$0xff] }
 0x203   : > { %v2517_v29 = vpop.f32.mrf.mxu0 }
 0x204   : > { %7913 = vtanh.f32 %v2765_v4  ;;  %v2691_v59 = vadd.f32 %v2517_v29, %v2215_v50  ;;  %v2766_v39 = vadd.f32 %v9922_v42, %v2690_v3  ;;  %v2221_v50 = vadd.f32 %v9787_v58, %v9710_v5 }
 0x205   : > { %v7902_v60 = vpop.eup %7901  ;;  %7915 = vtanh.f32 %v2764_v51  ;;  %v2521_v52 = vpop.f32.mrf.mxu0  ;;  %v1747_v4 = vadd.f32 %v9721_v45, %v1178_v48 }
 0x206   : > { %v7904_v43 = vpop.eup %7903  ;;  %v2767_v54 = vadd.f32 %v9928_v9, %v2691_v59  ;;  %v2692_v37 = vadd.f32 %v2521_v52, %v2216_v44  ;;  %7083 = vmatprep.mubr.msk.f32.mxu1 %vm2907_vm5, %v7902_v60  ;;  %v12117_v44 = vld [vmem:[#allocation13_spill] sm:$0xff] }
 0x207   : > { %v2523_v61 = vpop.f32.mrf.mxu0  ;;  %3069 = vmatmul.mubr.f32.vlgmr.msra.gmra.mxu1 %v7904_v43  ;;  %v1184_v59 = vadd.f32 %v12117_v44, %v12116_v11  ;;  %v12118_v60 = vld [vmem:[#allocation61_spill] sm:$0xff] }
 0x208   : > { %7917 = vtanh.f32 %v2767_v54  ;;  %v2693_v24 = vadd.f32 %v2523_v61, %v2217_v20  ;;  %v2768_v34 = vadd.f32 %v9922_v42, %v2692_v37  ;;  %v2223_v20 = vadd.f32 %v9802_v55, %v1747_v4  ;;  %v12119_v54 = vld [vmem:[#allocation63_spill] sm:$0xff] }
 0x209   : > { %v7906_v18 = vpop.eup %7905  ;;  %7919 = vtanh.f32 %v2766_v39  ;;  %v2527_v41 = vpop.f32.mrf.mxu0  ;;  %v2222_v39 = vadd.f32 %v9795_v49, %v12118_v60  ;;  %v1749_v37 = vadd.f32 %v12119_v54, %v1184_v59 }
 0x20a   : > { %v7908_v35 = vpop.eup %7907  ;;  %v2769_v6 = vadd.f32 %v9928_v9, %v2693_v24  ;;  %v2694_v14 = vadd.f32 %v2527_v41, %v2218_v63  ;;  %7084 = vmatprep.mubr.msk.f32.mxu1 %vm2907_vm5, %v7906_v18  ;;  %v10003_v24 = vpop.f32.mrf.mxu1  ;;  %v12120_v18 = vld [vmem:[#allocation14_spill] sm:$0xff] }
 0x20b   : > { %v2529_v26 = vpop.f32.mrf.mxu0  ;;  %3074 = vmatmul.mubr.f32.gmra.mxu1 %v7908_v35  ;;  %v12122_v35 = vld [vmem:[#allocation62_spill] sm:$0xff]  ;;  %v2225_v31 = vadd.f32 %v9816_v40, %v1749_v37 }
 0x20c   : > { %7921 = vtanh.f32 %v2769_v6  ;;  %v2695_v22 = vadd.f32 %v2529_v26, %v2219_v36  ;;  %v2770_v46 = vadd.f32 %v9922_v42, %v2694_v14  ;;  %v2224_v36 = vadd.f32 %v9809_v2, %v12122_v35  ;;  %v12130_v37 = vld [vmem:[#allocation66_spill] sm:$0xff] }
 0x20d   : > { %v7910_v51 = vpop.eup %7909  ;;  %7923 = vtanh.f32 %v2768_v34  ;;  %v2533_v53 = vpop.f32.mrf.mxu0  ;;  %v12121_v34 = vld [vmem:[#allocation15_spill] sm:$0xff] }
 0x20e   : > { %v7912_v23 = vpop.eup %7911  ;;  %v2771_v3 = vadd.f32 %v9928_v9, %v2695_v22  ;;  %v2696_v29 = vadd.f32 %v2533_v53, %v2220_v21  ;;  %7085 = vmatprep.mubr.msk.f32.mxu1 %vm2907_vm5, %v7910_v51  ;;  %v1190_v41 = vadd.f32 %v12121_v34, %v12120_v18  ;;  %v12123_v21 = vld [vmem:[#allocation65_spill] sm:$0xff]  ;;  %v10014_v53 = vpop.f32.mrf.mxu1 }
 0x20f   : > { %v2535_v33 = vpop.f32.mrf.mxu0  ;;  %3079 = vmatmul.mubr.f32.gmra.mxu1 %v7912_v23  ;;  %v12124_v23 = vld [vmem:[#allocation16_spill] sm:$0xff] }
 0x210   : > { %7925 = vtanh.f32 %v2771_v3  ;;  %v2697_v52 = vadd.f32 %v2535_v33, %v2221_v50  ;;  %v2772_v45 = vadd.f32 %v9922_v42, %v2696_v29  ;;  %v1751_v22 = vadd.f32 %v12123_v21, %v1190_v41  ;;  %v12125_v50 = vld [vmem:[#allocation17_spill] sm:$0xff]  ;;  %v12126_v3 = vld [vmem:[#allocation64_spill] sm:$0xff] }
 0x211   : > { %v7914_v5 = vpop.eup %7913  ;;  %7927 = vtanh.f32 %v2770_v46  ;;  %v2539_v58 = vpop.f32.mrf.mxu0  ;;  %v1196_v4 = vadd.f32 %v12125_v50, %v12124_v23  ;;  %v2226_v29 = vadd.f32 %v9823_v47, %v12126_v3  ;;  %v12134_v23 = vld [vmem:[#allocation71_spill] sm:$0xff] }
 0x212   : > { %v7916_v43 = vpop.eup %7915  ;;  %v2773_v61 = vadd.f32 %v9928_v9, %v2697_v52  ;;  %v2698_v63 = vadd.f32 %v2539_v58, %v2222_v39  ;;  %7086 = vmatprep.mubr.msk.f32.mxu1 %vm2907_vm5, %v7914_v5  ;;  %v2227_v60 = vadd.f32 %v9830_v0, %v1751_v22  ;;  %v12127_v39 = vld [vmem:[#allocation67_spill] sm:$0xff]  ;;  %v10025_v58 = vpop.f32.mrf.mxu1 }
 0x213   : > { %v2541_v49 = vpop.f32.mrf.mxu0  ;;  %3084 = vmatmul.mubr.f32.gmra.mxu1 %v7916_v43  ;;  %v1753_v52 = vadd.f32 %v12127_v39, %v1196_v4  ;;  %v12128_v43 = vld [vmem:[#allocation18_spill] sm:$0xff] }
 0x214   : > { %7929 = vtanh.f32 %v2773_v61  ;;  %v2699_v6 = vadd.f32 %v2541_v49, %v2223_v20  ;;  %v2774_v14 = vadd.f32 %v9922_v42, %v2698_v63  ;;  %v12129_v20 = vld [vmem:[#allocation19_spill] sm:$0xff]  ;;  %v2228_v61 = vadd.f32 %v9837_v16, %v12130_v37 }
 0x215   : > { %v7918_v55 = vpop.eup %7917  ;;  %7931 = vtanh.f32 %v2772_v45  ;;  %v2545_v26 = vpop.f32.mrf.mxu0  ;;  %v1202_v54 = vadd.f32 %v12129_v20, %v12128_v43  ;;  %v2229_v41 = vadd.f32 %v9844_v38, %v1753_v52 }
 0x216   : > { %v7920_v48 = vpop.eup %7919  ;;  %v2775_v51 = vadd.f32 %v9928_v9, %v2699_v6  ;;  %v2700_v46 = vadd.f32 %v2545_v26, %v2224_v36  ;;  %7087 = vmatprep.mubr.msk.f32.mxu1 %vm2907_vm5, %v7918_v55  ;;  %v10036_v55 = vpop.f32.mrf.mxu1  ;;  %v12132_v26 = vld [vmem:[#allocation23_spill] sm:$0xff] }
 0x217   : > { %v2547_v2 = vpop.f32.mrf.mxu0  ;;  %3089 = vmatmul.mubr.f32.gmra.mxu1 %v7920_v48  ;;  %v1755_v35 = vadd.f32 %v9765_v13, %v1202_v54 }
 0x218   : > { %7933 = vtanh.f32 %v2775_v51  ;;  %v2701_v33 = vadd.f32 %v2547_v2, %v2225_v31  ;;  %v2776_v11 = vadd.f32 %v9922_v42, %v2700_v46  ;;  %v12133_v31 = vld [vmem:[#allocation68_spill] sm:$0xff] }
 0x219   : > { %v7922_v40 = vpop.eup %7921  ;;  %7935 = vtanh.f32 %v2774_v14  ;;  %v2551_v44 = vpop.f32.mrf.mxu0  ;;  %v12131_v14 = vld [vmem:[#allocation22_spill] sm:$0xff]  ;;  %v2230_v21 = vadd.f32 %v9851_v1, %v12133_v31  ;;  %v2231_v2 = vadd.f32 %v9858_v27, %v1755_v35 }
 0x21a   : > { %v7924_v59 = vpop.eup %7923  ;;  %v2777_v5 = vadd.f32 %v9928_v9, %v2701_v33  ;;  %v2702_v45 = vadd.f32 %v2551_v44, %v2226_v29  ;;  %7088 = vmatprep.mubr.msk.f32.mxu1 %vm2907_vm5, %v7922_v40  ;;  %v1208_v48 = vadd.f32 %v12132_v26, %v12131_v14  ;;  %v10047_v29 = vpop.f32.mrf.mxu1  ;;  %v12135_v33 = vld [vmem:[#allocation24_spill] sm:$0xff]  ;;  %v12136_v40 = vld [vmem:[#allocation25_spill] sm:$0xff] }
 0x21b   : > { %v2553_v47 = vpop.f32.mrf.mxu0  ;;  %3094 = vmatmul.mubr.f32.gmra.mxu1 %v7924_v59  ;;  %v12137_v44 = vld [vmem:[#allocation69_spill] sm:$0xff] }
 0x21c   : > { %7937 = vtanh.f32 %v2777_v5  ;;  %v2703_v63 = vadd.f32 %v2553_v47, %v2227_v60  ;;  %v2778_v49 = vadd.f32 %v9922_v42, %v2702_v45  ;;  %v1757_v50 = vadd.f32 %v12134_v23, %v1208_v48  ;;  %v12138_v47 = vld [vmem:[#allocation73_spill] sm:$0xff]  ;;  %v10058_v37 = vpop.f32.mrf.mxu1 }
 0x21d   : > { %v7926_v0 = vpop.eup %7925  ;;  %7939 = vtanh.f32 %v2776_v11  ;;  %v2557_v18 = vpop.f32.mrf.mxu0  ;;  %v1214_v11 = vadd.f32 %v12136_v40, %v12135_v33  ;;  %v2232_v59 = vadd.f32 %v9865_v30, %v12137_v44 }
 0x21e   : > { %v7928_v34 = vpop.eup %7927  ;;  %v2779_v36 = vadd.f32 %v9928_v9, %v2703_v63  ;;  %v2704_v6 = vadd.f32 %v2557_v18, %v2228_v61  ;;  %7089 = vmatprep.mubr.msk.f32.mxu1 %vm2907_vm5, %v7926_v0  ;;  %v2233_v45 = vadd.f32 %v9872_v25, %v1757_v50  ;;  %v12139_v61 = vld [vmem:[#allocation26_spill] sm:$0xff]  ;;  %v12140_v63 = vld [vmem:[#allocation27_spill] sm:$0xff]  ;;  %v10069_v31 = vpop.f32.mrf.mxu1 }
 0x21f   : > { %v2559_v16 = vpop.f32.mrf.mxu0  ;;  %3099 = vmatmul.mubr.f32.gmra.mxu1 %v7928_v34  ;;  %v1759_v43 = vadd.f32 %v12138_v47, %v1214_v11  ;;  %v1220_v0 = vadd.f32 %v12140_v63, %v12139_v61  ;;  %v12152_v61 = vld [vmem:[#allocation79_spill] sm:$0xff] }
 0x220   : > { %7941 = vtanh.f32 %v2779_v36  ;;  %v2705_v22 = vadd.f32 %v2559_v16, %v2229_v41  ;;  %v2780_v13 = vadd.f32 %v9922_v42, %v2704_v6  ;;  %v12142_v16 = vld [vmem:[#allocation75_spill] sm:$0xff]  ;;  %v10080_v44 = vpop.f32.mrf.mxu1 }
 0x221   : > { %v7930_v38 = vpop.eup %7929  ;;  %7943 = vtanh.f32 %v2778_v49  ;;  %v2563_v51 = vpop.f32.mrf.mxu0  ;;  %v12141_v49 = vld [vmem:[#allocation72_spill] sm:$0xff]  ;;  %v2235_v6 = vadd.f32 %v9886_v57, %v1759_v43  ;;  %v1761_v14 = vadd.f32 %v12142_v16, %v1220_v0 }
 0x222   : > { %v7932_v46 = vpop.eup %7931  ;;  %v2781_v4 = vadd.f32 %v9928_v9, %v2705_v22  ;;  %v2706_v3 = vadd.f32 %v2563_v51, %v2230_v21  ;;  %7090 = vmatprep.mubr.msk.f32.mxu1 %vm2907_vm5, %v7930_v38  ;;  %v2234_v18 = vadd.f32 %v9879_v8, %v12141_v49  ;;  %v12143_v21 = vld [vmem:[#allocation28_spill] sm:$0xff]  ;;  %v12144_v22 = vld [vmem:[#allocation29_spill] sm:$0xff] }
 0x223   : > { %v2565_v1 = vpop.f32.mrf.mxu0  ;;  %3104 = vmatmul.mubr.f32.gmra.mxu1 %v7932_v46  ;;  %v1226_v38 = vadd.f32 %v12144_v22, %v12143_v21  ;;  %v12156_v21 = vld [vmem:[#allocation81_spill] sm:$0xff] }
 0x224   : > { %7945 = vtanh.f32 %v2781_v4  ;;  %v2707_v60 = vadd.f32 %v2565_v1, %v2231_v2  ;;  %v2782_v39 = vadd.f32 %v9922_v42, %v2706_v3  ;;  %v12146_v4 = vld [vmem:[#allocation105_spill] sm:$0xff] }
 0x225   : > { %v7934_v27 = vpop.eup %7933  ;;  %7947 = vtanh.f32 %v2780_v13  ;;  %v2569_v52 = vpop.f32.mrf.mxu0  ;;  %v12145_v13 = vld [vmem:[#allocation74_spill] sm:$0xff]  ;;  %v2237_v3 = vadd.f32 %v12146_v4, %v1761_v14  ;;  %v12147_v1 = vld [vmem:[#allocation77_spill] sm:$0xff] }
 0x226   : > { %v7936_v5 = vpop.eup %7935  ;;  %v2783_v20 = vadd.f32 %v9928_v9, %v2707_v60  ;;  %v2708_v54 = vadd.f32 %v2569_v52, %v2232_v59  ;;  %7091 = vmatprep.mubr.msk.f32.mxu1 %vm2907_vm5, %v7934_v27  ;;  %v2236_v51 = vadd.f32 %v9893_v12, %v12145_v13  ;;  %v1763_v33 = vadd.f32 %v12147_v1, %v1226_v38  ;;  %v12148_v59 = vld [vmem:[#allocation30_spill] sm:$0xff]  ;;  %v12149_v60 = vld [vmem:[#allocation31_spill] sm:$0xff]  ;;  %v12151_v52 = vld [vmem:[#allocation108_spill] sm:$0xff] }
 0x227   : > { %v2571_v30 = vpop.f32.mrf.mxu0  ;;  %3109 = vmatmul.mubr.f32.gmra.mxu1 %v7936_v5  ;;  %v1232_v27 = vadd.f32 %v12149_v60, %v12148_v59 }
 0x228   : > { %7949 = vtanh.f32 %v2783_v20  ;;  %v2709_v34 = vadd.f32 %v2571_v30, %v2233_v45  ;;  %v2784_v41 = vadd.f32 %v9922_v42, %v2708_v54  ;;  %v2239_v30 = vadd.f32 %v9930_v15, %v1763_v33 }
 0x229   : > { %v7938_v25 = vpop.eup %7937  ;;  %7951 = vtanh.f32 %v2782_v39  ;;  %v2575_v35 = vpop.f32.mrf.mxu0  ;;  %v12150_v39 = vld [vmem:[#allocation76_spill] sm:$0xff]  ;;  %v1765_v63 = vadd.f32 %v12152_v61, %v1232_v27 }
 0x22a   : > { %v7940_v36 = vpop.eup %7939  ;;  %v2785_v26 = vadd.f32 %v9928_v9, %v2709_v34  ;;  %v2710_v48 = vadd.f32 %v2575_v35, %v2234_v18  ;;  %7092 = vmatprep.mubr.msk.f32.mxu1 %vm2907_vm5, %v7938_v25  ;;  %v2238_v5 = vadd.f32 %v12151_v52, %v12150_v39  ;;  %v10091_v18 = vpop.f32.mrf.mxu1  ;;  %v12153_v25 = vld [vmem:[#allocation32_spill] sm:$0xff]  ;;  %v12162_v52 = vld [vmem:[#allocation37_spill] sm:$0xff] }
 0x22b   : > { %v2577_v8 = vpop.f32.mrf.mxu0  ;;  %3114 = vmatmul.mubr.f32.gmra.mxu1 %v7940_v36  ;;  %v12155_v36 = vld [vmem:[#allocation78_spill] sm:$0xff]  ;;  %v12161_v39 = vld [vmem:[#allocation36_spill] sm:$0xff] }
 0x22c   : > { %7953 = vtanh.f32 %v2785_v26  ;;  %v2711_v46 = vadd.f32 %v2577_v8, %v2235_v6  ;;  %v2786_v2 = vadd.f32 %v9922_v42, %v2710_v48  ;;  %v2240_v6 = vadd.f32 %v9938_v62, %v12155_v36 }
 0x22d   : > { %v7942_v57 = vpop.eup %7941  ;;  %7955 = vtanh.f32 %v2784_v41  ;;  %v2581_v23 = vpop.f32.mrf.mxu0  ;;  %v12154_v41 = vld [vmem:[#allocation33_spill] sm:$0xff]  ;;  %v2241_v8 = vadd.f32 %v9946_v7, %v1765_v63 }
 0x22e   : > { %v7944_v50 = vpop.eup %7943  ;;  %v2787_v40 = vadd.f32 %v9928_v9, %v2711_v46  ;;  %v2712_v11 = vadd.f32 %v2581_v23, %v2236_v51  ;;  %7093 = vmatprep.mubr.msk.f32.mxu1 %vm2907_vm5, %v7942_v57  ;;  %v1238_v35 = vadd.f32 %v12154_v41, %v12153_v25  ;;  %v10102_v51 = vpop.f32.mrf.mxu1  ;;  %v12157_v46 = vld [vmem:[#allocation34_spill] sm:$0xff]  ;;  %v12158_v57 = vld [vmem:[#allocation35_spill] sm:$0xff]  ;;  %v12159_v23 = vld [vmem:[#allocation80_spill] sm:$0xff] }
 0x22f   : > { %v2583_v12 = vpop.f32.mrf.mxu0  ;;  %3119 = vmatmul.mubr.f32.gmra.mxu1 %v7944_v50  ;;  %v2242_v50 = vadd.f32 %v9954_v56, %v12159_v23  ;;  %v12164_v63 = vld [vmem:[#allocation85_spill] sm:$0xff]  ;;  %v12165_v41 = vld [vmem:[#allocation38_spill] sm:$0xff] }
 0x230   : > { %7957 = vtanh.f32 %v2787_v40  ;;  %v2713_v45 = vadd.f32 %v2583_v12, %v2237_v3  ;;  %v2788_v43 = vadd.f32 %v9922_v42, %v2712_v11  ;;  %v1767_v22 = vadd.f32 %v12156_v21, %v1238_v35  ;;  %v12160_v11 = vld [vmem:[#allocation83_spill] sm:$0xff]  ;;  %v10113_v27 = vpop.f32.mrf.mxu1  ;;  %v12171_v23 = vld [vmem:[#allocation86_spill] sm:$0xff] }
 0x231   : > { %v7946_v47 = vpop.eup %7945  ;;  %7959 = vtanh.f32 %v2786_v2  ;;  %v2587_v20 = vpop.f32.mrf.mxu0  ;;  %v1244_v2 = vadd.f32 %v12158_v57, %v12157_v46  ;;  %v12166_v35 = vld [vmem:[#allocation39_spill] sm:$0xff]  ;;  %v12169_v46 = vld [vmem:[#allocation40_spill] sm:$0xff]  ;;  %v12170_v57 = vld [vmem:[#allocation41_spill] sm:$0xff] }
 0x232   : > { %v7948_v54 = vpop.eup %7947  ;;  %v2789_v0 = vadd.f32 %v9928_v9, %v2713_v45  ;;  %v2714_v49 = vadd.f32 %v2587_v20, %v2238_v5  ;;  %7094 = vmatprep.mubr.msk.f32.mxu1 %vm2907_vm5, %v7946_v47  ;;  %v2243_v40 = vadd.f32 %v9962_v19, %v1767_v22  ;;  %v1250_v5 = vadd.f32 %v12162_v52, %v12161_v39  ;;  %v12163_v45 = vld [vmem:[#allocation82_spill] sm:$0xff]  ;;  %v10124_v25 = vpop.f32.mrf.mxu1  ;;  %v12168_v21 = vld [vmem:[#allocation87_spill] sm:$0xff] }
 0x233   : > { %v2589_v34 = vpop.f32.mrf.mxu0  ;;  %3124 = vmatmul.mubr.f32.gmra.mxu1 %v7948_v54  ;;  %v1769_v12 = vadd.f32 %v12160_v11, %v1244_v2  ;;  %v2244_v47 = vadd.f32 %v9971_v10, %v12163_v45  ;;  %v1256_v36 = vadd.f32 %v12166_v35, %v12165_v41  ;;  %v1262_v2 = vadd.f32 %v12170_v57, %v12169_v46  ;;  %v12174_v39 = vld [vmem:[#allocation43_spill] sm:$0xff]  ;;  %v12179_v35 = vld [vmem:[#allocation90_spill] sm:$0xff]  ;;  %v12183_v46 = vld [vmem:[#allocation92_spill] sm:$0xff] }
 0x234   : > { %7961 = vtanh.f32 %v2789_v0  ;;  %v2715_v16 = vadd.f32 %v2589_v34, %v2239_v30  ;;  %v2790_v14 = vadd.f32 %v9922_v42, %v2714_v49  ;;  %v1771_v0 = vadd.f32 %v12164_v63, %v1250_v5  ;;  %v12175_v5 = vld [vmem:[#allocation88_spill] sm:$0xff] }
 0x235   : > { %v7950_v15 = vpop.eup %7949  ;;  %7963 = vtanh.f32 %v2788_v43  ;;  %v2593_v26 = vpop.f32.mrf.mxu0  ;;  %v2245_v61 = vadd.f32 %v9980_v28, %v1769_v12  ;;  %v1773_v22 = vadd.f32 %v12168_v21, %v1256_v36  ;;  %v2250_v45 = vadd.f32 %v10036_v55, %v12175_v5 }
 0x236   : > { %v7952_v48 = vpop.eup %7951  ;;  %v2791_v38 = vadd.f32 %v9928_v9, %v2715_v16  ;;  %v2716_v13 = vadd.f32 %v2593_v26, %v2240_v6  ;;  %7095 = vmatprep.mubr.msk.f32.mxu1 %vm2907_vm5, %v7950_v15  ;;  %v12167_v6 = vld [vmem:[#allocation84_spill] sm:$0xff]  ;;  %v2252_v36 = vadd.f32 %v10058_v37, %v12179_v35  ;;  %v2254_v57 = vadd.f32 %v10080_v44, %v12183_v46 }
 0x237   : > { %v2595_v62 = vpop.f32.mrf.mxu0  ;;  %3129 = vmatmul.mubr.f32.gmra.mxu1 %v7952_v48  ;;  %v2246_v16 = vadd.f32 %v9992_v32, %v12167_v6 }
 0x238   : > { %7965 = vtanh.f32 %v2791_v38  ;;  %v2717_v4 = vadd.f32 %v2595_v62, %v2241_v8  ;;  %v2792_v3 = vadd.f32 %v9922_v42, %v2716_v13  ;;  %v2247_v8 = vadd.f32 %v10003_v24, %v1771_v0  ;;  %v10135_v62 = vpop.f32.mrf.mxu1 }
 0x239   : > { %v7954_v7 = vpop.eup %7953  ;;  %7967 = vtanh.f32 %v2790_v14  ;;  %v2599_v1 = vpop.f32.mrf.mxu0 }
 0x23a   : > { %v7956_v33 = vpop.eup %7955  ;;  %v2793_v59 = vadd.f32 %v9928_v9, %v2717_v4  ;;  %v2718_v60 = vadd.f32 %v2599_v1, %v2242_v50  ;;  %7096 = vmatprep.mubr.msk.f32.mxu1 %vm2907_vm5, %v7954_v7  ;;  %v2248_v50 = vadd.f32 %v10014_v53, %v12171_v23 }
 0x23b   : > { %v2601_v56 = vpop.f32.mrf.mxu0  ;;  %3134 = vmatmul.mubr.f32.gmra.mxu1 %v7956_v33  ;;  %v2249_v33 = vadd.f32 %v10025_v58, %v1773_v22 }
 0x23c   : > { %7969 = vtanh.f32 %v2793_v59  ;;  %v2719_v43 = vadd.f32 %v2601_v56, %v2243_v40  ;;  %v2794_v20 = vadd.f32 %v9922_v42, %v2718_v60  ;;  %v12172_v40 = vld [vmem:[#allocation89_spill] sm:$0xff]  ;;  %v10146_v60 = vpop.f32.mrf.mxu1  ;;  %v12173_v56 = vld [vmem:[#allocation42_spill] sm:$0xff] }
 0x23d   : > { %v7958_v19 = vpop.eup %7957  ;;  %7971 = vtanh.f32 %v2792_v3  ;;  %v2605_v54 = vpop.f32.mrf.mxu0  ;;  %v1775_v11 = vadd.f32 %v12172_v40, %v1262_v2  ;;  %v1268_v52 = vadd.f32 %v12174_v39, %v12173_v56 }
 0x23e   : > { %v7960_v30 = vpop.eup %7959  ;;  %v2795_v49 = vadd.f32 %v9928_v9, %v2719_v43  ;;  %v2720_v34 = vadd.f32 %v2605_v54, %v2244_v47  ;;  %7097 = vmatprep.mubr.msk.f32.mxu1 %vm2907_vm5, %v7958_v19 }
 0x23f   : > { %v2607_v10 = vpop.f32.mrf.mxu0  ;;  %3139 = vmatmul.mubr.f32.gmra.mxu1 %v7960_v30  ;;  %v2251_v54 = vadd.f32 %v10047_v29, %v1775_v11  ;;  %v12176_v30 = vld [vmem:[#allocation91_spill] sm:$0xff]  ;;  %v12185_v11 = vld [vmem:[#allocation48_spill] sm:$0xff] }
 0x240   : > { %7973 = vtanh.f32 %v2795_v49  ;;  %v2721_v15 = vadd.f32 %v2607_v10, %v2245_v61  ;;  %v2796_v14 = vadd.f32 %v9922_v42, %v2720_v34  ;;  %v1777_v61 = vadd.f32 %v12176_v30, %v1268_v52  ;;  %v10157_v49 = vpop.f32.mrf.mxu1  ;;  %v12177_v34 = vld [vmem:[#allocation44_spill] sm:$0xff]  ;;  %v12178_v10 = vld [vmem:[#allocation45_spill] sm:$0xff] }
 0x241   : > { %v7962_v28 = vpop.eup %7961  ;;  %7975 = vtanh.f32 %v2794_v20  ;;  %v2611_v26 = vpop.f32.mrf.mxu0  ;;  %v1274_v41 = vadd.f32 %v12178_v10, %v12177_v34 }
 0x242   : > { %v7964_v48 = vpop.eup %7963  ;;  %v2797_v38 = vadd.f32 %v9928_v9, %v2721_v15  ;;  %v2722_v13 = vadd.f32 %v2611_v26, %v2246_v16  ;;  %7098 = vmatprep.mubr.msk.f32.mxu1 %vm2907_vm5, %v7962_v28  ;;  %v12180_v26 = vld [vmem:[#allocation93_spill] sm:$0xff]  ;;  %v10168_v22 = vpop.f32.mrf.mxu1 }
 0x243   : > { %v2613_v32 = vpop.f32.mrf.mxu0  ;;  %3144 = vmatmul.mubr.f32.gmra.mxu1 %v7964_v48  ;;  %v1779_v48 = vadd.f32 %v12180_v26, %v1274_v41  ;;  %v12194_v26 = vld [vmem:[#allocation53_spill] sm:$0xff] }
 0x244   : > { %7977 = vtanh.f32 %v2797_v38  ;;  %v2723_v4 = vadd.f32 %v2613_v32, %v2247_v8  ;;  %v2798_v7 = vadd.f32 %v9922_v42, %v2722_v13  ;;  %v12181_v38 = vld [vmem:[#allocation46_spill] sm:$0xff]  ;;  %v12182_v13 = vld [vmem:[#allocation47_spill] sm:$0xff]  ;;  %v10179_v40 = vpop.f32.mrf.mxu1 }
 0x245   : > { %v7966_v24 = vpop.eup %7965  ;;  %7979 = vtanh.f32 %v2796_v14  ;;  %v2617_v3 = vpop.f32.mrf.mxu0  ;;  %v2253_v14 = vadd.f32 %v10069_v31, %v1777_v61  ;;  %v1280_v32 = vadd.f32 %v12182_v13, %v12181_v38  ;;  %v12190_v61 = vld [vmem:[#allocation51_spill] sm:$0xff] }
 0x246   : > { %v7968_v1 = vpop.eup %7967  ;;  %v2799_v12 = vadd.f32 %v9928_v9, %v2723_v4  ;;  %v2724_v59 = vadd.f32 %v2617_v3, %v2248_v50  ;;  %7099 = vmatprep.mubr.msk.f32.mxu1 %vm2907_vm5, %v7966_v24  ;;  %v2255_v24 = vadd.f32 %v10091_v18, %v1779_v48 }
 0x247   : > { %v2619_v53 = vpop.f32.mrf.mxu0  ;;  %3149 = vmatmul.mubr.f32.gmra.mxu1 %v7968_v1 }
 0x248   : > { %7981 = vtanh.f32 %v2799_v12  ;;  %v2725_v47 = vadd.f32 %v2619_v53, %v2249_v33  ;;  %v2800_v43 = vadd.f32 %v9922_v42, %v2724_v59  ;;  %v12186_v12 = vld [vmem:[#allocation49_spill] sm:$0xff]  ;;  %v12187_v53 = vld [vmem:[#allocation94_spill] sm:$0xff] }
 0x249   : > { %v7970_v58 = vpop.eup %7969  ;;  %7983 = vtanh.f32 %v2798_v7  ;;  %v2623_v19 = vpop.f32.mrf.mxu0  ;;  %v12184_v7 = vld [vmem:[#allocation95_spill] sm:$0xff]  ;;  %v1286_v59 = vadd.f32 %v12186_v12, %v12185_v11  ;;  %v2256_v56 = vadd.f32 %v10102_v51, %v12187_v53  ;;  %v12189_v51 = vld [vmem:[#allocation50_spill] sm:$0xff] }
 0x24a   : > { %v7972_v20 = vpop.eup %7971  ;;  %v2801_v63 = vadd.f32 %v9928_v9, %v2725_v47  ;;  %v2726_v0 = vadd.f32 %v2623_v19, %v2250_v45  ;;  %7100 = vmatprep.mubr.msk.f32.mxu1 %vm2907_vm5, %v7970_v58  ;;  %v1781_v3 = vadd.f32 %v12184_v7, %v1280_v32  ;;  %v12188_v58 = vld [vmem:[#allocation97_spill] sm:$0xff]  ;;  %v12200_v53 = vld [vmem:[#allocation103_spill] sm:$0xff] }
 0x24b   : > { %v2625_v55 = vpop.f32.mrf.mxu0  ;;  %3154 = vmatmul.mubr.f32.gmra.mxu1 %v7972_v20 }
 0x24c   : > { %7985 = vtanh.f32 %v2801_v63  ;;  %v2727_v6 = vadd.f32 %v2625_v55, %v2251_v54  ;;  %v2802_v16 = vadd.f32 %v9922_v42, %v2726_v0  ;;  %v2257_v47 = vadd.f32 %v10113_v27, %v1781_v3  ;;  %v2189_v54 = vpop.f32.mrf.mxu1  ;;  %v12191_v0 = vld [vmem:[#allocation96_spill] sm:$0xff] }
 0x24d   : > { %v7974_v29 = vpop.eup %7973  ;;  %7987 = vtanh.f32 %v2800_v43  ;;  %v2629_v15 = vpop.f32.mrf.mxu0  ;;  %v1783_v43 = vadd.f32 %v12188_v58, %v1286_v59  ;;  %v1292_v63 = vadd.f32 %v12190_v61, %v12189_v51  ;;  %v2258_v55 = vadd.f32 %v10124_v25, %v12191_v0  ;;  %v12193_v25 = vld [vmem:[#allocation52_spill] sm:$0xff]  ;;  %v12204_v0 = vld [vmem:[#allocation106_spill] sm:$0xff] }
 0x24e   : > { %v7976_v28 = vpop.eup %7975  ;;  %v2803_v8 = vadd.f32 %v9928_v9, %v2727_v6  ;;  %v2728_v21 = vadd.f32 %v2629_v15, %v2252_v36  ;;  %7101 = vmatprep.mubr.msk.f32.mxu1 %vm2907_vm5, %v7974_v29  ;;  %v12192_v6 = vld [vmem:[#allocation99_spill] sm:$0xff]  ;;  %v1298_v48 = vadd.f32 %v12194_v26, %v12193_v25  ;;  %v12199_v3 = vld [vmem:[#allocation100_spill] sm:$0xff] }
 0x24f   : > { %v2631_v37 = vpop.f32.mrf.mxu0  ;;  %3159 = vmatmul.mubr.f32.gmra.mxu1 %v7976_v28  ;;  %v2259_v36 = vadd.f32 %v10135_v62, %v1783_v43  ;;  %v1785_v29 = vadd.f32 %v12192_v6, %v1292_v63  ;;  %v2191_v28 = vpop.f32.mrf.mxu1  ;;  %v12207_v6 = vld [vmem:[#allocation104_spill] sm:$0xff] }
 0x250   : > { %7989 = vtanh.f32 %v2803_v8  ;;  %v2729_v2 = vadd.f32 %v2631_v37, %v2253_v14  ;;  %v2804_v23 = vadd.f32 %v9922_v42, %v2728_v21  ;;  %v12195_v8 = vld [vmem:[#allocation98_spill] sm:$0xff] }
 0x251   : > { %v7978_v31 = vpop.eup %7977  ;;  %7991 = vtanh.f32 %v2802_v16  ;;  %v2635_v50 = vpop.f32.mrf.mxu0  ;;  %v2260_v21 = vadd.f32 %v10146_v60, %v12195_v8  ;;  %v2261_v46 = vadd.f32 %v10157_v49, %v1785_v29  ;;  %v12197_v60 = vld [vmem:[#allocation54_spill] sm:$0xff] }
 0x252   : > { %v7980_v4 = vpop.eup %7979  ;;  %v2805_v1 = vadd.f32 %v9928_v9, %v2729_v2  ;;  %v2730_v33 = vadd.f32 %v2635_v50, %v2254_v57  ;;  %7102 = vmatprep.mubr.msk.f32.mxu1 %vm2907_vm5, %v7978_v31  ;;  %v12196_v57 = vld [vmem:[#allocation101_spill] sm:$0xff]  ;;  %v2195_v50 = vpop.f32.mrf.mxu1 }
 0x253   : > { %v2637_v44 = vpop.f32.mrf.mxu0  ;;  %3164 = vmatmul.mubr.f32.gmra.mxu1 %v7980_v4  ;;  %v1787_v2 = vadd.f32 %v12196_v57, %v1298_v48  ;;  %v2266_v29 = vadd.f32 %v2195_v50, %v12207_v6  ;;  %v12208_v48 = vld [vmem:[#allocation109_spill] sm:$0xff] }
 0x254   : > { %7993 = vtanh.f32 %v2805_v1  ;;  %v2731_v39 = vadd.f32 %v2637_v44, %v2255_v24  ;;  %v2806_v52 = vadd.f32 %v9922_v42, %v2730_v33  ;;  %v12198_v24 = vld [vmem:[#allocation55_spill] sm:$0xff]  ;;  %v2262_v1 = vadd.f32 %v10168_v22, %v12199_v3  ;;  %v10220_v22 = vld [vmem:[%s11980_s4] sm:$0xff] }
 0x255   : > { %v7982_v18 = vpop.eup %7981  ;;  %7995 = vtanh.f32 %v2804_v23  ;;  %v2641_v5 = vpop.f32.mrf.mxu0  ;;  %v1304_v7 = vadd.f32 %v12198_v24, %v12197_v60  ;;  %v2263_v59 = vadd.f32 %v10179_v40, %v1787_v2  ;;  %v12203_v40 = vld [vmem:[#allocation102_spill] sm:$0xff]  ;;  %7573 = vmatprep.mubr.msk.f32.mxu0 %vm3231_vm6, %v10220_v22 }
 0x256   : > { %v7984_v45 = vpop.eup %7983  ;;  %v2807_v19 = vadd.f32 %v9928_v9, %v2731_v39  ;;  %v2732_v20 = vadd.f32 %v2641_v5, %v2256_v56  ;;  %7103 = vmatprep.mubr.msk.f32.mxu1 %vm2907_vm5, %v7982_v18  ;;  %v2264_v43 = vadd.f32 %v2189_v54, %v12203_v40 }
 0x257   : > { %v2643_v30 = vpop.f32.mrf.mxu0  ;;  %3169 = vmatmul.mubr.f32.gmra.mxu1 %v7984_v45  ;;  %v1789_v56 = vadd.f32 %v12200_v53, %v1304_v7  ;;  %v12201_v45 = vld [vmem:[#allocation56_spill] sm:$0xff] }
 0x258   : > { %7997 = vtanh.f32 %v2807_v19  ;;  %v2733_v34 = vadd.f32 %v2643_v30, %v2257_v47  ;;  %v2808_v27 = vadd.f32 %v9922_v42, %v2732_v20  ;;  %v12202_v47 = vld [vmem:[#allocation57_spill] sm:$0xff] }
 0x259   : > { %v7986_v10 = vpop.eup %7985  ;;  %7999 = vtanh.f32 %v2806_v52  ;;  %v2647_v41 = vpop.f32.mrf.mxu0  ;;  %v1310_v58 = vadd.f32 %v12202_v47, %v12201_v45  ;;  %v2265_v63 = vadd.f32 %v2191_v28, %v1789_v56 }
 0x25a   : > { %v7988_v35 = vpop.eup %7987  ;;  %v2809_v16 = vadd.f32 %v9928_v9, %v2733_v34  ;;  %v2734_v15 = vadd.f32 %v2647_v41, %v2258_v55  ;;  %7104 = vmatprep.mubr.msk.f32.mxu1 %vm2907_vm5, %v7986_v10  ;;  %v2197_v52 = vpop.f32.mrf.mxu1  ;;  %v12205_v41 = vld [vmem:[#allocation58_spill] sm:$0xff] }
 0x25b   : > { %v2649_v14 = vpop.f32.mrf.mxu0  ;;  %3174 = vmatmul.mubr.f32.gmra.mxu1 %v7988_v35  ;;  %v1791_v55 = vadd.f32 %v12204_v0, %v1310_v58  ;;  %v12206_v35 = vld [vmem:[#allocation59_spill] sm:$0xff] }
 0x25c   : > { %8001 = vtanh.f32 %v2809_v16  ;;  %v2735_v37 = vadd.f32 %v2649_v14, %v2259_v36  ;;  %v2810_v62 = vadd.f32 %v9922_v42, %v2734_v15  ;;  %v2201_v54 = vpop.f32.mrf.mxu1  ;;  %v1316_v36 = vadd.f32 %v12206_v35, %v12205_v41 }
 0x25d   : > { %v7990_v38 = vpop.eup %7989  ;;  %8003 = vtanh.f32 %v2808_v27  ;;  %v2653_v13 = vpop.f32.mrf.mxu0  ;;  %v2267_v26 = vadd.f32 %v2197_v52, %v1791_v55 }
 0x25e   : > { %v7992_v32 = vpop.eup %7991  ;;  %v2811_v31 = vadd.f32 %v9928_v9, %v2735_v37  ;;  %v2736_v23 = vadd.f32 %v2653_v13, %v2260_v21  ;;  %7105 = vmatprep.mubr.msk.f32.mxu1 %vm2907_vm5, %v7990_v38  ;;  %v1793_v8 = vadd.f32 %v12208_v48, %v1316_v36  ;;  %v2203_v38 = vpop.f32.mrf.mxu1  ;;  %v12209_v13 = vld [vmem:[#allocation107_spill] sm:$0xff] }
 0x25f   : > { %v2655_v4 = vpop.f32.mrf.mxu0  ;;  %3179 = vmatmul.mubr.f32.gmra.mxu1 %v7992_v32  ;;  %v2268_v32 = vadd.f32 %v2201_v54, %v12209_v13 }
 0x260   : > { %8005 = vtanh.f32 %v2811_v31  ;;  %v2737_v33 = vadd.f32 %v2655_v4, %v2261_v46  ;;  %v2812_v49 = vadd.f32 %v9922_v42, %v2736_v23  ;;  %v2269_v50 = vadd.f32 %v2203_v38, %v1793_v8 }
 0x261   : > { %v7994_v44 = vpop.eup %7993  ;;  %8007 = vtanh.f32 %v2810_v62  ;;  %v2659_v11 = vpop.f32.mrf.mxu0 }
 0x262   : > { %v7996_v12 = vpop.eup %7995  ;;  %v2813_v39 = vadd.f32 %v9928_v9, %v2737_v33  ;;  %v2738_v18 = vadd.f32 %v2659_v11, %v2262_v1  ;;  %7106 = vmatprep.mubr.msk.f32.mxu1 %vm2907_vm5, %v7994_v44 }
 0x263   : > { %v2661_v5 = vpop.f32.mrf.mxu0  ;;  %3184 = vmatmul.mubr.f32.gmra.mxu1 %v7996_v12 }
 0x264   : > { %8009 = vtanh.f32 %v2813_v39  ;;  %v2739_v19 = vadd.f32 %v2661_v5, %v2263_v59  ;;  %v2814_v30 = vadd.f32 %v9922_v42, %v2738_v18 }
 0x265   : > { %v7998_v20 = vpop.eup %7997  ;;  %8011 = vtanh.f32 %v2812_v49  ;;  %v2665_v51 = vpop.f32.mrf.mxu0 }
 0x266   : > { %v8000_v61 = vpop.eup %7999  ;;  %v2815_v34 = vadd.f32 %v9928_v9, %v2739_v19  ;;  %v2740_v10 = vadd.f32 %v2665_v51, %v2264_v43  ;;  %7107 = vmatprep.mubr.msk.f32.mxu1 %vm2907_vm5, %v7998_v20  ;;  %v10254_v20 = vld [vmem:[%s11980_s4 + $0x8] sm:$0xff] }
 0x267   : > { %v2667_v27 = vpop.f32.mrf.mxu0  ;;  %3189 = vmatmul.mubr.f32.gmra.mxu1 %v8000_v61 }
 0x268   : > { %8013 = vtanh.f32 %v2815_v34  ;;  %v2741_v16 = vadd.f32 %v2667_v27, %v2265_v63  ;;  %v2816_v28 = vadd.f32 %v9922_v42, %v2740_v10 }
 0x269   : > { %v8002_v15 = vpop.eup %8001  ;;  %8015 = vtanh.f32 %v2814_v30  ;;  %v2671_v14 = vpop.f32.mrf.mxu0 }
 0x26a   : > { %v8004_v25 = vpop.eup %8003  ;;  %v2817_v21 = vadd.f32 %v9928_v9, %v2741_v16  ;;  %v2742_v37 = vadd.f32 %v2671_v14, %v2266_v29  ;;  %7108 = vmatprep.mubr.msk.f32.mxu1 %vm2907_vm5, %v8002_v15 }
 0x26b   : > { %v2673_v62 = vpop.f32.mrf.mxu0  ;;  %3194 = vmatmul.mubr.f32.gmra.mxu1 %v8004_v25 }
 0x26c   : > { %8017 = vtanh.f32 %v2817_v21  ;;  %v2743_v46 = vadd.f32 %v2673_v62, %v2267_v26  ;;  %v2818_v2 = vadd.f32 %v9922_v42, %v2742_v37 }
 0x26d   : > { %v8006_v57 = vpop.eup %8005  ;;  %8019 = vtanh.f32 %v2816_v28  ;;  %v2677_v31 = vpop.f32.mrf.mxu0 }
 0x26e   : > { %v8008_v23 = vpop.eup %8007  ;;  %v2819_v4 = vadd.f32 %v9928_v9, %v2743_v46  ;;  %v2744_v60 = vadd.f32 %v2677_v31, %v2268_v32  ;;  %7109 = vmatprep.mubr.msk.f32.mxu1 %vm2907_vm5, %v8006_v57 }
 0x26f   : > { %v2679_v24 = vpop.f32.mrf.mxu0  ;;  %3199 = vmatmul.mubr.f32.gmra.mxu1 %v8008_v23 }
 0x270   : > { %8021 = vtanh.f32 %v2819_v4  ;;  %v2745_v7 = vadd.f32 %v2679_v24, %v2269_v50  ;;  %v2820_v1 = vadd.f32 %v9922_v42, %v2744_v60 }
 0x271   : > { %v8010_v3 = vpop.eup %8009  ;;  %8023 = vtanh.f32 %v2818_v2 }
 0x272   : > { %v8012_v33 = vpop.eup %8011  ;;  %v2821_v44 = vadd.f32 %v9928_v9, %v2745_v7  ;;  %7110 = vmatprep.mubr.msk.f32.mxu1 %vm2907_vm5, %v8010_v3 }
 0x273   : > { %3204 = vmatmul.mubr.f32.gmra.mxu1 %v8012_v33 }
 0x274   : > { %8025 = vtanh.f32 %v2821_v44 }
 0x275   : > { %v8014_v49 = vpop.eup %8013  ;;  %8027 = vtanh.f32 %v2820_v1 }
 0x276   : > { %v8016_v11 = vpop.eup %8015  ;;  %7111 = vmatprep.mubr.msk.f32.mxu1 %vm2907_vm5, %v8014_v49 }
 0x277   : > { %3209 = vmatmul.mubr.f32.gmra.mxu1 %v8016_v11 }
 0x279   : > { %v8018_v12 = vpop.eup %8017 }
 0x27a   : > { %v8020_v59 = vpop.eup %8019  ;;  %7112 = vmatprep.mubr.msk.f32.mxu1 %vm2907_vm5, %v8018_v12 }
 0x27b   : > { %3214 = vmatmul.mubr.f32.gmra.mxu1 %v8020_v59 }
 0x27d   : > { %v8022_v53 = vpop.eup %8021 }
 0x27e   : > { %v8024_v42 = vpop.eup %8023  ;;  %7113 = vmatprep.mubr.msk.f32.mxu1 %vm2907_vm5, %v8022_v53 }
 0x27f   : > { %3219 = vmatmul.mubr.f32.gmra.mxu1 %v8024_v42  ;;  %v7152_v42 = vld [vmem:[%s11981_s5 + $0x158] sm:$0xf] }
 0x281   : > { %v8026_v9 = vpop.eup %8025 }
 0x282   : > { %v8028_v56 = vpop.eup %8027  ;;  %7114 = vmatprep.mubr.msk.f32.mxu1 %vm2907_vm5, %v8026_v9 }
 0x283   : > { %3224 = vmatmul.mubr.f32.gmra.mxu1 %v8028_v56  ;;  %v7150_v56 = vld [vmem:[%s11981_s5 + $0x148] sm:$0xff] }
 0x284   : > { %7551 = vmatprep.mubr.msk.f32.mxu1 %vm3231_vm6, %v10220_v22 }
 0x2c7   : > { %v3070_v39 = vpop.f32.mrf.mxu1 }
 0x2c9   : > { %v3072_v18 = vpop.f32.mrf.mxu1 }
 0x2cb   : > { %v3075_v52 = vpop.f32.mrf.mxu1 }
 0x2cd   : > { %v3077_v5 = vpop.f32.mrf.mxu1 }
 0x2ce   : > { %v12210_v5 = vmov 0.0  }
 0x2cf   : > { %v3080_v45 = vpop.f32.mrf.mxu1 }
 0x2d1   : > { %v3082_v47 = vpop.f32.mrf.mxu1 }
 0x2d3   : > { %v3085_v58 = vpop.f32.mrf.mxu1 }
 0x2d4   : > { %7543 = vmatprep.subr.mxu1 %v3085_v58 }
 0x2d5   : > { %v3087_v40 = vpop.f32.mrf.mxu1  ;;  %7544 = vmatpush3.msra.mxu1 %v3085_v58  ;;  %v7146_v58 = vld [vmem:[%s11981_s5 + $0x128] sm:$0xff] }
 0x2d6   : > { %7545 = vmatprep.subr.mxu1 %v3080_v45  ;;  %v7145_v40 = vld [vmem:[%s11981_s5 + $0x120] sm:$0xff] }
 0x2d7   : > { %v3090_v43 = vpop.f32.mrf.mxu1  ;;  %7546 = vmatpush3.msra.mxu1 %v3080_v45  ;;  %v7147_v45 = vld [vmem:[%s11981_s5 + $0x130] sm:$0xff] }
 0x2d8   : > { %7547 = vmatprep.subr.mxu1 %v3075_v52 }
 0x2d9   : > { %v3092_v19 = vpop.f32.mrf.mxu1  ;;  %7548 = vmatpush3.msra.mxu1 %v3075_v52  ;;  %v7148_v52 = vld [vmem:[%s11981_s5 + $0x138] sm:$0xff] }
 0x2da   : > { %7549 = vmatprep.subr.mxu1 %v3070_v39  ;;  %v7144_v19 = vld [vmem:[%s11981_s5 + $0x118] sm:$0xff] }
 0x2db   : > { %v3095_v30 = vpop.f32.mrf.mxu1  ;;  %7550 = vmatpush3.msra.mxu1 %v3070_v39  ;;  %v7149_v39 = vld [vmem:[%s11981_s5 + $0x140] sm:$0xff] }
 0x2dc   : > { %7552 = vmatmul.mubr.msk.f32.vlgmr.msra.gmra.mxu1 %vm3231_vm6, %v10254_v20 }
 0x2dd   : > { %v3097_v51 = vpop.f32.mrf.mxu1  ;;  %7562 = vmatprep.mubr.msk.f32.mxu1 %vm3231_vm6, %v10220_v22 }
 0x2df   : > { %v3100_v61 = vpop.f32.mrf.mxu1 }
 0x2e1   : > { %v3102_v63 = vpop.f32.mrf.mxu1 }
 0x2e2   : > { %v7141_v63 = vld [vmem:[%s11981_s5 + $0x100] sm:$0xff] }
 0x2e3   : > { %v3105_v0 = vpop.f32.mrf.mxu1 }
 0x2e4   : > { %7554 = vmatprep.subr.mxu1 %v3105_v0 }
 0x2e5   : > { %v3107_v55 = vpop.f32.mrf.mxu1  ;;  %7555 = vmatpush3.msra.mxu1 %v3105_v0 }
 0x2e6   : > { %7556 = vmatprep.subr.mxu1 %v3100_v61  ;;  %v7140_v55 = vld [vmem:[%s11981_s5 + $0xf8] sm:$0xff] }
 0x2e7   : > { %v3110_v34 = vpop.f32.mrf.mxu1  ;;  %7557 = vmatpush3.msra.mxu1 %v3100_v61  ;;  %v7142_v61 = vld [vmem:[%s11981_s5 + $0x108] sm:$0xff] }
 0x2e8   : > { %7558 = vmatprep.subr.mxu1 %v3095_v30 }
 0x2e9   : > { %v3112_v10 = vpop.f32.mrf.mxu1  ;;  %7559 = vmatpush3.msra.mxu1 %v3095_v30  ;;  %v7143_v30 = vld [vmem:[%s11981_s5 + $0x110] sm:$0xff] }
 0x2ea   : > { %7560 = vmatprep.subr.mxu1 %v3090_v43  ;;  %v7138_v10 = vld [vmem:[%s11981_s5 + $0xe8] sm:$0xff] }
 0x2eb   : > { %v3115_v54 = vpop.f32.mrf.mxu1  ;;  %7561 = vmatpush3.msra.mxu1 %v3090_v43 }
 0x2ec   : > { %7563 = vmatmul.mubr.msk.f32.vlgmr.msra.gmra.mxu1 %vm3231_vm6, %v10254_v20 }
 0x2ed   : > { %v3117_v27 = vpop.f32.mrf.mxu1  ;;  %7584 = vmatprep.mubr.msk.f32.mxu1 %vm3231_vm6, %v10220_v22 }
 0x2ee   : > { %v3859_v27 = vld [vmem:[%s11981_s5 + $0xa8] sm:$0xf] }
 0x2ef   : > { %v3120_v41 = vpop.f32.mrf.mxu1 }
 0x2f1   : > { %v3122_v35 = vpop.f32.mrf.mxu1 }
 0x2f2   : > { %v3857_v35 = vld [vmem:[%s11981_s5 + $0x98] sm:$0xff] }
 0x2f3   : > { %v3125_v36 = vpop.f32.mrf.mxu1 }
 0x2f4   : > { %7565 = vmatprep.subr.mxu0 %v3125_v36 }
 0x2f5   : > { %v3127_v6 = vpop.f32.mrf.mxu1  ;;  %7566 = vmatpush3.msra.mxu0 %v3125_v36  ;;  %v7136_v36 = vld [vmem:[%s11981_s5 + $0xd8] sm:$0xff] }
 0x2f6   : > { %7567 = vmatprep.subr.mxu0 %v3120_v41  ;;  %v3856_v6 = vld [vmem:[%s11981_s5 + $0x90] sm:$0xff] }
 0x2f7   : > { %v3130_v29 = vpop.f32.mrf.mxu1  ;;  %7568 = vmatpush3.msra.mxu0 %v3120_v41  ;;  %v3858_v41 = vld [vmem:[%s11981_s5 + $0xa0] sm:$0xf] }
 0x2f8   : > { %7569 = vmatprep.subr.mxu0 %v3115_v54 }
 0x2f9   : > { %v3132_v16 = vpop.f32.mrf.mxu1  ;;  %7570 = vmatpush3.msra.mxu0 %v3115_v54  ;;  %v7137_v54 = vld [vmem:[%s11981_s5 + $0xe0] sm:$0xff] }
 0x2fa   : > { %7571 = vmatprep.subr.mxu0 %v3110_v34  ;;  %v3855_v16 = vld [vmem:[%s11981_s5 + $0x88] sm:$0xff] }
 0x2fb   : > { %v3135_v15 = vpop.f32.mrf.mxu1  ;;  %7572 = vmatpush3.msra.mxu0 %v3110_v34  ;;  %v7139_v34 = vld [vmem:[%s11981_s5 + $0xf0] sm:$0xff] }
 0x2fc   : > { %7574 = vmatmul.mubr.msk.f32.vlgmr.msra.gmra.mxu0 %vm3231_vm6, %v10254_v20 }
 0x2fd   : > { %v3137_v28 = vpop.f32.mrf.mxu1  ;;  %7595 = vmatprep.mubr.msk.f32.mxu0 %vm3231_vm6, %v10220_v22 }
 0x2fe   : > { %v7133_v28 = vld [vmem:[%s11981_s5 + $0xc0] sm:$0xff] }
 0x2ff   : > { %v3140_v14 = vpop.f32.mrf.mxu1 }
 0x301   : > { %v3142_v25 = vpop.f32.mrf.mxu1 }
 0x302   : > { %v7132_v25 = vld [vmem:[%s11981_s5 + $0xb8] sm:$0xff] }
 0x303   : > { %v3145_v26 = vpop.f32.mrf.mxu1 }
 0x304   : > { %7576 = vmatprep.subr.mxu1 %v3145_v26 }
 0x305   : > { %v3147_v48 = vpop.f32.mrf.mxu1  ;;  %7577 = vmatpush3.msra.mxu1 %v3145_v26  ;;  %v3852_v26 = vld [vmem:[%s11981_s5 + $0x70] sm:$0xff] }
 0x306   : > { %7578 = vmatprep.subr.mxu1 %v3140_v14  ;;  %v7131_v48 = vld [vmem:[%s11981_s5 + $0xb0] sm:$0xff] }
 0x307   : > { %v3150_v8 = vpop.f32.mrf.mxu1  ;;  %7579 = vmatpush3.msra.mxu1 %v3140_v14  ;;  %v3853_v14 = vld [vmem:[%s11981_s5 + $0x78] sm:$0xff] }
 0x308   : > { %7580 = vmatprep.subr.mxu1 %v3135_v15 }
 0x309   : > { %v3152_v21 = vpop.f32.mrf.mxu1  ;;  %7581 = vmatpush3.msra.mxu1 %v3135_v15  ;;  %v3854_v15 = vld [vmem:[%s11981_s5 + $0x80] sm:$0xff] }
 0x30a   : > { %7582 = vmatprep.subr.mxu1 %v3130_v29  ;;  %v3850_v21 = vld [vmem:[%s11981_s5 + $0x60] sm:$0xff] }
 0x30b   : > { %v3155_v37 = vpop.f32.mrf.mxu1  ;;  %7583 = vmatpush3.msra.mxu1 %v3130_v29  ;;  %v7135_v29 = vld [vmem:[%s11981_s5 + $0xd0] sm:$0xff] }
 0x30c   : > { %7585 = vmatmul.mubr.msk.f32.vlgmr.msra.gmra.mxu1 %vm3231_vm6, %v10254_v20 }
 0x30d   : > { %v3157_v38 = vpop.f32.mrf.mxu1  ;;  %7606 = vmatprep.mubr.msk.f32.mxu1 %vm3231_vm6, %v10220_v22 }
 0x30e   : > { %v3848_v38 = vld [vmem:[%s11981_s5 + $0x50] sm:$0xff] }
 0x30f   : > { %v3160_v62 = vpop.f32.mrf.mxu1 }
 0x311   : > { %v3162_v13 = vpop.f32.mrf.mxu1 }
 0x312   : > { %v3846_v13 = vld [vmem:[%s11981_s5 + $0x40] sm:$0xff] }
 0x313   : > { %v3165_v32 = vpop.f32.mrf.mxu1 }
 0x314   : > { %7587 = vmatprep.subr.mxu0 %v3165_v32 }
 0x315   : > { %v3167_v46 = vpop.f32.mrf.mxu1  ;;  %7588 = vmatpush3.msra.mxu0 %v3165_v32  ;;  %v3845_v32 = vld [vmem:[%s11981_s5 + $0x38] sm:$0xff] }
 0x316   : > { %7589 = vmatprep.subr.mxu0 %v3160_v62  ;;  %v3844_v46 = vld [vmem:[%s11981_s5 + $0x30] sm:$0xff] }
 0x317   : > { %v3170_v57 = vpop.f32.mrf.mxu1  ;;  %7590 = vmatpush3.msra.mxu0 %v3160_v62  ;;  %v3847_v62 = vld [vmem:[%s11981_s5 + $0x48] sm:$0xff] }
 0x318   : > { %7591 = vmatprep.subr.mxu0 %v3155_v37 }
 0x319   : > { %v3172_v2 = vpop.f32.mrf.mxu1  ;;  %7592 = vmatpush3.msra.mxu0 %v3155_v37  ;;  %v3849_v37 = vld [vmem:[%s11981_s5 + $0x58] sm:$0xff] }
 0x31a   : > { %7593 = vmatprep.subr.mxu0 %v3150_v8  ;;  %v3842_v2 = vld [vmem:[%s11981_s5 + $0x20] sm:$0xff] }
 0x31b   : > { %v3175_v31 = vpop.f32.mrf.mxu1  ;;  %7594 = vmatpush3.msra.mxu0 %v3150_v8  ;;  %v3851_v8 = vld [vmem:[%s11981_s5 + $0x68] sm:$0xff] }
 0x31c   : > { %7596 = vmatmul.mubr.msk.f32.vlgmr.msra.gmra.mxu0 %vm3231_vm6, %v10254_v20 }
 0x31d   : > { %v3177_v23 = vpop.f32.mrf.mxu1  ;;  %7617 = vmatprep.mubr.msk.f32.mxu0 %vm3231_vm6, %v10220_v22 }
 0x31e   : > { %v3840_v23 = vld [vmem:[%s11981_s5 + $0x10] sm:$0xff] }
 0x31f   : > { %v3180_v50 = vpop.f32.mrf.mxu1 }
 0x321   : > { %v3182_v4 = vpop.f32.mrf.mxu1 }
 0x322   : > { %v3838_v4 = vld [vmem:[%s11981_s5] sm:$0xff] }
 0x323   : > { %v3185_v60 = vpop.f32.mrf.mxu1 }
 0x324   : > { %7598 = vmatprep.subr.mxu1 %v3185_v60 }
 0x325   : > { %v3187_v24 = vpop.f32.mrf.mxu1  ;;  %7599 = vmatpush3.msra.mxu1 %v3185_v60  ;;  %v7250_v60 = vld [vmem:[%s11981_s5 + $0x2b8] sm:$0xf] }
 0x326   : > { %7600 = vmatprep.subr.mxu1 %v3180_v50  ;;  %v7210_v24 = vld [vmem:[%s11981_s5 + $0x208] sm:$0xf] }
 0x327   : > { %v3190_v7 = vpop.f32.mrf.mxu1  ;;  %7601 = vmatpush3.msra.mxu1 %v3180_v50  ;;  %v3839_v50 = vld [vmem:[%s11981_s5 + $0x8] sm:$0xff] }
 0x328   : > { %7602 = vmatprep.subr.mxu1 %v3175_v31 }
 0x329   : > { %v3192_v3 = vpop.f32.mrf.mxu1  ;;  %7603 = vmatpush3.msra.mxu1 %v3175_v31  ;;  %v3841_v31 = vld [vmem:[%s11981_s5 + $0x18] sm:$0xff] }
 0x32a   : > { %7604 = vmatprep.subr.mxu1 %v3170_v57 }
 0x32b   : > { %v3195_v1 = vpop.f32.mrf.mxu1  ;;  %7605 = vmatpush3.msra.mxu1 %v3170_v57  ;;  %v3843_v57 = vld [vmem:[%s11981_s5 + $0x28] sm:$0xff] }
 0x32c   : > { %7607 = vmatmul.mubr.msk.f32.vlgmr.msra.gmra.mxu1 %vm3231_vm6, %v10254_v20 }
 0x32d   : > { %v3197_v33 = vpop.f32.mrf.mxu1  ;;  %7628 = vmatprep.mubr.msk.f32.mxu1 %vm3231_vm6, %v10220_v22  ;;  %v7151_v22 = vld [vmem:[%s11981_s5 + $0x150] sm:$0xf] }
 0x32f   : > { %v3200_v44 = vpop.f32.mrf.mxu1 }
 0x331   : > { %v3202_v49 = vpop.f32.mrf.mxu1 }
 0x333   : > { %v3205_v11 = vpop.f32.mrf.mxu1 }
 0x334   : > { %7609 = vmatprep.subr.mxu0 %v3205_v11 }
 0x335   : > { %v3207_v12 = vpop.f32.mrf.mxu1  ;;  %7610 = vmatpush3.msra.mxu0 %v3205_v11  ;;  %v7247_v11 = vld [vmem:[%s11981_s5 + $0x2a0] sm:$0xff] }
 0x336   : > { %7611 = vmatprep.subr.mxu0 %v3200_v44 }
 0x337   : > { %v3210_v59 = vpop.f32.mrf.mxu1  ;;  %7612 = vmatpush3.msra.mxu0 %v3200_v44  ;;  %v7248_v44 = vld [vmem:[%s11981_s5 + $0x2a8] sm:$0xff] }
 0x338   : > { %7613 = vmatprep.subr.mxu0 %v3195_v1 }
 0x339   : > { %v3212_v53 = vpop.f32.mrf.mxu1  ;;  %7614 = vmatpush3.msra.mxu0 %v3195_v1  ;;  %v7249_v1 = vld [vmem:[%s11981_s5 + $0x2b0] sm:$0xf] }
 0x33a   : > { %7615 = vmatprep.subr.mxu0 %v3190_v7  ;;  %v7245_v53 = vld [vmem:[%s11981_s5 + $0x290] sm:$0xff] }
 0x33b   : > { %v3215_v9 = vpop.f32.mrf.mxu1  ;;  %7616 = vmatpush3.msra.mxu0 %v3190_v7 }
 0x33c   : > { %7618 = vmatmul.mubr.msk.f32.vlgmr.msra.gmra.mxu0 %vm3231_vm6, %v10254_v20  ;;  %7153 = vmatprep.subr.msk.mxu0 %vm2295_vm4, %v7152_v42  ;;  %v7209_v42 = vld [vmem:[%s11981_s5 + $0x200] sm:$0xf] }
 0x33d   : > { %v3217_v18 = vpop.f32.mrf.mxu1  ;;  %7154 = vmatpush1.msk.msra.mxu0 %vm2295_vm4, %v7151_v22  ;;  %4034 = vmatprep.mubr.f32.mxu0 %v12210_v5  ;;  %v7244_v22 = vld [vmem:[%s11981_s5 + $0x288] sm:$0xff] }
 0x33e   : > { %3982 = vmatprep.subr.mxu0 %v7150_v56  ;;  %v7243_v56 = vld [vmem:[%s11981_s5 + $0x280] sm:$0xff]  ;;  %v7242_v18 = vld [vmem:[%s11981_s5 + $0x278] sm:$0xff] }
 0x33f   : > { %v3220_v47 = vpop.f32.mrf.mxu1  ;;  %3983 = vmatpush1.msra.mxu0 %v7149_v39  ;;  %v7207_v39 = vld [vmem:[%s11981_s5 + $0x1f0] sm:$0xff] }
 0x340   : > { %3984 = vmatprep.subr.mxu0 %v7148_v52  ;;  %v7206_v52 = vld [vmem:[%s11981_s5 + $0x1e8] sm:$0xff] }
 0x341   : > { %v3222_v43 = vpop.f32.mrf.mxu1  ;;  %3985 = vmatpush1.msra.mxu0 %v7147_v45  ;;  %v7241_v45 = vld [vmem:[%s11981_s5 + $0x270] sm:$0xff] }
 0x342   : > { %3986 = vmatprep.subr.mxu0 %v7146_v58  ;;  %v7240_v58 = vld [vmem:[%s11981_s5 + $0x268] sm:$0xff]  ;;  %v7239_v43 = vld [vmem:[%s11981_s5 + $0x260] sm:$0xff] }
 0x343   : > { %v3225_v51 = vpop.f32.mrf.mxu1  ;;  %3987 = vmatpush1.msra.mxu0 %v7145_v40  ;;  %v7204_v40 = vld [vmem:[%s11981_s5 + $0x1d8] sm:$0xff] }
 0x344   : > { %7620 = vmatprep.subr.mxu1 %v3225_v51  ;;  %3988 = vmatprep.subr.mxu0 %v7144_v19  ;;  %v7203_v19 = vld [vmem:[%s11981_s5 + $0x1d0] sm:$0xff] }
 0x345   : > { %v3227_v0 = vpop.f32.mrf.mxu1  ;;  %7621 = vmatpush3.msra.mxu1 %v3225_v51  ;;  %3989 = vmatpush1.msra.mxu0 %v7143_v30  ;;  %v7238_v30 = vld [vmem:[%s11981_s5 + $0x258] sm:$0xff]  ;;  %v7202_v51 = vld [vmem:[%s11981_s5 + $0x1c8] sm:$0xff] }
 0x346   : > { %7622 = vmatprep.subr.mxu1 %v3220_v47  ;;  %3990 = vmatprep.subr.mxu0 %v7142_v61  ;;  %v7237_v61 = vld [vmem:[%s11981_s5 + $0x250] sm:$0xff]  ;;  %v7236_v0 = vld [vmem:[%s11981_s5 + $0x248] sm:$0xff] }
 0x347   : > { %7623 = vmatpush3.msra.mxu1 %v3220_v47  ;;  %3991 = vmatpush1.msra.mxu0 %v7141_v63  ;;  %v7205_v47 = vld [vmem:[%s11981_s5 + $0x1e0] sm:$0xff] }
 0x348   : > { %7624 = vmatprep.subr.mxu1 %v3215_v9  ;;  %3992 = vmatprep.subr.mxu0 %v7140_v55  ;;  %v7201_v63 = vld [vmem:[%s11981_s5 + $0x1c0] sm:$0xff]  ;;  %v7200_v55 = vld [vmem:[%s11981_s5 + $0x1b8] sm:$0xff] }
 0x349   : > { %7625 = vmatpush3.msra.mxu1 %v3215_v9  ;;  %3993 = vmatpush1.msra.mxu0 %v7139_v34  ;;  %v7208_v9 = vld [vmem:[%s11981_s5 + $0x1f8] sm:$0xff] }
 0x34a   : > { %7626 = vmatprep.subr.mxu1 %v3210_v59  ;;  %3994 = vmatprep.subr.mxu0 %v7138_v10  ;;  %v7199_v10 = vld [vmem:[%s11981_s5 + $0x1b0] sm:$0xff] }
 0x34b   : > { %7627 = vmatpush3.msra.mxu1 %v3210_v59  ;;  %3995 = vmatpush1.msra.mxu0 %v7137_v54  ;;  %v7246_v59 = vld [vmem:[%s11981_s5 + $0x298] sm:$0xff]  ;;  %v7235_v54 = vld [vmem:[%s11981_s5 + $0x240] sm:$0xff] }
 0x34c   : > { %7629 = vmatmul.mubr.msk.f32.vlgmr.msra.gmra.mxu1 %vm3231_vm6, %v10254_v20  ;;  %7171 = vmatprep.subr.msk.mxu1 %vm2295_vm4, %v3859_v27  ;;  %v7134_v20 = vld [vmem:[%s11981_s5 + $0xc8] sm:$0xff] }
 0x34d   : > { %7172 = vmatpush1.msk.msra.mxu1 %vm2295_vm4, %v3858_v41  ;;  %4233 = vmatprep.mubr.f32.mxu1 %v12210_v5  ;;  %v7234_v41 = vld [vmem:[%s11981_s5 + $0x238] sm:$0xff] }
 0x34e   : > { %4181 = vmatprep.subr.mxu1 %v3857_v35  ;;  %3996 = vmatprep.subr.mxu0 %v7136_v36  ;;  %v7198_v35 = vld [vmem:[%s11981_s5 + $0x1a8] sm:$0xff] }
 0x34f   : > { %4182 = vmatpush1.msra.mxu1 %v3856_v6  ;;  %3997 = vmatpush1.msra.mxu0 %v7135_v29  ;;  %v7233_v29 = vld [vmem:[%s11981_s5 + $0x230] sm:$0xff] }
 0x350   : > { %4183 = vmatprep.subr.mxu1 %v3855_v16  ;;  %3998 = vmatprep.subr.mxu0 %v7134_v20  ;;  %v7232_v20 = vld [vmem:[%s11981_s5 + $0x228] sm:$0xff] }
 0x351   : > { %4184 = vmatpush1.msra.mxu1 %v3854_v15  ;;  %3999 = vmatpush1.msra.mxu0 %v7133_v28  ;;  %v7231_v15 = vld [vmem:[%s11981_s5 + $0x220] sm:$0xff] }
 0x352   : > { %4185 = vmatprep.subr.mxu1 %v3853_v14  ;;  %4000 = vmatprep.subr.mxu0 %v7132_v25  ;;  %v7197_v28 = vld [vmem:[%s11981_s5 + $0x1a0] sm:$0xff]  ;;  %v7230_v25 = vld [vmem:[%s11981_s5 + $0x218] sm:$0xff] }
 0x353   : > { %4186 = vmatpush1.msra.mxu1 %v3852_v26  ;;  %4001 = vmatpush1.msra.mxu0 %v7131_v48  ;;  %v7196_v26 = vld [vmem:[%s11981_s5 + $0x198] sm:$0xff]  ;;  %v7229_v48 = vld [vmem:[%s11981_s5 + $0x210] sm:$0xff] }
 0x354   : > { %4187 = vmatprep.subr.mxu1 %v3851_v8  ;;  %7211 = vmatprep.subr.msk.mxu0 %vm2295_vm4, %v7210_v24  ;;  %v7195_v8 = vld [vmem:[%s11981_s5 + $0x190] sm:$0xff] }
 0x355   : > { %4188 = vmatpush1.msra.mxu1 %v3850_v21  ;;  %v7194_v21 = vld [vmem:[%s11981_s5 + $0x188] sm:$0xff] }
 0x356   : > { %4189 = vmatprep.subr.mxu1 %v3849_v37  ;;  %v7193_v37 = vld [vmem:[%s11981_s5 + $0x180] sm:$0xff] }
 0x357   : > { %4190 = vmatpush1.msra.mxu1 %v3848_v38  ;;  %v7192_v38 = vld [vmem:[%s11981_s5 + $0x178] sm:$0xff] }
 0x358   : > { %4191 = vmatprep.subr.mxu1 %v3847_v62  ;;  %v7191_v62 = vld [vmem:[%s11981_s5 + $0x170] sm:$0xff] }
 0x359   : > { %4192 = vmatpush1.msra.mxu1 %v3846_v13  ;;  %v7190_v13 = vld [vmem:[%s11981_s5 + $0x168] sm:$0xff] }
 0x35a   : > { %4193 = vmatprep.subr.mxu1 %v3845_v32  ;;  %v7189_v32 = vld [vmem:[%s11981_s5 + $0x160] sm:$0xff] }
 0x35b   : > { %4194 = vmatpush1.msra.mxu1 %v3844_v46 }
 0x35c   : > { %4195 = vmatprep.subr.mxu1 %v3843_v57 }
 0x35d   : > { %4196 = vmatpush1.msra.mxu1 %v3842_v2 }
 0x35e   : > { %4197 = vmatprep.subr.mxu1 %v3841_v31 }
 0x35f   : > { %4198 = vmatpush1.msra.mxu1 %v3840_v23 }
 0x360   : > { %4199 = vmatprep.subr.mxu1 %v3839_v50 }
 0x361   : > { %4200 = vmatpush1.msra.mxu1 %v3838_v4  ;;  %v7290_v4 = vld [vmem:[%s11981_s5 + $0x368] sm:$0xf] }
 0x362   : > { %7251 = vmatprep.subr.msk.mxu1 %vm2295_vm4, %v7250_v60 }
 0x39c   : > { %v10430_v7 = vpop.f32.mrf.mxu1 }
 0x39d   : > { %v3900_v3 = vrot.slane %v10430_v7, 1 }
 0x39e   : > { %v10436_v33 = vpop.f32.mrf.mxu1 }
 0x39f   : > { %v3899_v49 = vrot.slane %v10436_v33, 1  ;;  %7173 = vmatmul.mubr.msk.f32.vlgmr.msra.gmra.mxu1 %vm3931_vm7, %v10436_v33 }
 0x3a0   : > { %4239 = vmatprep.mubr.f32.mxu1 %v12210_v5  ;;  %7252 = vmatpush1.msk.msra.mxu1 %vm2295_vm4, %v7249_v1 }
 0x3a1   : > { %v3901_v12 = vsel %vm609_vm0, %v3899_v49, %v3900_v3  ;;  %4721 = vmatprep.subr.mxu1 %v7248_v44 }
 0x3a2   : > { %7155 = vmatmul.mubr.msk.f32.vlgmr.msra.gmra.mxu0 %vm3931_vm7, %v3901_v12  ;;  %4722 = vmatpush1.msra.mxu1 %v7247_v11 }
 0x3a3   : > { %7174 = vmatmul.mubr.msk.f32.gmra.mxu1 %vm3931_vm7, %v10430_v7  ;;  %4040 = vmatprep.mubr.f32.mxu0 %v12210_v5 }
 0x3a4   : > { %4245 = vmatprep.mubr.f32.mxu1 %v12210_v5  ;;  %4723 = vmatprep.subr.mxu1 %v7246_v59 }
 0x3a5   : > { %4724 = vmatpush1.msra.mxu1 %v7245_v53  ;;  %7212 = vmatpush1.msk.msra.mxu0 %vm2295_vm4, %v7209_v42 }
 0x3a6   : > { %4725 = vmatprep.subr.mxu1 %v7244_v22  ;;  %4435 = vmatprep.subr.mxu0 %v7208_v9 }
 0x3a7   : > { %4726 = vmatpush1.msra.mxu1 %v7243_v56  ;;  %4436 = vmatpush1.msra.mxu0 %v7207_v39 }
 0x3a8   : > { %4727 = vmatprep.subr.mxu1 %v7242_v18  ;;  %4437 = vmatprep.subr.mxu0 %v7206_v52 }
 0x3a9   : > { %4728 = vmatpush1.msra.mxu1 %v7241_v45  ;;  %4438 = vmatpush1.msra.mxu0 %v7205_v47 }
 0x3aa   : > { %4729 = vmatprep.subr.mxu1 %v7240_v58  ;;  %4439 = vmatprep.subr.mxu0 %v7204_v40 }
 0x3ab   : > { %4730 = vmatpush1.msra.mxu1 %v7239_v43  ;;  %4440 = vmatpush1.msra.mxu0 %v7203_v19 }
 0x3ac   : > { %v10521_v34 = vpop.f32.mrf.mxu1  ;;  %4731 = vmatprep.subr.mxu1 %v7238_v30  ;;  %4441 = vmatprep.subr.mxu0 %v7202_v51 }
 0x3ad   : > { %4732 = vmatpush1.msra.mxu1 %v7237_v61  ;;  %4442 = vmatpush1.msra.mxu0 %v7201_v63  ;;  %v3904_v36 = vrot.slane %v10521_v34, 1 }
 0x3ae   : > { %v10529_v27 = vpop.f32.mrf.mxu1  ;;  %4733 = vmatprep.subr.mxu1 %v7236_v0  ;;  %4443 = vmatprep.subr.mxu0 %v7200_v55  ;;  %v4640_v55 = vrot.slane %v10430_v7, 3 }
 0x3af   : > { %7175 = vmatmul.mubr.msk.f32.gmra.mxu1 %vm3931_vm7, %v10529_v27  ;;  %v3902_v6 = vrot.slane %v10529_v27, 1  ;;  %4444 = vmatpush1.msra.mxu0 %v7199_v10  ;;  %v4639_v10 = vrot.slane %v10436_v33, 3 }
 0x3b0   : > { %4251 = vmatprep.mubr.f32.mxu1 %v12210_v5  ;;  %4734 = vmatpush1.msra.mxu1 %v7235_v54 }
 0x3b1   : > { %v3903_v16 = vsel %vm609_vm0, %v3900_v3, %v3902_v6  ;;  %4735 = vmatprep.subr.mxu1 %v7234_v41  ;;  %4445 = vmatprep.subr.mxu0 %v7198_v35  ;;  %v3905_v14 = vsel %vm609_vm0, %v3902_v6, %v3904_v36  ;;  %v4641_v35 = vsel %vm1819_vm3, %v4639_v10, %v4640_v55  ;;  %v4354_v6 = vrot.slane %v10430_v7, 2  ;;  %v7278_v10 = vld [vmem:[%s11981_s5 + $0x308] sm:$0xff] }
 0x3b2   : > { %7156 = vmatmul.mubr.msk.f32.gmra.mxu0 %vm3931_vm7, %v3903_v16  ;;  %4736 = vmatpush1.msra.mxu1 %v7233_v29  ;;  %v4353_v29 = vrot.slane %v10436_v33, 2  ;;  %v12211_v16 = vld [vmem:[#allocation11_spill] sm:$0xff] }
 0x3b3   : > { %7176 = vmatmul.mubr.msk.f32.gmra.mxu1 %vm3931_vm7, %v10521_v34  ;;  %4046 = vmatprep.mubr.f32.mxu0 %v12210_v5 }
 0x3b4   : > { %4257 = vmatprep.mubr.f32.mxu1 %v12210_v5  ;;  %4737 = vmatprep.subr.mxu1 %v7232_v20 }
 0x3b5   : > { %4738 = vmatpush1.msra.mxu1 %v7231_v15  ;;  %4446 = vmatpush1.msra.mxu0 %v7197_v28  ;;  %v4644_v15 = vrot.slane %v10521_v34, 3 }
 0x3b6   : > { %7157 = vmatmul.mubr.msk.f32.gmra.mxu0 %vm3931_vm7, %v3905_v14  ;;  %4739 = vmatprep.subr.mxu1 %v7230_v25  ;;  %v4355_v14 = vsel %vm1343_vm2, %v4353_v29, %v4354_v6  ;;  %v4356_v25 = vrot.slane %v10529_v27, 2  ;;  %v7276_v29 = vld [vmem:[%s11981_s5 + $0x2f8] sm:$0xff] }
 0x3b7   : > { %4052 = vmatprep.mubr.f32.mxu0 %v12210_v5  ;;  %4447 = vmatprep.subr.mxu0 %v7196_v26  ;;  %v7289_v26 = vld [vmem:[%s11981_s5 + $0x360] sm:$0xf] }
 0x3b8   : > { %4740 = vmatpush1.msra.mxu1 %v7229_v48  ;;  %4448 = vmatpush1.msra.mxu0 %v7195_v8 }
 0x3b9   : > { %4449 = vmatprep.subr.mxu0 %v7194_v21  ;;  %5332 = vmatprep.subr.mxu1 %v12210_v5  ;;  %v7288_v21 = vld [vmem:[%s11981_s5 + $0x358] sm:$0xff] }
 0x3ba   : > { %4450 = vmatpush1.msra.mxu0 %v7193_v37  ;;  %v4358_v37 = vrot.slane %v10521_v34, 2 }
 0x3bb   : > { %4451 = vmatprep.subr.mxu0 %v7192_v38  ;;  %v4357_v38 = vsel %vm1343_vm2, %v4354_v6, %v4356_v25 }
 0x3bc   : > { %v10596_v46 = vpop.f32.mrf.mxu0  ;;  %4452 = vmatpush1.msra.mxu0 %v7191_v62  ;;  %v7287_v62 = vld [vmem:[%s11981_s5 + $0x350] sm:$0xff] }
 0x3bd   : > { %4453 = vmatprep.subr.mxu0 %v7190_v13  ;;  %v3908_v2 = vrot.slane %v10596_v46, 1  ;;  %v4648_v13 = vrot.slane %v10596_v46, 3 }
 0x3be   : > { %v10598_v57 = vpop.f32.mrf.mxu0  ;;  %4454 = vmatpush1.msra.mxu0 %v7189_v32 }
 0x3bf   : > { %7177 = vmatmul.mubr.msk.f32.gmra.mxu1 %vm3931_vm7, %v10598_v57  ;;  %v3906_v31 = vrot.slane %v10598_v57, 1  ;;  %7291 = vmatprep.subr.msk.mxu0 %vm2295_vm4, %v7290_v4  ;;  %v4646_v8 = vrot.slane %v10598_v57, 3 }
 0x3c0   : > { %4263 = vmatprep.mubr.f32.mxu1 %v12210_v5 }
 0x3c1   : > { %v3907_v23 = vsel %vm609_vm0, %v3904_v36, %v3906_v31  ;;  %v3909_v50 = vsel %vm609_vm0, %v3906_v31, %v3908_v2  ;;  %v4642_v36 = vrot.slane %v10529_v27, 3  ;;  %v4647_v32 = vsel %vm1819_vm3, %v4644_v15, %v4646_v8 }
 0x3c2   : > { %7158 = vmatmul.mubr.msk.f32.gmra.mxu0 %vm3931_vm7, %v3907_v23  ;;  %v4359_v31 = vsel %vm1343_vm2, %v4356_v25, %v4358_v37  ;;  %v4360_v23 = vrot.slane %v10598_v57, 2  ;;  %v4649_v4 = vsel %vm1819_vm3, %v4646_v8, %v4648_v13  ;;  %v7274_v25 = vld [vmem:[%s11981_s5 + $0x2e8] sm:$0xff]  ;;  %v7273_v8 = vld [vmem:[%s11981_s5 + $0x2e0] sm:$0xff] }
 0x3c3   : > { %7178 = vmatmul.mubr.msk.f32.gmra.mxu1 %vm3931_vm7, %v10596_v46  ;;  %4058 = vmatprep.mubr.f32.mxu0 %v12210_v5  ;;  %v4643_v28 = vsel %vm1819_vm3, %v4640_v55, %v4642_v36  ;;  %v4645_v48 = vsel %vm1819_vm3, %v4642_v36, %v4644_v15  ;;  %v7275_v15 = vld [vmem:[%s11981_s5 + $0x2f0] sm:$0xff] }
 0x3c4   : > { %4269 = vmatprep.mubr.f32.mxu1 %v12210_v5 }
 0x3c6   : > { %7159 = vmatmul.mubr.msk.f32.gmra.mxu0 %vm3931_vm7, %v3909_v50  ;;  %v7285_v50 = vld [vmem:[%s11981_s5 + $0x340] sm:$0xff] }
 0x3c7   : > { %4064 = vmatprep.mubr.f32.mxu0 %v12210_v5 }
 0x3cc   : > { %v10618_v60 = vpop.f32.mrf.mxu1 }
 0x3cd   : > { %v3912_v3 = vrot.slane %v10618_v60, 1 }
 0x3ce   : > { %v10620_v24 = vpop.f32.mrf.mxu1 }
 0x3cf   : > { %7179 = vmatmul.mubr.msk.f32.gmra.mxu1 %vm3931_vm7, %v10620_v24  ;;  %v3910_v1 = vrot.slane %v10620_v24, 1 }
 0x3d0   : > { %4275 = vmatprep.mubr.f32.mxu1 %v12210_v5 }
 0x3d1   : > { %v3911_v44 = vsel %vm609_vm0, %v3908_v2, %v3910_v1  ;;  %v3913_v49 = vsel %vm609_vm0, %v3910_v1, %v3912_v3  ;;  %v7286_v2 = vld [vmem:[%s11981_s5 + $0x348] sm:$0xff]  ;;  %v7284_v1 = vld [vmem:[%s11981_s5 + $0x338] sm:$0xff] }
 0x3d2   : > { %7160 = vmatmul.mubr.msk.f32.gmra.mxu0 %vm3931_vm7, %v3911_v44  ;;  %v4362_v44 = vrot.slane %v10596_v46, 2 }
 0x3d3   : > { %7180 = vmatmul.mubr.msk.f32.gmra.mxu1 %vm3931_vm7, %v10618_v60  ;;  %4070 = vmatprep.mubr.f32.mxu0 %v12210_v5 }
 0x3d4   : > { %4281 = vmatprep.mubr.f32.mxu1 %v12210_v5 }
 0x3d6   : > { %7161 = vmatmul.mubr.msk.f32.gmra.mxu0 %vm3931_vm7, %v3913_v49  ;;  %v4361_v49 = vsel %vm1343_vm2, %v4358_v37, %v4360_v23 }
 0x3d7   : > { %4076 = vmatprep.mubr.f32.mxu0 %v12210_v5 }
 0x3dc   : > { %v10636_v11 = vpop.f32.mrf.mxu0 }
 0x3dd   : > { %v3916_v59 = vrot.slane %v10636_v11, 1 }
 0x3de   : > { %v10638_v12 = vpop.f32.mrf.mxu0 }
 0x3df   : > { %7181 = vmatmul.mubr.msk.f32.gmra.mxu1 %vm3931_vm7, %v10638_v12  ;;  %v3914_v53 = vrot.slane %v10638_v12, 1 }
 0x3e0   : > { %4287 = vmatprep.mubr.f32.mxu1 %v12210_v5 }
 0x3e1   : > { %v3915_v42 = vsel %vm609_vm0, %v3912_v3, %v3914_v53  ;;  %v3917_v22 = vsel %vm609_vm0, %v3914_v53, %v3916_v59  ;;  %v4650_v3 = vrot.slane %v10620_v24, 3  ;;  %v4652_v53 = vrot.slane %v10618_v60, 3 }
 0x3e2   : > { %7162 = vmatmul.mubr.msk.f32.gmra.mxu0 %vm3931_vm7, %v3915_v42 }
 0x3e3   : > { %7182 = vmatmul.mubr.msk.f32.gmra.mxu1 %vm3931_vm7, %v10636_v11  ;;  %4082 = vmatprep.mubr.f32.mxu0 %v12210_v5  ;;  %v4651_v42 = vsel %vm1819_vm3, %v4648_v13, %v4650_v3 }
 0x3e4   : > { %4293 = vmatprep.mubr.f32.mxu1 %v12210_v5 }
 0x3e6   : > { %7163 = vmatmul.mubr.msk.f32.gmra.mxu0 %vm3931_vm7, %v3917_v22  ;;  %v7282_v22 = vld [vmem:[%s11981_s5 + $0x328] sm:$0xff] }
 0x3e7   : > { %4088 = vmatprep.mubr.f32.mxu0 %v12210_v5 }
 0x3ec   : > { %v10654_v9 = vpop.f32.mrf.mxu1 }
 0x3ed   : > { %v3920_v39 = vrot.slane %v10654_v9, 1 }
 0x3ee   : > { %v10656_v56 = vpop.f32.mrf.mxu1 }
 0x3ef   : > { %7183 = vmatmul.mubr.msk.f32.gmra.mxu1 %vm3931_vm7, %v10656_v56  ;;  %v3918_v18 = vrot.slane %v10656_v56, 1  ;;  %v4658_v6 = vrot.slane %v10656_v56, 3 }
 0x3f0   : > { %4299 = vmatprep.mubr.f32.mxu1 %v12210_v5 }
 0x3f1   : > { %v3919_v52 = vsel %vm609_vm0, %v3916_v59, %v3918_v18  ;;  %v3921_v45 = vsel %vm609_vm0, %v3918_v18, %v3920_v39  ;;  %v7283_v59 = vld [vmem:[%s11981_s5 + $0x330] sm:$0xff]  ;;  %v4364_v18 = vrot.slane %v10620_v24, 2 }
 0x3f2   : > { %7164 = vmatmul.mubr.msk.f32.gmra.mxu0 %vm3931_vm7, %v3919_v52  ;;  %v7281_v52 = vld [vmem:[%s11981_s5 + $0x320] sm:$0xff] }
 0x3f3   : > { %7184 = vmatmul.mubr.msk.f32.gmra.mxu1 %vm3931_vm7, %v10654_v9  ;;  %4094 = vmatprep.mubr.f32.mxu0 %v12210_v5 }
 0x3f4   : > { %4305 = vmatprep.mubr.f32.mxu1 %v12210_v5 }
 0x3f6   : > { %7165 = vmatmul.mubr.msk.f32.gmra.mxu0 %vm3931_vm7, %v3921_v45  ;;  %v4653_v45 = vsel %vm1819_vm3, %v4650_v3, %v4652_v53  ;;  %v7269_v3 = vld [vmem:[%s11981_s5 + $0x2c0] sm:$0xff] }
 0x3f7   : > { %4100 = vmatprep.mubr.f32.mxu0 %v12210_v5 }
 0x3fc   : > { %v10672_v47 = vpop.f32.mrf.mxu0 }
 0x3fd   : > { %v3924_v40 = vrot.slane %v10672_v47, 1 }
 0x3fe   : > { %v10674_v58 = vpop.f32.mrf.mxu0 }
 0x3ff   : > { %7185 = vmatmul.mubr.msk.f32.gmra.mxu1 %vm3931_vm7, %v10674_v58  ;;  %v3922_v43 = vrot.slane %v10674_v58, 1  ;;  %v4662_v37 = vrot.slane %v10674_v58, 3 }
 0x400   : > { %4311 = vmatprep.mubr.f32.mxu1 %v12210_v5 }
 0x401   : > { %v3923_v19 = vsel %vm609_vm0, %v3920_v39, %v3922_v43  ;;  %v3925_v30 = vsel %vm609_vm0, %v3922_v43, %v3924_v40  ;;  %v4363_v39 = vsel %vm1343_vm2, %v4360_v23, %v4362_v44  ;;  %v7280_v43 = vld [vmem:[%s11981_s5 + $0x318] sm:$0xff]  ;;  %v7270_v23 = vld [vmem:[%s11981_s5 + $0x2c8] sm:$0xff] }
 0x402   : > { %7166 = vmatmul.mubr.msk.f32.gmra.mxu0 %vm3931_vm7, %v3923_v19  ;;  %v4366_v19 = vrot.slane %v10618_v60, 2 }
 0x403   : > { %7186 = vmatmul.mubr.msk.f32.gmra.mxu1 %vm3931_vm7, %v10672_v47  ;;  %4106 = vmatprep.mubr.f32.mxu0 %v12210_v5 }
 0x404   : > { %4317 = vmatprep.mubr.f32.mxu1 %v12210_v5 }
 0x406   : > { %7167 = vmatmul.mubr.msk.f32.gmra.mxu0 %vm3931_vm7, %v3925_v30  ;;  %v4365_v30 = vsel %vm1343_vm2, %v4362_v44, %v4364_v18 }
 0x407   : > { %4112 = vmatprep.mubr.f32.mxu0 %v12210_v5 }
 0x40c   : > { %v10690_v51 = vpop.f32.mrf.mxu1 }
 0x40d   : > { %v3928_v54 = vrot.slane %v10690_v51, 1 }
 0x40e   : > { %v10692_v61 = vpop.f32.mrf.mxu1 }
 0x40f   : > { %v3926_v63 = vrot.slane %v10692_v61, 1  ;;  %7187 = vmatmul.mubr.msk.f32.gmra.mxu1 %vm3931_vm7, %v10692_v61  ;;  %v3930_v20 = vsel %vm609_vm0, %v3928_v54, %v12211_v16  ;;  %v4370_v16 = vrot.slane %v10636_v11, 2 }
 0x410   : > { %4323 = vmatprep.mubr.f32.mxu1 %v12210_v5 }
 0x411   : > { %v3927_v0 = vsel %vm609_vm0, %v3924_v40, %v3926_v63  ;;  %v3929_v41 = vsel %vm609_vm0, %v3926_v63, %v3928_v54  ;;  %v4654_v40 = vrot.slane %v10638_v12, 3  ;;  %v7279_v63 = vld [vmem:[%s11981_s5 + $0x310] sm:$0xff]  ;;  %v4367_v54 = vsel %vm1343_vm2, %v4364_v18, %v4366_v19 }
 0x412   : > { %7168 = vmatmul.mubr.msk.f32.gmra.mxu0 %vm3931_vm7, %v3927_v0  ;;  %v4656_v0 = vrot.slane %v10636_v11, 3  ;;  %vm6090_vm0 = vcmask 1047559  }
 0x413   : > { %7188 = vmatmul.mubr.msk.f32.gmra.mxu1 %vm3931_vm7, %v10690_v51  ;;  %4118 = vmatprep.mubr.f32.mxu0 %v12210_v5  ;;  %v4655_v55 = vsel %vm1819_vm3, %v4652_v53, %v4654_v40 }
 0x414   : > { %4773 = vmatprep.mubr.f32.mxu1 %v12210_v5  ;;  %v4657_v36 = vsel %vm1819_vm3, %v4654_v40, %v4656_v0 }
 0x416   : > { %7169 = vmatmul.mubr.msk.f32.gmra.mxu0 %vm3931_vm7, %v3929_v41  ;;  %v4368_v41 = vrot.slane %v10638_v12, 2 }
 0x417   : > { %7253 = vmatmul.mubr.msk.f32.vlgmr.msra.gmra.mxu1 %vm3931_vm7, %v4641_v35  ;;  %4124 = vmatprep.mubr.f32.mxu0 %v12210_v5  ;;  %v7277_v35 = vld [vmem:[%s11981_s5 + $0x300] sm:$0xff] }
 0x418   : > { %4779 = vmatprep.mubr.f32.mxu1 %v12210_v5 }
 0x41a   : > { %7170 = vmatmul.mubr.msk.f32.gmra.mxu0 %vm3931_vm7, %v3930_v20  ;;  %v4369_v20 = vsel %vm1343_vm2, %v4366_v19, %v4368_v41 }
 0x41b   : > { %7254 = vmatmul.mubr.msk.f32.gmra.mxu1 %vm3931_vm7, %v4643_v28  ;;  %4487 = vmatprep.mubr.f32.mxu0 %v12210_v5  ;;  %v4660_v28 = vrot.slane %v10654_v9, 3 }
 0x41c   : > { %4785 = vmatprep.mubr.f32.mxu1 %v12210_v5 }
 0x41e   : > { %7213 = vmatmul.mubr.msk.f32.vlgmr.msra.gmra.mxu0 %vm3931_vm7, %v4355_v14  ;;  %v4659_v14 = vsel %vm1819_vm3, %v4656_v0, %v4658_v6  ;;  %v12213_v0 = vld [vmem:[#allocation20_spill] sm:$0xff] }
 0x41f   : > { %7255 = vmatmul.mubr.msk.f32.gmra.mxu1 %vm3931_vm7, %v4645_v48  ;;  %4493 = vmatprep.mubr.f32.mxu0 %v12210_v5  ;;  %v4372_v48 = vrot.slane %v10656_v56, 2 }
 0x420   : > { %4791 = vmatprep.mubr.f32.mxu1 %v12210_v5  ;;  %7292 = vmatpush1.msk.msra.mxu0 %vm2295_vm4, %v7289_v26  ;;  %v4371_v26 = vsel %vm1343_vm2, %v4368_v41, %v4370_v16  ;;  %v4930_v41 = vrot.slane %v10521_v34, 4  ;;  %v4934_v34 = vrot.slane %v10596_v46, 4  ;;  %v4938_v46 = vrot.slane %v10618_v60, 4 }
 0x421   : > { %5007 = vmatprep.subr.mxu0 %v7288_v21  ;;  %v4661_v21 = vsel %vm1819_vm3, %v4658_v6, %v4660_v28  ;;  %v4373_v13 = vsel %vm1343_vm2, %v4370_v16, %v4372_v48 }
 0x422   : > { %7214 = vmatmul.mubr.msk.f32.gmra.mxu0 %vm3931_vm7, %v4357_v38  ;;  %v7272_v38 = vld [vmem:[%s11981_s5 + $0x2d8] sm:$0xff] }
 0x423   : > { %7256 = vmatmul.mubr.msk.f32.gmra.mxu1 %vm3931_vm7, %v4647_v32  ;;  %4499 = vmatprep.mubr.f32.mxu0 %v12210_v5  ;;  %v7271_v32 = vld [vmem:[%s11981_s5 + $0x2d0] sm:$0xff] }
 0x424   : > { %4797 = vmatprep.mubr.f32.mxu1 %v12210_v5  ;;  %5008 = vmatpush1.msra.mxu0 %v7287_v62  ;;  %v4374_v62 = vrot.slane %v10654_v9, 2 }
 0x425   : > { %5009 = vmatprep.subr.mxu0 %v7286_v2  ;;  %v4664_v2 = vrot.slane %v10672_v47, 3 }
 0x426   : > { %7215 = vmatmul.mubr.msk.f32.gmra.mxu0 %vm3931_vm7, %v4359_v31  ;;  %v4663_v31 = vsel %vm1819_vm3, %v4660_v28, %v4662_v37 }
 0x427   : > { %7257 = vmatmul.mubr.msk.f32.gmra.mxu1 %vm3931_vm7, %v4649_v4  ;;  %4505 = vmatprep.mubr.f32.mxu0 %v12210_v5  ;;  %v4376_v4 = vrot.slane %v10674_v58, 2  ;;  %v4665_v44 = vsel %vm1819_vm3, %v4662_v37, %v4664_v2 }
 0x428   : > { %4803 = vmatprep.mubr.f32.mxu1 %v12210_v5  ;;  %5010 = vmatpush1.msra.mxu0 %v7285_v50  ;;  %v4375_v50 = vsel %vm1343_vm2, %v4372_v48, %v4374_v62 }
 0x429   : > { %5011 = vmatprep.subr.mxu0 %v7284_v1  ;;  %v4666_v1 = vrot.slane %v10692_v61, 3 }
 0x42a   : > { %7216 = vmatmul.mubr.msk.f32.gmra.mxu0 %vm3931_vm7, %v4361_v49  ;;  %v4378_v49 = vrot.slane %v10672_v47, 2 }
 0x42b   : > { %7258 = vmatmul.mubr.msk.f32.gmra.mxu1 %vm3931_vm7, %v4651_v42  ;;  %4511 = vmatprep.mubr.f32.mxu0 %v12210_v5  ;;  %v4667_v53 = vsel %vm1819_vm3, %v4664_v2, %v4666_v1  ;;  %v4668_v42 = vrot.slane %v10690_v51, 3 }
 0x42c   : > { %4809 = vmatprep.mubr.f32.mxu1 %v12210_v5  ;;  %5012 = vmatpush1.msra.mxu0 %v7283_v59  ;;  %v4377_v59 = vsel %vm1343_vm2, %v4374_v62, %v4376_v4  ;;  %v4944_v62 = vrot.slane %v10656_v56, 4 }
 0x42d   : > { %5013 = vmatprep.subr.mxu0 %v7282_v22  ;;  %v4380_v22 = vrot.slane %v10692_v61, 2  ;;  %v4669_v18 = vsel %vm1819_vm3, %v4666_v1, %v4668_v42 }
 0x42e   : > { %7217 = vmatmul.mubr.msk.f32.gmra.mxu0 %vm3931_vm7, %v4363_v39  ;;  %v4379_v39 = vsel %vm1343_vm2, %v4376_v4, %v4378_v49 }
 0x42f   : > { %7259 = vmatmul.mubr.msk.f32.gmra.mxu1 %vm3931_vm7, %v4653_v45  ;;  %4517 = vmatprep.mubr.f32.mxu0 %v12210_v5  ;;  %v12212_v45 = vld [vmem:[#allocation21_spill] sm:$0xff] }
 0x430   : > { %4815 = vmatprep.mubr.f32.mxu1 %v12210_v5  ;;  %5014 = vmatpush1.msra.mxu0 %v7281_v52  ;;  %v4381_v52 = vsel %vm1343_vm2, %v4378_v49, %v4380_v22  ;;  %v4670_v40 = vsel %vm1819_vm3, %v4668_v42, %v12212_v45  ;;  %v5278_v42 = vld [vmem:[%s11983_s7 + $0x70] sm:$0xff]  ;;  %v5276_v45 = vld [vmem:[%s11983_s7 + $0x60] sm:$0xff]  ;;  %vm6745_vm3 = vcmask 80896  }
 0x431   : > { %5015 = vmatprep.subr.mxu0 %v7280_v43  ;;  %v4382_v43 = vrot.slane %v10690_v51, 2 }
 0x432   : > { %7218 = vmatmul.mubr.msk.f32.gmra.mxu0 %vm3931_vm7, %v4365_v30  ;;  %v4926_v30 = vrot.slane %v10430_v7, 4 }
 0x433   : > { %7260 = vmatmul.mubr.msk.f32.gmra.mxu1 %vm3931_vm7, %v4655_v55  ;;  %4523 = vmatprep.mubr.f32.mxu0 %v12210_v5  ;;  %v4383_v19 = vsel %vm1343_vm2, %v4380_v22, %v4382_v43  ;;  %v4384_v55 = vsel %vm1343_vm2, %v4382_v43, %v12213_v0  ;;  %v12214_v0 = vld [vmem:[#allocation70_spill] sm:$0xff]  ;;  %vm6576_vm2 = vcmask 982016  }
 0x434   : > { %4821 = vmatprep.mubr.f32.mxu1 %v12210_v5  ;;  %5016 = vmatpush1.msra.mxu0 %v7279_v63  ;;  %v4925_v63 = vrot.slane %v10436_v33, 4 }
 0x435   : > { %5017 = vmatprep.subr.mxu0 %v7278_v10 }
 0x436   : > { %7219 = vmatmul.mubr.msk.f32.gmra.mxu0 %vm3931_vm7, %v4367_v54  ;;  %v4927_v10 = vsel %vm2295_vm4, %v4925_v63, %v4926_v30  ;;  %v4928_v54 = vrot.slane %v10529_v27, 4 }
 0x437   : > { %7261 = vmatmul.mubr.msk.f32.gmra.mxu1 %vm3931_vm7, %v4657_v36  ;;  %4529 = vmatprep.mubr.f32.mxu0 %v12210_v5  ;;  %v4932_v36 = vrot.slane %v10598_v57, 4  ;;  %v4936_v57 = vrot.slane %v10620_v24, 4 }
 0x438   : > { %4827 = vmatprep.mubr.f32.mxu1 %v12210_v5  ;;  %5018 = vmatpush1.msra.mxu0 %v7277_v35  ;;  %v4929_v7 = vsel %vm2295_vm4, %v4926_v30, %v4928_v54  ;;  %v4931_v35 = vsel %vm2295_vm4, %v4928_v54, %v4930_v41  ;;  %v5274_v30 = vld [vmem:[%s11983_s7 + $0x50] sm:$0xff]  ;;  %v5273_v54 = vld [vmem:[%s11983_s7 + $0x48] sm:$0xff] }
 0x439   : > { %5019 = vmatprep.subr.mxu0 %v7276_v29  ;;  %v4933_v27 = vsel %vm2295_vm4, %v4930_v41, %v4932_v36  ;;  %v4935_v16 = vsel %vm2295_vm4, %v4932_v36, %v4934_v34  ;;  %v4937_v28 = vsel %vm2295_vm4, %v4934_v34, %v4936_v57  ;;  %v4939_v24 = vsel %vm2295_vm4, %v4936_v57, %v4938_v46  ;;  %v5272_v41 = vld [vmem:[%s11983_s7 + $0x40] sm:$0xff]  ;;  %v5271_v36 = vld [vmem:[%s11983_s7 + $0x38] sm:$0xff]  ;;  %v5270_v34 = vld [vmem:[%s11983_s7 + $0x30] sm:$0xff] }
 0x43a   : > { %7220 = vmatmul.mubr.msk.f32.gmra.mxu0 %vm3931_vm7, %v4369_v20  ;;  %v5269_v57 = vld [vmem:[%s11983_s7 + $0x28] sm:$0xff] }
 0x43b   : > { %7262 = vmatmul.mubr.msk.f32.gmra.mxu1 %vm3931_vm7, %v4659_v14  ;;  %4535 = vmatprep.mubr.f32.mxu0 %v12210_v5 }
 0x43c   : > { %4833 = vmatprep.mubr.f32.mxu1 %v12210_v5  ;;  %5020 = vmatpush1.msra.mxu0 %v7275_v15 }
 0x43d   : > { %5021 = vmatprep.subr.mxu0 %v7274_v25 }
 0x43e   : > { %7221 = vmatmul.mubr.msk.f32.gmra.mxu0 %vm3931_vm7, %v4371_v26  ;;  %v4940_v26 = vrot.slane %v10638_v12, 4 }
 0x43f   : > { %7263 = vmatmul.mubr.msk.f32.gmra.mxu1 %vm3931_vm7, %v4661_v21  ;;  %4541 = vmatprep.mubr.f32.mxu0 %v12210_v5 }
 0x440   : > { %4839 = vmatprep.mubr.f32.mxu1 %v12210_v5  ;;  %5022 = vmatpush1.msra.mxu0 %v7273_v8  ;;  %v4942_v8 = vrot.slane %v10636_v11, 4  ;;  %v4941_v21 = vsel %vm2295_vm4, %v4938_v46, %v4940_v26  ;;  %v5268_v46 = vld [vmem:[%s11983_s7 + $0x20] sm:$0xff] }
 0x441   : > { %5023 = vmatprep.subr.mxu0 %v7272_v38 }
 0x442   : > { %7222 = vmatmul.mubr.msk.f32.gmra.mxu0 %vm3931_vm7, %v4373_v13  ;;  %v4943_v12 = vsel %vm2295_vm4, %v4940_v26, %v4942_v8  ;;  %v4945_v2 = vsel %vm2295_vm4, %v4942_v8, %v4944_v62  ;;  %v5267_v26 = vld [vmem:[%s11983_s7 + $0x18] sm:$0xff]  ;;  %v5266_v8 = vld [vmem:[%s11983_s7 + $0x10] sm:$0xff] }
 0x443   : > { %7264 = vmatmul.mubr.msk.f32.gmra.mxu1 %vm3931_vm7, %v4663_v31  ;;  %4547 = vmatprep.mubr.f32.mxu0 %v12210_v5 }
 0x444   : > { %4845 = vmatprep.mubr.f32.mxu1 %v12210_v5  ;;  %5024 = vmatpush1.msra.mxu0 %v7271_v32  ;;  %v4946_v32 = vrot.slane %v10654_v9, 4 }
 0x445   : > { %5025 = vmatprep.subr.mxu0 %v7270_v23 }
 0x446   : > { %7223 = vmatmul.mubr.msk.f32.gmra.mxu0 %vm3931_vm7, %v4375_v50  ;;  %v4947_v56 = vsel %vm2295_vm4, %v4944_v62, %v4946_v32  ;;  %v4948_v50 = vrot.slane %v10674_v58, 4  ;;  %v4952_v58 = vrot.slane %v10692_v61, 4  ;;  %v5265_v62 = vld [vmem:[%s11983_s7 + $0x8] sm:$0xff] }
 0x447   : > { %7265 = vmatmul.mubr.msk.f32.gmra.mxu1 %vm3931_vm7, %v4665_v44  ;;  %4553 = vmatprep.mubr.f32.mxu0 %v12210_v5 }
 0x448   : > { %4851 = vmatprep.mubr.f32.mxu1 %v12210_v5  ;;  %5026 = vmatpush1.msra.mxu0 %v7269_v3  ;;  %v4950_v3 = vrot.slane %v10672_v47, 4  ;;  %v4949_v1 = vsel %vm2295_vm4, %v4946_v32, %v4948_v50  ;;  %v5279_v47 = vld [vmem:[%s11983_s7 + $0x78] sm:$0xff]  ;;  %v5264_v32 = vld [vmem:[%s11983_s7] sm:$0xff] }
 0x449   : > { %7631 = vmatprep.subr.mxu0 %v12210_v5  ;;  %5333 = vmatpush1.msra.mxu1 %v5279_v47  ;;  %v5280_v47 = vld [vmem:[%s11983_s7 + $0x80] sm:$0xff] }
 0x44a   : > { %7224 = vmatmul.mubr.msk.f32.gmra.mxu0 %vm3931_vm7, %v4377_v59  ;;  %v4951_v59 = vsel %vm2295_vm4, %v4948_v50, %v4950_v3  ;;  %5334 = vmatprep.subr.mxu1 %v12210_v5  ;;  %v4953_v22 = vsel %vm2295_vm4, %v4950_v3, %v4952_v58  ;;  %v5283_v50 = vld [vmem:[%s11983_s7 + $0x98] sm:$0xff]  ;;  %v5282_v3 = vld [vmem:[%s11983_s7 + $0x90] sm:$0xff] }
 0x44b   : > { %7266 = vmatmul.mubr.msk.f32.gmra.mxu1 %vm3931_vm7, %v4667_v53  ;;  %4559 = vmatprep.mubr.f32.mxu0 %v12210_v5 }
 0x44c   : > { %4857 = vmatprep.mubr.f32.mxu1 %v12210_v5  ;;  %5335 = vmatpush1.msra.mxu1 %v5278_v42 }
 0x44d   : > { %5336 = vmatprep.subr.mxu1 %v12210_v5 }
 0x44e   : > { %7225 = vmatmul.mubr.msk.f32.gmra.mxu0 %vm3931_vm7, %v4379_v39 }
 0x44f   : > { %7267 = vmatmul.mubr.msk.f32.gmra.mxu1 %vm3931_vm7, %v4669_v18  ;;  %4565 = vmatprep.mubr.f32.mxu0 %v12210_v5  ;;  %v5277_v18 = vld [vmem:[%s11983_s7 + $0x68] sm:$0xff] }
 0x450   : > { %4863 = vmatprep.mubr.f32.mxu1 %v12210_v5  ;;  %5337 = vmatpush1.msra.mxu1 %v5277_v18 }
 0x451   : > { %5338 = vmatprep.subr.mxu1 %v12210_v5 }
 0x452   : > { %7226 = vmatmul.mubr.msk.f32.gmra.mxu0 %vm3931_vm7, %v4381_v52  ;;  %v4954_v52 = vrot.slane %v10690_v51, 4  ;;  %5339 = vmatpush1.msra.mxu1 %v5276_v45  ;;  %v5275_v51 = vld [vmem:[%s11983_s7 + $0x58] sm:$0xff] }
 0x453   : > { %7268 = vmatmul.mubr.msk.f32.gmra.mxu1 %vm3931_vm7, %v4670_v40  ;;  %4571 = vmatprep.mubr.f32.mxu0 %v12210_v5 }
 0x454   : > { %v4955_v43 = vsel %vm2295_vm4, %v4952_v58, %v4954_v52  ;;  %5340 = vmatprep.subr.mxu1 %v12210_v5 }
 0x455   : > { %5341 = vmatpush1.msra.mxu1 %v5275_v51 }
 0x456   : > { %7227 = vmatmul.mubr.msk.f32.gmra.mxu0 %vm3931_vm7, %v4383_v19  ;;  %5342 = vmatprep.subr.mxu1 %v12210_v5 }
 0x457   : > { %4577 = vmatprep.mubr.f32.mxu0 %v12210_v5  ;;  %5343 = vmatpush1.msra.mxu1 %v5274_v30 }
 0x458   : > { %5344 = vmatprep.subr.mxu1 %v12210_v5 }
 0x459   : > { %5345 = vmatpush1.msra.mxu1 %v5273_v54 }
 0x45a   : > { %7228 = vmatmul.mubr.msk.f32.gmra.mxu0 %vm3931_vm7, %v4384_v55  ;;  %v4956_v55 = vsel %vm2295_vm4, %v4954_v52, %v12214_v0  ;;  %5346 = vmatprep.subr.mxu1 %v12210_v5 }
 0x45b   : > { %5059 = vmatprep.mubr.f32.mxu0 %v12210_v5  ;;  %5347 = vmatpush1.msra.mxu1 %v5272_v41 }
 0x45c   : > { %5348 = vmatprep.subr.mxu1 %v12210_v5 }
 0x45d   : > { %5349 = vmatpush1.msra.mxu1 %v5271_v36 }
 0x45e   : > { %7293 = vmatmul.mubr.msk.f32.vlgmr.msra.gmra.mxu0 %vm3931_vm7, %v4927_v10  ;;  %5350 = vmatprep.subr.mxu1 %v12210_v5 }
 0x45f   : > { %5065 = vmatprep.mubr.f32.mxu0 %v12210_v5  ;;  %v10914_v33 = vpop.f32.mrf.mxu1  ;;  %5351 = vmatpush1.msra.mxu1 %v5270_v34 }
 0x460   : > { %5352 = vmatprep.subr.mxu1 %v12210_v5 }
 0x461   : > { %v10920_v6 = vpop.f32.mrf.mxu1  ;;  %5353 = vmatpush1.msra.mxu1 %v5269_v57 }
 0x462   : > { %7294 = vmatmul.mubr.msk.f32.gmra.mxu0 %vm3931_vm7, %v4929_v7  ;;  %v10936_v15 = vpop.f32.mrf.mxu0  ;;  %5354 = vmatprep.subr.mxu1 %v12210_v5 }
 0x463   : > { %5071 = vmatprep.mubr.f32.mxu0 %v12210_v5  ;;  %v10926_v29 = vpop.f32.mrf.mxu1  ;;  %5355 = vmatpush1.msra.mxu1 %v5268_v46 }
 0x464   : > { %v10944_v25 = vpop.f32.mrf.mxu0  ;;  %5356 = vmatprep.subr.mxu1 %v12210_v5 }
 0x465   : > { %v10932_v20 = vpop.f32.mrf.mxu1  ;;  %5357 = vmatpush1.msra.mxu1 %v5267_v26 }
 0x466   : > { %7295 = vmatmul.mubr.msk.f32.gmra.mxu0 %vm3931_vm7, %v4931_v35  ;;  %5358 = vmatprep.subr.mxu1 %v12210_v5 }
 0x467   : > { %5077 = vmatprep.mubr.f32.mxu0 %v12210_v5  ;;  %5359 = vmatpush1.msra.mxu1 %v5266_v8 }
 0x468   : > { %5360 = vmatprep.subr.mxu1 %v12210_v5 }
 0x469   : > { %5361 = vmatpush1.msra.mxu1 %v5265_v62 }
 0x46a   : > { %7296 = vmatmul.mubr.msk.f32.gmra.mxu0 %vm3931_vm7, %v4933_v27  ;;  %5362 = vmatprep.subr.mxu1 %v12210_v5 }
 0x46b   : > { %5083 = vmatprep.mubr.f32.mxu0 %v12210_v5  ;;  %5363 = vmatpush1.msra.mxu1 %v5264_v32 }
 0x46c   : > { %5388 = vmatprep.subr.mxu1 %v12210_v5 }
 0x46d   : > { %5389 = vmatpush2.msra.mxu1 %v5283_v50 }
 0x46e   : > { %7297 = vmatmul.mubr.msk.f32.gmra.mxu0 %vm3931_vm7, %v4935_v16  ;;  %5390 = vmatprep.subr.mxu1 %v12210_v5 }
 0x46f   : > { %5089 = vmatprep.mubr.f32.mxu0 %v12210_v5  ;;  %v10940_v14 = vpop.f32.mrf.mxu1  ;;  %5391 = vmatpush2.msra.mxu1 %v5282_v3 }
 0x470   : > { %5392 = vmatprep.subr.mxu1 %v12210_v5 }
 0x471   : > { %v10948_v48 = vpop.f32.mrf.mxu1 }
 0x472   : > { %7298 = vmatmul.mubr.msk.f32.gmra.mxu0 %vm3931_vm7, %v4937_v28  ;;  %v10952_v60 = vpop.f32.mrf.mxu0 }
 0x473   : > { %5095 = vmatprep.mubr.f32.mxu0 %v12210_v5  ;;  %v10956_v37 = vpop.f32.mrf.mxu1 }
 0x474   : > { %v10960_v38 = vpop.f32.mrf.mxu0 }
 0x475   : > { %v10964_v13 = vpop.f32.mrf.mxu1 }
 0x476   : > { %7299 = vmatmul.mubr.msk.f32.gmra.mxu0 %vm3931_vm7, %v4939_v24  ;;  %v10968_v11 = vpop.f32.mrf.mxu0 }
 0x477   : > { %5101 = vmatprep.mubr.f32.mxu0 %v12210_v5 }
 0x478   : > { %v10976_v23 = vpop.f32.mrf.mxu0 }
 0x47a   : > { %7300 = vmatmul.mubr.msk.f32.gmra.mxu0 %vm3931_vm7, %v4941_v21 }
 0x47b   : > { %5107 = vmatprep.mubr.f32.mxu0 %v12210_v5 }
 0x47e   : > { %7301 = vmatmul.mubr.msk.f32.gmra.mxu0 %vm3931_vm7, %v4943_v12 }
 0x47f   : > { %5113 = vmatprep.mubr.f32.mxu0 %v12210_v5  ;;  %v10972_v31 = vpop.f32.mrf.mxu1 }
 0x481   : > { %v10980_v4 = vpop.f32.mrf.mxu1 }
 0x482   : > { %7302 = vmatmul.mubr.msk.f32.gmra.mxu0 %vm3931_vm7, %v4945_v2  ;;  %v10984_v9 = vpop.f32.mrf.mxu0 }
 0x483   : > { %5119 = vmatprep.mubr.f32.mxu0 %v12210_v5  ;;  %v10988_v44 = vpop.f32.mrf.mxu1 }
 0x484   : > { %v10992_v49 = vpop.f32.mrf.mxu0 }
 0x485   : > { %v10996_v53 = vpop.f32.mrf.mxu1 }
 0x486   : > { %7303 = vmatmul.mubr.msk.f32.gmra.mxu0 %vm3931_vm7, %v4947_v56  ;;  %v11007_v61 = vpop.f32.mrf.mxu0 }
 0x487   : > { %5125 = vmatprep.mubr.f32.mxu0 %v12210_v5 }
 0x488   : > { %v11023_v40 = vpop.f32.mrf.mxu0 }
 0x48a   : > { %7304 = vmatmul.mubr.msk.f32.gmra.mxu0 %vm3931_vm7, %v4949_v1 }
 0x48b   : > { %5131 = vmatprep.mubr.f32.mxu0 %v12210_v5 }
 0x48e   : > { %7305 = vmatmul.mubr.msk.f32.gmra.mxu0 %vm3931_vm7, %v4951_v59  ;;  %v5281_v59 = vld [vmem:[%s11983_s7 + $0x88] sm:$0xff] }
 0x48f   : > { %5137 = vmatprep.mubr.f32.mxu0 %v12210_v5  ;;  %v11010_v39 = vpop.f32.mrf.mxu1  ;;  %5393 = vmatpush2.msra.mxu1 %v5281_v59 }
 0x490   : > { %5394 = vmatprep.subr.mxu1 %v12210_v5 }
 0x491   : > { %v11026_v19 = vpop.f32.mrf.mxu1  ;;  %5395 = vmatpush2.msra.mxu1 %v5280_v47 }
 0x492   : > { %7306 = vmatmul.mubr.msk.f32.gmra.mxu0 %vm3931_vm7, %v4953_v22  ;;  %v11038_v63 = vpop.f32.mrf.mxu0  ;;  %7638 = vmatprep.subr.mxu1 %v12210_v5 }
 0x493   : > { %5143 = vmatprep.mubr.f32.mxu0 %v12210_v5  ;;  %v11042_v10 = vpop.f32.mrf.mxu1 }
 0x494   : > { %12215 = vst [vmem:[#allocation60_spill] sm:$0xff] %v11042_v10  ;;  %v11053_v7 = vpop.f32.mrf.mxu0 }
 0x495   : > { %v11055_v35 = vpop.f32.mrf.mxu1 }
 0x496   : > { %7307 = vmatmul.mubr.msk.f32.gmra.mxu0 %vm3931_vm7, %v4955_v43  ;;  %12216 = vst [vmem:[#allocation12_spill] sm:$0xff] %v11055_v35  ;;  %v11065_v27 = vpop.f32.mrf.mxu0 }
 0x497   : > { %5149 = vmatprep.mubr.f32.mxu0 %v12210_v5 }
 0x498   : > { %v11077_v28 = vpop.f32.mrf.mxu0 }
 0x49a   : > { %7308 = vmatmul.mubr.msk.f32.gmra.mxu0 %vm3931_vm7, %v4956_v55 }
 0x49f   : > { %v11067_v16 = vpop.f32.mrf.mxu1 }
 0x4a0   : > { %12217 = vst [vmem:[#allocation13_spill] sm:$0xff] %v11067_v16 }
 0x4a1   : > { %v11079_v24 = vpop.f32.mrf.mxu1 }
 0x4a2   : > { %12218 = vst [vmem:[#allocation61_spill] sm:$0xff] %v11079_v24  ;;  %v11089_v21 = vpop.f32.mrf.mxu0 }
 0x4a3   : > { %12219 = vst [vmem:[#allocation63_spill] sm:$0xff] %v11089_v21  ;;  %v11091_v12 = vpop.f32.mrf.mxu1 }
 0x4a4   : > { %12220 = vst [vmem:[#allocation14_spill] sm:$0xff] %v11091_v12  ;;  %v11101_v2 = vpop.f32.mrf.mxu0 }
 0x4a5   : > { %12221 = vst [vmem:[#allocation15_spill] sm:$0xff] %v11101_v2  ;;  %v11103_v56 = vpop.f32.mrf.mxu1 }
 0x4a6   : > { %12222 = vst [vmem:[#allocation62_spill] sm:$0xff] %v11103_v56  ;;  %v11113_v1 = vpop.f32.mrf.mxu0 }
 0x4a7   : > { %12223 = vst [vmem:[#allocation65_spill] sm:$0xff] %v11113_v1 }
 0x4a8   : > { %v11125_v42 = vpop.f32.mrf.mxu0 }
 0x4a9   : > { %12225 = vst [vmem:[#allocation17_spill] sm:$0xff] %v11125_v42 }
 0x4af   : > { %v11115_v58 = vpop.f32.mrf.mxu1 }
 0x4b0   : > { %12224 = vst [vmem:[#allocation16_spill] sm:$0xff] %v11115_v58 }
 0x4b1   : > { %v11127_v22 = vpop.f32.mrf.mxu1 }
 0x4b2   : > { %12226 = vst [vmem:[#allocation64_spill] sm:$0xff] %v11127_v22  ;;  %v11130_v18 = vpop.f32.mrf.mxu0 }
 0x4b3   : > { %12227 = vst [vmem:[#allocation67_spill] sm:$0xff] %v11130_v18  ;;  %v11132_v52 = vpop.f32.mrf.mxu1 }
 0x4b4   : > { %12228 = vst [vmem:[#allocation18_spill] sm:$0xff] %v11132_v52  ;;  %v11134_v45 = vpop.f32.mrf.mxu0 }
 0x4b5   : > { %12229 = vst [vmem:[#allocation19_spill] sm:$0xff] %v11134_v45  ;;  %v11136_v43 = vpop.f32.mrf.mxu1 }
 0x4b6   : > { %12230 = vst [vmem:[#allocation66_spill] sm:$0xff] %v11136_v43  ;;  %v11138_v51 = vpop.f32.mrf.mxu0 }
 0x4b7   : > { %12231 = vst [vmem:[#allocation22_spill] sm:$0xff] %v11138_v51 }
 0x4b8   : > { %v11142_v0 = vpop.f32.mrf.mxu0 }
 0x4b9   : > { %12233 = vst [vmem:[#allocation68_spill] sm:$0xff] %v11142_v0 }
 0x4bf   : > { %v11140_v30 = vpop.f32.mrf.mxu1 }
 0x4c0   : > { %12232 = vst [vmem:[#allocation23_spill] sm:$0xff] %v11140_v30 }
 0x4c1   : > { %v11146_v54 = vpop.f32.mrf.mxu1 }
 0x4c2   : > { %v11144_v55 = vpop.f32.mrf.mxu0  ;;  %12235 = vst [vmem:[#allocation24_spill] sm:$0xff] %v11146_v54 }
 0x4c3   : > { %12234 = vst [vmem:[#allocation71_spill] sm:$0xff] %v11144_v55  ;;  %v11150_v36 = vpop.f32.mrf.mxu1 }
 0x4c4   : > { %v11148_v41 = vpop.f32.mrf.mxu0  ;;  %12237 = vst [vmem:[#allocation69_spill] sm:$0xff] %v11150_v36 }
 0x4c5   : > { %12236 = vst [vmem:[#allocation25_spill] sm:$0xff] %v11148_v41  ;;  %v11154_v57 = vpop.f32.mrf.mxu1 }
 0x4c6   : > { %v11152_v34 = vpop.f32.mrf.mxu0  ;;  %12239 = vst [vmem:[#allocation26_spill] sm:$0xff] %v11154_v57 }
 0x4c7   : > { %12238 = vst [vmem:[#allocation73_spill] sm:$0xff] %v11152_v34 }
 0x4c8   : > { %v11158_v26 = vpop.f32.mrf.mxu0 }
 0x4c9   : > { %12241 = vst [vmem:[#allocation72_spill] sm:$0xff] %v11158_v26 }
 0x4cf   : > { %v11156_v46 = vpop.f32.mrf.mxu1 }
 0x4d0   : > { %12240 = vst [vmem:[#allocation27_spill] sm:$0xff] %v11156_v46 }
 0x4d1   : > { %v11160_v8 = vpop.f32.mrf.mxu1 }
 0x4d2   : > { %12242 = vst [vmem:[#allocation75_spill] sm:$0xff] %v11160_v8  ;;  %v11162_v62 = vpop.f32.mrf.mxu0 }
 0x4d3   : > { %12243 = vst [vmem:[#allocation28_spill] sm:$0xff] %v11162_v62  ;;  %v11166_v50 = vpop.f32.mrf.mxu1 }
 0x4d4   : > { %v11164_v32 = vpop.f32.mrf.mxu0  ;;  %12245 = vst [vmem:[#allocation74_spill] sm:$0xff] %v11166_v50 }
 0x4d5   : > { %12244 = vst [vmem:[#allocation29_spill] sm:$0xff] %v11164_v32  ;;  %v11172_v47 = vpop.f32.mrf.mxu1 }
 0x4d6   : > { %v11168_v3 = vpop.f32.mrf.mxu0  ;;  %12248 = vst [vmem:[#allocation30_spill] sm:$0xff] %v11172_v47 }
 0x4d7   : > { %12246 = vst [vmem:[#allocation105_spill] sm:$0xff] %v11168_v3  ;;  %v4775_v46 = vpop.f32.mrf.mxu1 }
 0x4d8   : > { %v11170_v59 = vpop.f32.mrf.mxu0 }
 0x4d9   : > { %12247 = vst [vmem:[#allocation77_spill] sm:$0xff] %v11170_v59  ;;  %v4777_v8 = vpop.f32.mrf.mxu1 }
 0x4da   : > { %v11174_v5 = vpop.f32.mrf.mxu0 }
 0x4db   : > { %12249 = vst [vmem:[#allocation31_spill] sm:$0xff] %v11174_v5  ;;  %v11178_v30 = vpop.f32.mrf.mxu1 }
 0x4dc   : > { %v11176_v57 = vpop.f32.mrf.mxu0 }
 0x4dd   : > { %12250 = vst [vmem:[#allocation76_spill] sm:$0xff] %v11176_v57  ;;  %v11182_v3 = vpop.f32.mrf.mxu1 }
 0x4de   : > { %v4489_v36 = vpop.f32.mrf.mxu0 }
 0x4df   : > { %v11188_v5 = vpop.f32.mrf.mxu1 }
 0x4e0   : > { %v4491_v54 = vpop.f32.mrf.mxu0 }
 0x4e1   : > { %v11194_v43 = vpop.f32.mrf.mxu1 }
 0x4e2   : > { %v4495_v26 = vpop.f32.mrf.mxu0 }
 0x4e3   : > { %v11200_v55 = vpop.f32.mrf.mxu1 }
 0x4e4   : > { %v4497_v62 = vpop.f32.mrf.mxu0 }
 0x4e5   : > { %v11206_v58 = vpop.f32.mrf.mxu1 }
 0x4e6   : > { %v4501_v32 = vpop.f32.mrf.mxu0 }
 0x4e7   : > { %v11212_v45 = vpop.f32.mrf.mxu1 }
 0x4e8   : > { %v11180_v50 = vpop.f32.mrf.mxu0 }
 0x4e9   : > { %v11218_v24 = vpop.f32.mrf.mxu1 }
 0x4ea   : > { %v11184_v59 = vpop.f32.mrf.mxu0 }
 0x4eb   : > { %v11224_v1 = vpop.f32.mrf.mxu1 }
 0x4ec   : > { %v11186_v47 = vpop.f32.mrf.mxu0 }
 0x4ee   : > { %v11190_v57 = vpop.f32.mrf.mxu0 }
 0x4f0   : > { %v11192_v34 = vpop.f32.mrf.mxu0 }
 0x4f2   : > { %v11196_v41 = vpop.f32.mrf.mxu0 }
 0x4f4   : > { %v11198_v52 = vpop.f32.mrf.mxu0 }
 0x4f6   : > { %v11202_v22 = vpop.f32.mrf.mxu0 }
 0x4f8   : > { %v11204_v0 = vpop.f32.mrf.mxu0 }
 0x4f9   : > { %12251 = vst [vmem:[#allocation108_spill] sm:$0xff] %v11204_v0 }
 0x4fa   : > { %v11208_v51 = vpop.f32.mrf.mxu0 }
 0x4fb   : > { %12252 = vst [vmem:[#allocation79_spill] sm:$0xff] %v11208_v51  ;;  %v11230_v51 = vpop.f32.mrf.mxu1 }
 0x4fc   : > { %v11210_v56 = vpop.f32.mrf.mxu0 }
 0x4fd   : > { %12253 = vst [vmem:[#allocation32_spill] sm:$0xff] %v11210_v56 }
 0x4fe   : > { %v11214_v12 = vpop.f32.mrf.mxu0 }
 0x4ff   : > { %12254 = vst [vmem:[#allocation33_spill] sm:$0xff] %v11214_v12  ;;  %v11236_v12 = vpop.f32.mrf.mxu1 }
 0x500   : > { %v11216_v18 = vpop.f32.mrf.mxu0  ;;  %12262 = vst [vmem:[#allocation37_spill] sm:$0xff] %v11236_v12 }
 0x501   : > { %12255 = vst [vmem:[#allocation78_spill] sm:$0xff] %v11216_v18 }
 0x502   : > { %v11220_v42 = vpop.f32.mrf.mxu0 }
 0x503   : > { %12256 = vst [vmem:[#allocation81_spill] sm:$0xff] %v11220_v42  ;;  %v11242_v42 = vpop.f32.mrf.mxu1 }
 0x504   : > { %v11222_v16 = vpop.f32.mrf.mxu0  ;;  %12265 = vst [vmem:[#allocation38_spill] sm:$0xff] %v11242_v42 }
 0x505   : > { %12257 = vst [vmem:[#allocation34_spill] sm:$0xff] %v11222_v16 }
 0x506   : > { %v11226_v35 = vpop.f32.mrf.mxu0 }
 0x507   : > { %12258 = vst [vmem:[#allocation35_spill] sm:$0xff] %v11226_v35  ;;  %v11248_v35 = vpop.f32.mrf.mxu1 }
 0x508   : > { %v11228_v2 = vpop.f32.mrf.mxu0  ;;  %12268 = vst [vmem:[#allocation87_spill] sm:$0xff] %v11248_v35 }
 0x509   : > { %12259 = vst [vmem:[#allocation80_spill] sm:$0xff] %v11228_v2 }
 0x50a   : > { %v11232_v56 = vpop.f32.mrf.mxu0 }
 0x50b   : > { %12260 = vst [vmem:[#allocation83_spill] sm:$0xff] %v11232_v56  ;;  %v4236_v56 = vadd.f32 %v10914_v33, %v10936_v15  ;;  %v4244_v33 = vadd.f32 %v10932_v20, %v10960_v38  ;;  %v4250_v38 = vadd.f32 %v10948_v48, %v10976_v23  ;;  %v4256_v48 = vadd.f32 %v10964_v13, %v10992_v49 }
 0x50c   : > { %v11234_v0 = vpop.f32.mrf.mxu0 }
 0x50d   : > { %12261 = vst [vmem:[#allocation36_spill] sm:$0xff] %v11234_v0  ;;  %v4584_v12 = vadd.f32 %v4489_v36, %v4236_v56 }
 0x50e   : > { %v11238_v18 = vpop.f32.mrf.mxu0 }
 0x50f   : > { %12263 = vst [vmem:[#allocation82_spill] sm:$0xff] %v11238_v18  ;;  %v4238_v18 = vadd.f32 %v10920_v6, %v10944_v25  ;;  %v4870_v6 = vadd.f32 %v4775_v46, %v4584_v12  ;;  %v4248_v25 = vadd.f32 %v10940_v14, %v10968_v11  ;;  %v4254_v12 = vadd.f32 %v10956_v37, %v10984_v9 }
 0x510   : > { %v11240_v10 = vpop.f32.mrf.mxu0 }
 0x511   : > { %12264 = vst [vmem:[#allocation85_spill] sm:$0xff] %v11240_v10  ;;  %v11258_v10 = vpop.f32.mrf.mxu1 }
 0x512   : > { %v11244_v16 = vpop.f32.mrf.mxu0 }
 0x513   : > { %12266 = vst [vmem:[#allocation39_spill] sm:$0xff] %v11244_v16  ;;  %v4585_v16 = vadd.f32 %v4491_v54, %v4238_v18  ;;  %v11273_v56 = vpop.f32.mrf.mxu1  ;;  %v4587_v18 = vadd.f32 %v4497_v62, %v4244_v33  ;;  %v4262_v33 = vadd.f32 %v10980_v4, %v11023_v40 }
 0x514   : > { %v11246_v21 = vpop.f32.mrf.mxu0 }
 0x515   : > { %12267 = vst [vmem:[#allocation84_spill] sm:$0xff] %v11246_v21  ;;  %v4242_v21 = vadd.f32 %v10926_v29, %v10952_v60  ;;  %v12273_v29 = vsub.s32 0, %v9897_v17  ;;  %v11288_v46 = vpop.f32.mrf.mxu1 }
 0x516   : > { %v11250_v2 = vpop.f32.mrf.mxu0 }
 0x517   : > { %12269 = vst [vmem:[#allocation40_spill] sm:$0xff] %v11250_v2  ;;  %v5188_v2 = vld [vmem:[%s11982_s6] sm:$0x3]  ;;  %v4586_v15 = vadd.f32 %v4495_v26, %v4242_v21  ;;  %v4588_v21 = vadd.f32 %v4501_v32, %v4248_v25  ;;  %v11300_v62 = vpop.f32.mrf.mxu1 }
 0x518   : > { %v11254_v0 = vpop.f32.mrf.mxu0  ;;  %v11277_v60 = vrot.slane %v5188_v2, %v12273_v29  ;;  %v4268_v29 = vadd.f32 %v10996_v53, %v11053_v7 }
 0x519   : > { %12270 = vst [vmem:[#allocation41_spill] sm:$0xff] %v11254_v0  ;;  %v4872_v11 = vadd.f32 %v11178_v30, %v4586_v15  ;;  %v4874_v9 = vadd.f32 %v11188_v5, %v4588_v21  ;;  %v4260_v30 = vadd.f32 %v10972_v31, %v11007_v61  ;;  %v11312_v25 = vpop.f32.mrf.mxu1  ;;  %v4274_v21 = vadd.f32 %v11026_v19, %v11077_v28 }
 0x51a   : > { %v11260_v42 = vpop.f32.mrf.mxu0 }
 0x51b   : > { %12271 = vst [vmem:[#allocation86_spill] sm:$0xff] %v11260_v42  ;;  %v4871_v42 = vadd.f32 %v4777_v8, %v4585_v16  ;;  %v4873_v8 = vadd.f32 %v11182_v3, %v4587_v18  ;;  %v4591_v3 = vadd.f32 %v11186_v47, %v4256_v48  ;;  %v4592_v15 = vadd.f32 %v11190_v57, %v4260_v30  ;;  %v12279_v48 = vld [vmem:[#allocation12_spill] sm:$0xff] }
 0x51c   : > { %v11267_v35 = vpop.f32.mrf.mxu0 }
 0x51d   : > { %12272 = vst [vmem:[#allocation89_spill] sm:$0xff] %v11267_v35  ;;  %v12274_v35 = vsub.s32 1, %v9897_v17  ;;  %v4589_v17 = vadd.f32 %v11180_v50, %v4250_v38  ;;  %v4877_v57 = vadd.f32 %v11206_v58, %v4591_v3  ;;  %v4595_v58 = vadd.f32 %v11198_v52, %v4268_v29 }
 0x51e   : > { %v5061_v36 = vpop.f32.mrf.mxu0 }
 0x51f   : > { %v5156_v54 = vadd.f32 %v5061_v36, %v4870_v6  ;;  %v11281_v0 = vrot.slane %v5188_v2, %v12274_v35  ;;  %v4266_v6 = vadd.f32 %v10988_v44, %v11038_v63  ;;  %v4878_v63 = vadd.f32 %v11212_v45, %v4592_v15 }
 0x520   : > { %v5063_v20 = vpop.f32.mrf.mxu0 }
 0x521   : > { %v5157_v14 = vadd.f32 %v5063_v20, %v4871_v42  ;;  %v5200_v26 = vadd.f32 %v11277_v60, %v5156_v54  ;;  %v4590_v42 = vadd.f32 %v11184_v59, %v4254_v12  ;;  %v4875_v59 = vadd.f32 %v11194_v43, %v4589_v17  ;;  %v11324_v20 = vpop.f32.mrf.mxu1  ;;  %v12275_v12 = vld [vmem:[#allocation63_spill] sm:$0xff] }
 0x522   : > { %v5067_v16 = vpop.f32.mrf.mxu0  ;;  %v4593_v43 = vadd.f32 %v11192_v34, %v4262_v33  ;;  %v4594_v18 = vadd.f32 %v11196_v41, %v4266_v6  ;;  %v4272_v54 = vadd.f32 %v11010_v39, %v11065_v27 }
 0x523   : > { %v5201_v35 = vadd.f32 %v11281_v0, %v5157_v14  ;;  %v5158_v2 = vadd.f32 %v5067_v16, %v4872_v11  ;;  %v4876_v61 = vadd.f32 %v11200_v55, %v4590_v42  ;;  %v11336_v52 = vpop.f32.mrf.mxu1 }
 0x524   : > { %v5069_v23 = vpop.f32.mrf.mxu0  ;;  %v4879_v41 = vadd.f32 %v11218_v24, %v4593_v43  ;;  %v4596_v14 = vadd.f32 %v11202_v22, %v4272_v54  ;;  %v4880_v27 = vadd.f32 %v11224_v1, %v4594_v18  ;;  %v4881_v1 = vadd.f32 %v11230_v51, %v4595_v58  ;;  %v12291_v58 = vld [vmem:[#allocation14_spill] sm:$0xff] }
 0x525   : > { %8029 = vtanh.f32 %v5201_v35  ;;  %v5159_v37 = vadd.f32 %v5069_v23, %v4873_v8  ;;  %v5202_v32 = vadd.f32 %v11277_v60, %v5158_v2  ;;  %v12277_v2 = vld [vmem:[#allocation108_spill] sm:$0xff]  ;;  %v12278_v8 = vld [vmem:[#allocation15_spill] sm:$0xff]  ;;  %v11349_v33 = vpop.f32.mrf.mxu1 }
 0x526   : > { %8031 = vtanh.f32 %v5200_v26  ;;  %v5073_v50 = vpop.f32.mrf.mxu0  ;;  %v12276_v26 = vld [vmem:[#allocation60_spill] sm:$0xff]  ;;  %v4597_v19 = vadd.f32 %v12277_v2, %v4274_v21  ;;  %v4280_v23 = vadd.f32 %v12279_v48, %v12278_v8 }
 0x527   : > { %v5203_v13 = vadd.f32 %v11281_v0, %v5159_v37  ;;  %v5160_v49 = vadd.f32 %v5073_v50, %v4874_v9  ;;  %v4278_v16 = vadd.f32 %v12276_v26, %v12275_v12  ;;  %v12280_v37 = vld [vmem:[#allocation79_spill] sm:$0xff]  ;;  %v12297_v8 = vld [vmem:[#allocation16_spill] sm:$0xff] }
 0x528   : > { %v5075_v5 = vpop.f32.mrf.mxu0  ;;  %v12293_v26 = vld [vmem:[#allocation19_spill] sm:$0xff] }
 0x529   : > { %8033 = vtanh.f32 %v5203_v13  ;;  %v5161_v31 = vadd.f32 %v5075_v5, %v4875_v59  ;;  %v5204_v47 = vadd.f32 %v11277_v60, %v5160_v49  ;;  %v4598_v9 = vadd.f32 %v12280_v37, %v4278_v16  ;;  %v12282_v13 = vld [vmem:[#allocation65_spill] sm:$0xff]  ;;  %v12294_v16 = vld [vmem:[#allocation62_spill] sm:$0xff] }
 0x52a   : > { %8035 = vtanh.f32 %v5202_v32  ;;  %v5079_v36 = vpop.f32.mrf.mxu0  ;;  %v12281_v32 = vld [vmem:[#allocation37_spill] sm:$0xff] }
 0x52b   : > { %v5205_v4 = vadd.f32 %v11281_v0, %v5161_v31  ;;  %v5162_v40 = vadd.f32 %v5079_v36, %v4876_v61  ;;  %v4882_v50 = vadd.f32 %v12281_v32, %v4596_v14  ;;  %v12283_v49 = vld [vmem:[#allocation13_spill] sm:$0xff]  ;;  %v12284_v31 = vld [vmem:[#allocation32_spill] sm:$0xff]  ;;  %v12285_v36 = vld [vmem:[#allocation38_spill] sm:$0xff] }
 0x52c   : > { %v5081_v55 = vpop.f32.mrf.mxu0  ;;  %v4284_v59 = vadd.f32 %v12283_v49, %v12282_v13  ;;  %v4599_v61 = vadd.f32 %v12284_v31, %v4280_v23  ;;  %v4883_v43 = vadd.f32 %v12285_v36, %v4597_v19  ;;  %v12292_v14 = vld [vmem:[#allocation78_spill] sm:$0xff]  ;;  %v12300_v13 = vld [vmem:[#allocation64_spill] sm:$0xff] }
 0x52d   : > { %8037 = vtanh.f32 %v5205_v4  ;;  %v5163_v44 = vadd.f32 %v5081_v55, %v4877_v57  ;;  %v5206_v34 = vadd.f32 %v11277_v60, %v5162_v40  ;;  %v12286_v4 = vld [vmem:[#allocation17_spill] sm:$0xff] }
 0x52e   : > { %8039 = vtanh.f32 %v5204_v47  ;;  %v5085_v38 = vpop.f32.mrf.mxu0  ;;  %v12287_v40 = vld [vmem:[#allocation61_spill] sm:$0xff]  ;;  %v4885_v12 = vadd.f32 %v11258_v10, %v4599_v61 }
 0x52f   : > { %v5207_v53 = vadd.f32 %v11281_v0, %v5163_v44  ;;  %v5164_v7 = vadd.f32 %v5085_v38, %v4878_v63  ;;  %v4286_v57 = vadd.f32 %v12287_v40, %v12286_v4  ;;  %v12288_v55 = vld [vmem:[#allocation33_spill] sm:$0xff]  ;;  %v12289_v63 = vld [vmem:[#allocation87_spill] sm:$0xff] }
 0x530   : > { %v5087_v45 = vpop.f32.mrf.mxu0  ;;  %v4600_v18 = vadd.f32 %v12288_v55, %v4284_v59  ;;  %v4884_v54 = vadd.f32 %v12289_v63, %v4598_v9  ;;  %v12290_v38 = vld [vmem:[#allocation67_spill] sm:$0xff]  ;;  %v12298_v9 = vld [vmem:[#allocation34_spill] sm:$0xff] }
 0x531   : > { %8041 = vtanh.f32 %v5207_v53  ;;  %v5165_v39 = vadd.f32 %v5087_v45, %v4879_v41  ;;  %v5208_v17 = vadd.f32 %v11277_v60, %v5164_v7  ;;  %v4290_v53 = vadd.f32 %v12291_v58, %v12290_v38  ;;  %v11362_v7 = vpop.f32.mrf.mxu1  ;;  %v12306_v63 = vld [vmem:[#allocation66_spill] sm:$0xff]  ;;  %v12307_v38 = vld [vmem:[#allocation83_spill] sm:$0xff] }
 0x532   : > { %v8030_v11 = vpop.eup %8029  ;;  %8043 = vtanh.f32 %v5206_v34  ;;  %v5091_v24 = vpop.f32.mrf.mxu0 }
 0x533   : > { %v8032_v35 = vpop.eup %8031  ;;  %v5209_v28 = vadd.f32 %v11281_v0, %v5165_v39  ;;  %v5166_v22 = vadd.f32 %v5091_v24, %v4880_v27  ;;  %7309 = vmatprep.mubr.msk.f32.mxu1 %vm3231_vm6, %v8030_v11  ;;  %v4601_v39 = vadd.f32 %v12292_v14, %v4286_v57  ;;  %v11375_v23 = vpop.f32.mrf.mxu1  ;;  %v12304_v57 = vld [vmem:[#allocation80_spill] sm:$0xff]  ;;  %v12309_v14 = vld [vmem:[#allocation23_spill] sm:$0xff] }
 0x534   : > { %v5093_v42 = vpop.f32.mrf.mxu0  ;;  %5397 = vmatmul.mubr.f32.vlgmr.msra.gmra.mxu1 %v8032_v35  ;;  %v12295_v35 = vld [vmem:[#allocation81_spill] sm:$0xff] }
 0x535   : > { %8045 = vtanh.f32 %v5209_v28  ;;  %v5167_v30 = vadd.f32 %v5093_v42, %v4881_v1  ;;  %v5210_v51 = vadd.f32 %v11277_v60, %v5166_v22  ;;  %v4602_v2 = vadd.f32 %v12295_v35, %v4290_v53  ;;  %v12296_v1 = vld [vmem:[#allocation22_spill] sm:$0xff] }
 0x536   : > { %v8034_v3 = vpop.eup %8033  ;;  %8047 = vtanh.f32 %v5208_v17  ;;  %v5097_v5 = vpop.f32.mrf.mxu0  ;;  %v4292_v17 = vadd.f32 %v12294_v16, %v12293_v26  ;;  %v4886_v28 = vadd.f32 %v11273_v56, %v4600_v18  ;;  %v4296_v48 = vadd.f32 %v12297_v8, %v12296_v1  ;;  %v12310_v26 = vld [vmem:[#allocation36_spill] sm:$0xff] }
 0x537   : > { %v8036_v15 = vpop.eup %8035  ;;  %v5211_v6 = vadd.f32 %v11281_v0, %v5167_v30  ;;  %v5168_v47 = vadd.f32 %v5097_v5, %v4882_v50  ;;  %7310 = vmatprep.mubr.msk.f32.mxu1 %vm3231_vm6, %v8034_v3  ;;  %v4887_v56 = vadd.f32 %v11288_v46, %v4601_v39  ;;  %v12299_v3 = vld [vmem:[#allocation68_spill] sm:$0xff]  ;;  %v4888_v31 = vadd.f32 %v11300_v62, %v4602_v2 }
 0x538   : > { %v5099_v29 = vpop.f32.mrf.mxu0  ;;  %5402 = vmatmul.mubr.f32.gmra.mxu1 %v8036_v15  ;;  %v4603_v30 = vadd.f32 %v12298_v9, %v4292_v17  ;;  %v4298_v49 = vadd.f32 %v12300_v13, %v12299_v3  ;;  %v12312_v2 = vld [vmem:[#allocation24_spill] sm:$0xff] }
 0x539   : > { %8049 = vtanh.f32 %v5211_v6  ;;  %v5169_v44 = vadd.f32 %v5099_v29, %v4883_v43  ;;  %v5212_v41 = vadd.f32 %v11277_v60, %v5168_v47  ;;  %v12302_v6 = vld [vmem:[#allocation71_spill] sm:$0xff]  ;;  %v12303_v47 = vld [vmem:[#allocation18_spill] sm:$0xff]  ;;  %v11388_v43 = vpop.f32.mrf.mxu1 }
 0x53a   : > { %v8038_v34 = vpop.eup %8037  ;;  %8051 = vtanh.f32 %v5210_v51  ;;  %v5103_v21 = vpop.f32.mrf.mxu0  ;;  %v12301_v51 = vld [vmem:[#allocation35_spill] sm:$0xff]  ;;  %v4302_v36 = vadd.f32 %v12303_v47, %v12302_v6  ;;  %v4605_v29 = vadd.f32 %v12304_v57, %v4298_v49  ;;  %v4889_v62 = vadd.f32 %v11312_v25, %v4603_v30 }
 0x53b   : > { %v8040_v45 = vpop.eup %8039  ;;  %v5213_v27 = vadd.f32 %v11281_v0, %v5169_v44  ;;  %v5170_v11 = vadd.f32 %v5103_v21, %v4884_v54  ;;  %7311 = vmatprep.mubr.msk.f32.mxu1 %vm3231_vm6, %v8038_v34  ;;  %v4604_v5 = vadd.f32 %v12301_v51, %v4296_v48  ;;  %v12305_v44 = vld [vmem:[#allocation25_spill] sm:$0xff]  ;;  %v12318_v51 = vld [vmem:[#allocation26_spill] sm:$0xff] }
 0x53c   : > { %v5105_v24 = vpop.f32.mrf.mxu0  ;;  %5407 = vmatmul.mubr.f32.gmra.mxu1 %v8040_v45  ;;  %v4304_v54 = vadd.f32 %v12306_v63, %v12305_v44  ;;  %v4606_v58 = vadd.f32 %v12307_v38, %v4302_v36  ;;  %v12308_v45 = vld [vmem:[#allocation73_spill] sm:$0xff]  ;;  %v4891_v35 = vadd.f32 %v11336_v52, %v4605_v29 }
 0x53d   : > { %8053 = vtanh.f32 %v5213_v27  ;;  %v5171_v19 = vadd.f32 %v5105_v24, %v4885_v12  ;;  %v5214_v10 = vadd.f32 %v11277_v60, %v5170_v11  ;;  %v4308_v39 = vadd.f32 %v12309_v14, %v12308_v45  ;;  %v4853_v27 = vpop.f32.mrf.mxu1 }
 0x53e   : > { %v8042_v22 = vpop.eup %8041  ;;  %8055 = vtanh.f32 %v5212_v41  ;;  %v5109_v42 = vpop.f32.mrf.mxu0  ;;  %v4890_v41 = vadd.f32 %v11324_v20, %v4604_v5  ;;  %v4607_v16 = vadd.f32 %v12310_v26, %v4304_v54  ;;  %v12311_v20 = vld [vmem:[#allocation72_spill] sm:$0xff]  ;;  %v4892_v48 = vadd.f32 %v11349_v33, %v4606_v58  ;;  %v12317_v33 = vld [vmem:[#allocation29_spill] sm:$0xff] }
 0x53f   : > { %v8044_v37 = vpop.eup %8043  ;;  %v5215_v32 = vadd.f32 %v11281_v0, %v5171_v19  ;;  %v5172_v50 = vadd.f32 %v5109_v42, %v4886_v28  ;;  %7312 = vmatprep.mubr.msk.f32.mxu1 %vm3231_vm6, %v8042_v22  ;;  %v4310_v19 = vadd.f32 %v12312_v2, %v12311_v20  ;;  %v12313_v22 = vld [vmem:[#allocation82_spill] sm:$0xff]  ;;  %v12314_v42 = vld [vmem:[#allocation28_spill] sm:$0xff]  ;;  %v4855_v30 = vpop.f32.mrf.mxu1  ;;  %v4316_v5 = vadd.f32 %v12318_v51, %v12317_v33 }
 0x540   : > { %v5111_v59 = vpop.f32.mrf.mxu0  ;;  %5412 = vmatmul.mubr.f32.gmra.mxu1 %v8044_v37  ;;  %v4608_v1 = vadd.f32 %v12313_v22, %v4308_v39  ;;  %v12315_v37 = vld [vmem:[#allocation69_spill] sm:$0xff]  ;;  %v12326_v39 = vld [vmem:[#allocation31_spill] sm:$0xff] }
 0x541   : > { %8057 = vtanh.f32 %v5215_v32  ;;  %v5173_v15 = vadd.f32 %v5111_v59, %v4887_v56  ;;  %v5216_v46 = vadd.f32 %v11277_v60, %v5172_v50  ;;  %v4314_v9 = vadd.f32 %v12315_v37, %v12314_v42  ;;  %v12316_v56 = vld [vmem:[#allocation85_spill] sm:$0xff]  ;;  %v4859_v57 = vpop.f32.mrf.mxu1 }
 0x542   : > { %v8046_v61 = vpop.eup %8045  ;;  %8059 = vtanh.f32 %v5214_v10  ;;  %v5115_v4 = vpop.f32.mrf.mxu0  ;;  %v4609_v3 = vadd.f32 %v12316_v56, %v4310_v19  ;;  %v4893_v59 = vadd.f32 %v11362_v7, %v4607_v16  ;;  %v4894_v47 = vadd.f32 %v11375_v23, %v4608_v1  ;;  %v12323_v23 = vld [vmem:[#allocation77_spill] sm:$0xff]  ;;  %v12329_v19 = vld [vmem:[#allocation76_spill] sm:$0xff]  ;;  %v12331_v1 = vld [vmem:[#allocation86_spill] sm:$0xff] }
 0x543   : > { %v8048_v40 = vpop.eup %8047  ;;  %v5217_v55 = vadd.f32 %v11281_v0, %v5173_v15  ;;  %v5174_v18 = vadd.f32 %v5115_v4, %v4888_v31  ;;  %7313 = vmatprep.mubr.msk.f32.mxu1 %vm3231_vm6, %v8046_v61  ;;  %v12319_v31 = vld [vmem:[#allocation39_spill] sm:$0xff] }
 0x544   : > { %v5117_v34 = vpop.f32.mrf.mxu0  ;;  %5417 = vmatmul.mubr.f32.gmra.mxu1 %v8048_v40  ;;  %v4610_v61 = vadd.f32 %v12319_v31, %v4314_v9  ;;  %v12321_v4 = vld [vmem:[#allocation27_spill] sm:$0xff]  ;;  %v4895_v54 = vadd.f32 %v11388_v43, %v4609_v3 }
 0x545   : > { %8061 = vtanh.f32 %v5217_v55  ;;  %v5175_v53 = vadd.f32 %v5117_v34, %v4889_v62  ;;  %v5218_v11 = vadd.f32 %v11277_v60, %v5174_v18  ;;  %v12322_v18 = vld [vmem:[#allocation84_spill] sm:$0xff]  ;;  %v12324_v34 = vld [vmem:[#allocation75_spill] sm:$0xff] }
 0x546   : > { %v8050_v21 = vpop.eup %8049  ;;  %8063 = vtanh.f32 %v5216_v46  ;;  %v5121_v25 = vpop.f32.mrf.mxu0  ;;  %v12320_v46 = vld [vmem:[#allocation105_spill] sm:$0xff]  ;;  %v4611_v62 = vadd.f32 %v12322_v18, %v4316_v5  ;;  %v4322_v38 = vadd.f32 %v12324_v34, %v12323_v23  ;;  %v4896_v45 = vadd.f32 %v4853_v27, %v4610_v61  ;;  %v12330_v27 = vld [vmem:[#allocation30_spill] sm:$0xff] }
 0x547   : > { %v8052_v12 = vpop.eup %8051  ;;  %v5219_v17 = vadd.f32 %v11281_v0, %v5175_v53  ;;  %v5176_v24 = vadd.f32 %v5121_v25, %v4890_v41  ;;  %7314 = vmatprep.mubr.msk.f32.mxu1 %vm3231_vm6, %v8050_v21  ;;  %v4320_v40 = vadd.f32 %v12321_v4, %v12320_v46  ;;  %v12325_v53 = vld [vmem:[#allocation40_spill] sm:$0xff]  ;;  %v12333_v23 = vmov 0.0  }
 0x548   : > { %v5123_v28 = vpop.f32.mrf.mxu0  ;;  %5422 = vmatmul.mubr.f32.gmra.mxu1 %v8052_v12  ;;  %v4861_v12 = vpop.f32.mrf.mxu1  ;;  %v4897_v2 = vadd.f32 %v4855_v30, %v4611_v62  ;;  %7635 = vmatprep.mubr.msk.f32.mxu0 %vm8192_vm8, %v12333_v23 }
 0x549   : > { %8065 = vtanh.f32 %v5219_v17  ;;  %v5177_v8 = vadd.f32 %v5123_v28, %v4891_v35  ;;  %v5220_v32 = vadd.f32 %v11277_v60, %v5176_v24  ;;  %v4612_v41 = vadd.f32 %v12325_v53, %v4320_v40  ;;  %v12328_v17 = vld [vmem:[#allocation41_spill] sm:$0xff] }
 0x54a   : > { %v8054_v10 = vpop.eup %8053  ;;  %8067 = vtanh.f32 %v5218_v11  ;;  %v5127_v52 = vpop.f32.mrf.mxu0  ;;  %v12327_v11 = vld [vmem:[#allocation74_spill] sm:$0xff]  ;;  %v4613_v24 = vadd.f32 %v12328_v17, %v4322_v38  ;;  %v4328_v28 = vadd.f32 %v12330_v27, %v12329_v19  ;;  %v11461_v53 = vld [vmem:[%s11984_s8] sm:$0xff] }
 0x54b   : > { %v8056_v50 = vpop.eup %8055  ;;  %v5221_v13 = vadd.f32 %v11281_v0, %v5177_v8  ;;  %v5178_v49 = vadd.f32 %v5127_v52, %v4892_v48  ;;  %7315 = vmatprep.mubr.msk.f32.mxu1 %vm3231_vm6, %v8054_v10  ;;  %v4326_v25 = vadd.f32 %v12327_v11, %v12326_v39  ;;  %v4898_v10 = vadd.f32 %v4859_v57, %v4612_v41  ;;  %v4865_v37 = vpop.f32.mrf.mxu1 }
 0x54c   : > { %v5129_v15 = vpop.f32.mrf.mxu0  ;;  %5427 = vmatmul.mubr.f32.gmra.mxu1 %v8056_v50  ;;  %v12332_v50 = vld [vmem:[#allocation89_spill] sm:$0xff] }
 0x54d   : > { %8069 = vtanh.f32 %v5221_v13  ;;  %v5179_v6 = vadd.f32 %v5129_v15, %v4893_v59  ;;  %v5222_v29 = vadd.f32 %v11277_v60, %v5178_v49  ;;  %v4614_v8 = vadd.f32 %v12331_v1, %v4326_v25  ;;  %v4867_v5 = vpop.f32.mrf.mxu1 }
 0x54e   : > { %v8058_v36 = vpop.eup %8057  ;;  %8071 = vtanh.f32 %v5220_v32  ;;  %v5133_v7 = vpop.f32.mrf.mxu0  ;;  %v4615_v56 = vadd.f32 %v12332_v50, %v4328_v28  ;;  %v4899_v13 = vadd.f32 %v4861_v12, %v4613_v24 }
 0x54f   : > { %v8060_v55 = vpop.eup %8059  ;;  %v5223_v44 = vadd.f32 %v11281_v0, %v5179_v6  ;;  %v5180_v63 = vadd.f32 %v5133_v7, %v4894_v47  ;;  %7316 = vmatprep.mubr.msk.f32.mxu1 %vm3231_vm6, %v8058_v36  ;;  %v4900_v33 = vadd.f32 %v4865_v37, %v4614_v8  ;;  %v7342_v37 = vld [vmem:[%s11985_s9 + $0x98] sm:$0xff] }
 0x550   : > { %v5135_v58 = vpop.f32.mrf.mxu0  ;;  %5432 = vmatmul.mubr.f32.gmra.mxu1 %v8060_v55  ;;  %v4901_v36 = vadd.f32 %v4867_v5, %v4615_v56  ;;  %v6050_v5 = vld [vmem:[%s11985_s9 + $0x40] sm:$0xff] }
 0x551   : > { %8073 = vtanh.f32 %v5223_v44  ;;  %v5181_v21 = vadd.f32 %v5135_v58, %v4895_v54  ;;  %v5224_v26 = vadd.f32 %v11277_v60, %v5180_v63 }
 0x552   : > { %v8062_v14 = vpop.eup %8061  ;;  %8075 = vtanh.f32 %v5222_v29  ;;  %v5139_v16 = vpop.f32.mrf.mxu0 }
 0x553   : > { %v8064_v43 = vpop.eup %8063  ;;  %v5225_v35 = vadd.f32 %v11281_v0, %v5181_v21  ;;  %v5182_v20 = vadd.f32 %v5139_v16, %v4896_v45  ;;  %7317 = vmatprep.mubr.msk.f32.mxu1 %vm3231_vm6, %v8062_v14 }
 0x554   : > { %v5141_v22 = vpop.f32.mrf.mxu0  ;;  %5437 = vmatmul.mubr.f32.gmra.mxu1 %v8064_v43 }
 0x555   : > { %8077 = vtanh.f32 %v5225_v35  ;;  %v5183_v48 = vadd.f32 %v5141_v22, %v4897_v2  ;;  %v5226_v9 = vadd.f32 %v11277_v60, %v5182_v20 }
 0x556   : > { %v8066_v42 = vpop.eup %8065  ;;  %8079 = vtanh.f32 %v5224_v26  ;;  %v5145_v32 = vpop.f32.mrf.mxu0 }
 0x557   : > { %v8068_v52 = vpop.eup %8067  ;;  %v5227_v30 = vadd.f32 %v11281_v0, %v5183_v48  ;;  %v5184_v3 = vadd.f32 %v5145_v32, %v4898_v10  ;;  %7318 = vmatprep.mubr.msk.f32.mxu1 %vm3231_vm6, %v8066_v42  ;;  %v7341_v32 = vld [vmem:[%s11985_s9 + $0x90] sm:$0xff] }
 0x558   : > { %v5147_v49 = vpop.f32.mrf.mxu0  ;;  %5442 = vmatmul.mubr.f32.gmra.mxu1 %v8068_v52 }
 0x559   : > { %8081 = vtanh.f32 %v5227_v30  ;;  %v5185_v59 = vadd.f32 %v5147_v49, %v4899_v13  ;;  %v5228_v15 = vadd.f32 %v11277_v60, %v5184_v3  ;;  %v7340_v30 = vld [vmem:[%s11985_s9 + $0x88] sm:$0xff]  ;;  %v7339_v3 = vld [vmem:[%s11985_s9 + $0x80] sm:$0xff]  ;;  %v7338_v13 = vld [vmem:[%s11985_s9 + $0x78] sm:$0xff] }
 0x55a   : > { %v8070_v51 = vpop.eup %8069  ;;  %8083 = vtanh.f32 %v5226_v9  ;;  %v5151_v31 = vpop.f32.mrf.mxu0  ;;  %v7337_v49 = vld [vmem:[%s11985_s9 + $0x70] sm:$0xff] }
 0x55b   : > { %v8072_v61 = vpop.eup %8071  ;;  %v5229_v6 = vadd.f32 %v11281_v0, %v5185_v59  ;;  %v5186_v47 = vadd.f32 %v5151_v31, %v4900_v33  ;;  %7319 = vmatprep.mubr.msk.f32.mxu1 %vm3231_vm6, %v8070_v51  ;;  %v6051_v59 = vld [vmem:[%s11985_s9 + $0x48] sm:$0xff]  ;;  %v7335_v51 = vld [vmem:[%s11985_s9 + $0x60] sm:$0xff]  ;;  %v6048_v31 = vld [vmem:[%s11985_s9 + $0x30] sm:$0xff] }
 0x55c   : > { %v5153_v46 = vpop.f32.mrf.mxu0  ;;  %5447 = vmatmul.mubr.f32.gmra.mxu1 %v8072_v61  ;;  %v7336_v33 = vld [vmem:[%s11985_s9 + $0x68] sm:$0xff] }
 0x55d   : > { %8085 = vtanh.f32 %v5229_v6  ;;  %v5187_v4 = vadd.f32 %v5153_v46, %v4901_v36  ;;  %v5230_v57 = vadd.f32 %v11277_v60, %v5186_v47  ;;  %v6047_v61 = vld [vmem:[%s11985_s9 + $0x28] sm:$0xff]  ;;  %v6046_v6 = vld [vmem:[%s11985_s9 + $0x20] sm:$0xff]  ;;  %v6045_v47 = vld [vmem:[%s11985_s9 + $0x18] sm:$0xff] }
 0x55e   : > { %v8074_v40 = vpop.eup %8073  ;;  %8087 = vtanh.f32 %v5228_v15  ;;  %v6049_v15 = vld [vmem:[%s11985_s9 + $0x38] sm:$0xff]  ;;  %v6044_v36 = vld [vmem:[%s11985_s9 + $0x10] sm:$0xff] }
 0x55f   : > { %v8076_v29 = vpop.eup %8075  ;;  %v5231_v7 = vadd.f32 %v11281_v0, %v5187_v4  ;;  %7320 = vmatprep.mubr.msk.f32.mxu1 %vm3231_vm6, %v8074_v40  ;;  %v7334_v46 = vld [vmem:[%s11985_s9 + $0x58] sm:$0xff]  ;;  %v6043_v4 = vld [vmem:[%s11985_s9 + $0x8] sm:$0xff]  ;;  %v7333_v40 = vld [vmem:[%s11985_s9 + $0x50] sm:$0xff] }
 0x560   : > { %5452 = vmatmul.mubr.f32.gmra.mxu1 %v8076_v29 }
 0x561   : > { %8089 = vtanh.f32 %v5231_v7 }
 0x562   : > { %v8078_v55 = vpop.eup %8077  ;;  %8091 = vtanh.f32 %v5230_v57  ;;  %v6042_v57 = vld [vmem:[%s11985_s9] sm:$0xff] }
 0x563   : > { %v8080_v18 = vpop.eup %8079  ;;  %7321 = vmatprep.mubr.msk.f32.mxu1 %vm3231_vm6, %v8078_v55 }
 0x564   : > { %5457 = vmatmul.mubr.f32.gmra.mxu1 %v8080_v18 }
 0x566   : > { %v8082_v62 = vpop.eup %8081 }
 0x567   : > { %v8084_v44 = vpop.eup %8083  ;;  %7322 = vmatprep.mubr.msk.f32.mxu1 %vm3231_vm6, %v8082_v62 }
 0x568   : > { %5462 = vmatmul.mubr.f32.gmra.mxu1 %v8084_v44 }
 0x56a   : > { %v8086_v63 = vpop.eup %8085 }
 0x56b   : > { %v8088_v60 = vpop.eup %8087  ;;  %7323 = vmatprep.mubr.msk.f32.mxu1 %vm3231_vm6, %v8086_v63 }
 0x56c   : > { %5467 = vmatmul.mubr.f32.gmra.mxu1 %v8088_v60 }
 0x56e   : > { %v8090_v0 = vpop.eup %8089 }
 0x56f   : > { %v8092_v54 = vpop.eup %8091  ;;  %7324 = vmatprep.mubr.msk.f32.mxu1 %vm3231_vm6, %v8090_v0 }
 0x570   : > { %5472 = vmatmul.mubr.f32.gmra.mxu1 %v8092_v54 }
 0x571   : > { %7642 = vmatprep.mubr.msk.f32.mxu1 %vm8192_vm8, %v12333_v23 }
 0x5f4   : > { %v5398_v34 = vpop.f32.mrf.mxu1 }
 0x5f6   : > { %v5400_v38 = vpop.f32.mrf.mxu1 }
 0x5f8   : > { %v5403_v58 = vpop.f32.mrf.mxu1 }
 0x5f9   : > { %7632 = vmatpush3.msra.mxu0 %v5403_v58 }
 0x5fa   : > { %v5405_v41 = vpop.f32.mrf.mxu1  ;;  %7633 = vmatprep.subr.mxu0 %v12333_v23 }
 0x5fb   : > { %7634 = vmatpush3.msra.mxu0 %v5398_v34 }
 0x5fc   : > { %v5408_v21 = vpop.f32.mrf.mxu1  ;;  %7645 = vmatprep.subr.mxu0 %v12333_v23  ;;  %7636 = vmatmul.mubr.msk.f32.vlgmr.msra.gmra.mxu0 %vm5478_vm9, %v11461_v53 }
 0x5fd   : > { %7649 = vmatprep.mubr.msk.f32.mxu0 %vm8192_vm8, %v12333_v23 }
 0x5fe   : > { %v5410_v45 = vpop.f32.mrf.mxu1 }
 0x600   : > { %v5413_v14 = vpop.f32.mrf.mxu1 }
 0x601   : > { %7639 = vmatpush3.msra.mxu1 %v5413_v14 }
 0x602   : > { %v5415_v39 = vpop.f32.mrf.mxu1  ;;  %7640 = vmatprep.subr.mxu1 %v12333_v23 }
 0x603   : > { %7641 = vmatpush3.msra.mxu1 %v5408_v21 }
 0x604   : > { %v5418_v11 = vpop.f32.mrf.mxu1  ;;  %7652 = vmatprep.subr.mxu1 %v12333_v23  ;;  %7643 = vmatmul.mubr.msk.f32.vlgmr.msra.gmra.mxu1 %vm5478_vm9, %v11461_v53 }
 0x605   : > { %7656 = vmatprep.mubr.msk.f32.mxu1 %vm8192_vm8, %v12333_v23 }
 0x606   : > { %v5420_v25 = vpop.f32.mrf.mxu1 }
 0x608   : > { %v5423_v12 = vpop.f32.mrf.mxu1 }
 0x609   : > { %7646 = vmatpush3.msra.mxu0 %v5423_v12 }
 0x60a   : > { %v5425_v26 = vpop.f32.mrf.mxu1  ;;  %7647 = vmatprep.subr.mxu0 %v12333_v23 }
 0x60b   : > { %7648 = vmatpush3.msra.mxu0 %v5418_v11 }
 0x60c   : > { %v5428_v16 = vpop.f32.mrf.mxu1  ;;  %7659 = vmatprep.subr.mxu0 %v12333_v23  ;;  %7650 = vmatmul.mubr.msk.f32.vlgmr.msra.gmra.mxu0 %vm5478_vm9, %v11461_v53 }
 0x60d   : > { %7663 = vmatprep.mubr.msk.f32.mxu0 %vm8192_vm8, %v12333_v23 }
 0x60e   : > { %v5430_v43 = vpop.f32.mrf.mxu1 }
 0x610   : > { %v5433_v17 = vpop.f32.mrf.mxu1 }
 0x611   : > { %7653 = vmatpush3.msra.mxu1 %v5433_v17 }
 0x612   : > { %v5435_v24 = vpop.f32.mrf.mxu1  ;;  %7654 = vmatprep.subr.mxu1 %v12333_v23 }
 0x613   : > { %7655 = vmatpush3.msra.mxu1 %v5428_v16 }
 0x614   : > { %v5438_v35 = vpop.f32.mrf.mxu1  ;;  %7666 = vmatprep.subr.mxu1 %v12333_v23  ;;  %7657 = vmatmul.mubr.msk.f32.vlgmr.msra.gmra.mxu1 %vm5478_vm9, %v11461_v53 }
 0x615   : > { %7670 = vmatprep.mubr.msk.f32.mxu1 %vm8192_vm8, %v12333_v23 }
 0x616   : > { %v5440_v20 = vpop.f32.mrf.mxu1 }
 0x618   : > { %v5443_v2 = vpop.f32.mrf.mxu1 }
 0x619   : > { %7660 = vmatpush3.msra.mxu0 %v5443_v2 }
 0x61a   : > { %v5445_v19 = vpop.f32.mrf.mxu1  ;;  %7661 = vmatprep.subr.mxu0 %v12333_v23 }
 0x61b   : > { %7662 = vmatpush3.msra.mxu0 %v5438_v35 }
 0x61c   : > { %v5448_v27 = vpop.f32.mrf.mxu1  ;;  %7673 = vmatprep.subr.mxu0 %v12333_v23  ;;  %7664 = vmatmul.mubr.msk.f32.vlgmr.msra.gmra.mxu0 %vm5478_vm9, %v11461_v53 }
 0x61d   : > { %7677 = vmatprep.mubr.msk.f32.mxu0 %vm8192_vm8, %v12333_v23 }
 0x61e   : > { %v5450_v28 = vpop.f32.mrf.mxu1 }
 0x620   : > { %v5453_v22 = vpop.f32.mrf.mxu1 }
 0x621   : > { %7667 = vmatpush3.msra.mxu1 %v5453_v22 }
 0x622   : > { %v5455_v1 = vpop.f32.mrf.mxu1  ;;  %7668 = vmatprep.subr.mxu1 %v12333_v23 }
 0x623   : > { %7669 = vmatpush3.msra.mxu1 %v5448_v27 }
 0x624   : > { %v5458_v8 = vpop.f32.mrf.mxu1  ;;  %7680 = vmatprep.subr.mxu1 %v12333_v23  ;;  %7671 = vmatmul.mubr.msk.f32.vlgmr.msra.gmra.mxu1 %vm5478_vm9, %v11461_v53 }
 0x625   : > { %7684 = vmatprep.mubr.msk.f32.mxu1 %vm8192_vm8, %v12333_v23 }
 0x626   : > { %v5460_v48 = vpop.f32.mrf.mxu1 }
 0x628   : > { %v5463_v10 = vpop.f32.mrf.mxu1 }
 0x629   : > { %7674 = vmatpush3.msra.mxu0 %v5463_v10 }
 0x62a   : > { %v5465_v42 = vpop.f32.mrf.mxu1  ;;  %7675 = vmatprep.subr.mxu0 %v12333_v23 }
 0x62b   : > { %7676 = vmatpush3.msra.mxu0 %v5458_v8 }
 0x62c   : > { %v5468_v9 = vpop.f32.mrf.mxu1  ;;  %7678 = vmatmul.mubr.msk.f32.vlgmr.msra.gmra.mxu0 %vm5478_vm9, %v11461_v53  ;;  %7687 = vmatprep.subr.mxu0 %v12333_v23 }
 0x62d   : > { %7688 = vmatpush3.msra.mxu0 %v7342_v37  ;;  %7707 = vmatprep.mubr.msk.f32.mxu0 %vm8192_vm8, %v12333_v23 }
 0x62e   : > { %v5470_v52 = vpop.f32.mrf.mxu1  ;;  %7689 = vmatprep.subr.mxu0 %v12333_v23 }
 0x62f   : > { %7690 = vmatpush3.msra.mxu0 %v7341_v32 }
 0x630   : > { %v5473_v50 = vpop.f32.mrf.mxu1  ;;  %7691 = vmatprep.subr.mxu0 %v12333_v23 }
 0x631   : > { %7681 = vmatpush3.msra.mxu1 %v5473_v50  ;;  %7692 = vmatpush3.msra.mxu0 %v7340_v30 }
 0x632   : > { %v5475_v56 = vpop.f32.mrf.mxu1  ;;  %7682 = vmatprep.subr.mxu1 %v12333_v23  ;;  %7693 = vmatprep.subr.mxu0 %v12333_v23 }
 0x633   : > { %7683 = vmatpush3.msra.mxu1 %v5468_v9  ;;  %7694 = vmatpush3.msra.mxu0 %v7339_v3 }
 0x634   : > { %7685 = vmatmul.mubr.msk.f32.vlgmr.msra.gmra.mxu1 %vm5478_vm9, %v11461_v53  ;;  %7710 = vmatprep.subr.mxu1 %v12333_v23 }
 0x635   : > { %7730 = vmatprep.mubr.msk.f32.mxu1 %vm8192_vm8, %v12333_v23  ;;  %7695 = vmatprep.subr.mxu0 %v12333_v23 }
 0x636   : > { %7696 = vmatpush3.msra.mxu0 %v7338_v13  ;;  %7711 = vmatpush3.msra.mxu1 %v6051_v59 }
 0x637   : > { %7697 = vmatprep.subr.mxu0 %v12333_v23  ;;  %7712 = vmatprep.subr.mxu1 %v12333_v23 }
 0x638   : > { %7698 = vmatpush3.msra.mxu0 %v7337_v49  ;;  %7713 = vmatpush3.msra.mxu1 %v6050_v5  ;;  %v7365_v5 = vld [vmem:[%s11985_s9 + $0x138] sm:$0xff] }
 0x639   : > { %7699 = vmatprep.subr.mxu0 %v12333_v23  ;;  %7714 = vmatprep.subr.mxu1 %v12333_v23 }
 0x63a   : > { %7700 = vmatpush3.msra.mxu0 %v7336_v33  ;;  %7715 = vmatpush3.msra.mxu1 %v6049_v15  ;;  %v7354_v33 = vld [vmem:[%s11985_s9 + $0xe8] sm:$0xff] }
 0x63b   : > { %7701 = vmatprep.subr.mxu0 %v12333_v23  ;;  %7716 = vmatprep.subr.mxu1 %v12333_v23 }
 0x63c   : > { %7702 = vmatpush3.msra.mxu0 %v7335_v51  ;;  %7717 = vmatpush3.msra.mxu1 %v6048_v31 }
 0x63d   : > { %7703 = vmatprep.subr.mxu0 %v12333_v23  ;;  %7718 = vmatprep.subr.mxu1 %v12333_v23 }
 0x63e   : > { %7719 = vmatpush3.msra.mxu1 %v6047_v61  ;;  %7704 = vmatpush3.msra.mxu0 %v7334_v46  ;;  %v7364_v46 = vld [vmem:[%s11985_s9 + $0x130] sm:$0xff] }
 0x63f   : > { %7720 = vmatprep.subr.mxu1 %v12333_v23  ;;  %7705 = vmatprep.subr.mxu0 %v12333_v23 }
 0x640   : > { %7721 = vmatpush3.msra.mxu1 %v6046_v6  ;;  %7706 = vmatpush3.msra.mxu0 %v7333_v40 }
 0x641   : > { %7722 = vmatprep.subr.mxu1 %v12333_v23  ;;  %7733 = vmatprep.subr.mxu0 %v12333_v23 }
 0x642   : > { %7723 = vmatpush3.msra.mxu1 %v6045_v47 }
 0x643   : > { %7724 = vmatprep.subr.mxu1 %v12333_v23 }
 0x644   : > { %7725 = vmatpush3.msra.mxu1 %v6044_v36  ;;  %v7353_v36 = vld [vmem:[%s11985_s9 + $0xe0] sm:$0xff] }
 0x645   : > { %7726 = vmatprep.subr.mxu1 %v12333_v23 }
 0x646   : > { %7727 = vmatpush3.msra.mxu1 %v6043_v4  ;;  %v7352_v4 = vld [vmem:[%s11985_s9 + $0xd8] sm:$0xff] }
 0x647   : > { %7728 = vmatprep.subr.mxu1 %v12333_v23 }
 0x648   : > { %7729 = vmatpush3.msra.mxu1 %v6042_v57  ;;  %v7363_v57 = vld [vmem:[%s11985_s9 + $0x128] sm:$0xff] }
 0x649   : > { %7756 = vmatprep.subr.mxu1 %v12333_v23 }
 0x6bc   : > { %v11591_v29 = vpop.f32.mrf.mxu0 }
 0x6bd   : > { %v6360_v55 = vrot.slane %v11591_v29, 3  ;;  %v6458_v18 = vrot.slane %v11591_v29, 4  ;;  %v6071_v25 = vrot.slane %v11591_v29, 1  ;;  %v6262_v31 = vrot.slane %v11591_v29, 2 }
 0x6be   : > { %v7637_v7 = vpop.f32.mrf.mxu0 }
 0x6c4   : > { %v11595_v62 = vpop.f32.mrf.mxu1 }
 0x6c5   : > { %v6361_v44 = vrot.slane %v11595_v62, 2  ;;  %v6459_v63 = vrot.slane %v11595_v62, 3  ;;  %v6165_v26 = vrot.slane %v11595_v62, 7  ;;  %v6073_v17 = vsel %vm6072_vm10, %v11595_v62, %v6071_v25 }
 0x6c6   : > { %v7644_v60 = vpop.f32.mrf.mxu1  ;;  %v6263_v61 = vrot.slane %v11595_v62, 1 }
 0x6c7   : > { %v11600_v0 = vsel %vm6072_vm10, %v6361_v44, %v6360_v55  ;;  %v6460_v54 = vsel %vm6072_vm10, %v6459_v63, %v6458_v18  ;;  %v6166_v35 = vsel %vm6072_vm10, %v6165_v26, %v11591_v29  ;;  %v7351_v29 = vld [vmem:[%s11985_s9 + $0xd0] sm:$0xff]  ;;  %v7362_v18 = vld [vmem:[%s11985_s9 + $0x120] sm:$0xff]  ;;  %v7350_v44 = vld [vmem:[%s11985_s9 + $0xc8] sm:$0xff] }
 0x6c8   : > { %v6264_v40 = vsel %vm6072_vm10, %v6263_v61, %v6262_v31  ;;  %v7361_v63 = vld [vmem:[%s11985_s9 + $0x118] sm:$0xff]  ;;  %v7347_v26 = vld [vmem:[%s11985_s9 + $0xb0] sm:$0xff]  ;;  %v6566_v61 = vld [vmem:[%s11987_s11 + $0x60] sm:$0xff] }
 0x6cc   : > { %v11603_v34 = vpop.f32.mrf.mxu0 }
 0x6cd   : > { %v6461_v38 = vrot.slane %v11603_v34, 2  ;;  %v6074_v16 = vrot.slane %v11603_v34, 7  ;;  %v6167_v24 = vrot.slane %v11603_v34, 6  ;;  %v6363_v7 = vrot.slane %v11603_v34, 1 }
 0x6ce   : > { %v7651_v58 = vpop.f32.mrf.mxu0  ;;  %v6265_v62 = vsel %vm6075_vm11, %v11603_v34, %v6264_v40  ;;  %v6560_v40 = vld [vmem:[%s11987_s11 + $0x30] sm:$0xff] }
 0x6cf   : > { %v6462_v53 = vsel %vm6075_vm11, %v6461_v38, %v6460_v54  ;;  %v6076_v2 = vsel %vm6075_vm11, %v6074_v16, %v6073_v17  ;;  %v6168_v27 = vsel %vm6075_vm11, %v6167_v24, %v6166_v35  ;;  %v7349_v54 = vld [vmem:[%s11985_s9 + $0xc0] sm:$0xff]  ;;  %v6364_v38 = vsel %vm6075_vm11, %v6363_v7, %v11600_v0  ;;  %v7360_v58 = vld [vmem:[%s11985_s9 + $0x110] sm:$0xff]  ;;  %v7359_v0 = vld [vmem:[%s11985_s9 + $0x108] sm:$0xff] }
 0x6d0   : > { %v7358_v16 = vld [vmem:[%s11985_s9 + $0x100] sm:$0xff]  ;;  %v7346_v17 = vld [vmem:[%s11985_s9 + $0xa8] sm:$0xff]  ;;  %v6557_v7 = vld [vmem:[%s11987_s11 + $0x18] sm:$0xff] }
 0x6d4   : > { %v11607_v41 = vpop.f32.mrf.mxu1 }
 0x6d5   : > { %v6463_v21 = vrot.slane %v11607_v41, 1  ;;  %v6077_v20 = vrot.slane %v11607_v41, 6  ;;  %v6169_v19 = vrot.slane %v11607_v41, 5  ;;  %v6266_v55 = vrot.slane %v11607_v41, 7 }
 0x6d6   : > { %v7658_v45 = vpop.f32.mrf.mxu1 }
 0x6d7   : > { %v11611_v14 = vsel %vm6078_vm12, %v6463_v21, %v6462_v53  ;;  %v6079_v1 = vsel %vm6078_vm12, %v6077_v20, %v6076_v2  ;;  %v6170_v10 = vsel %vm6078_vm12, %v6169_v19, %v6168_v27  ;;  %v6267_v34 = vsel %vm6078_vm12, %v6266_v55, %v6265_v62  ;;  %v7348_v53 = vld [vmem:[%s11985_s9 + $0xb8] sm:$0xff]  ;;  %v7345_v19 = vld [vmem:[%s11985_s9 + $0xa0] sm:$0xff]  ;;  %v6556_v55 = vld [vmem:[%s11987_s11 + $0x10] sm:$0xff] }
 0x6d8   : > { %v7357_v2 = vld [vmem:[%s11985_s9 + $0xf8] sm:$0xff]  ;;  %v6554_v62 = vld [vmem:[%s11987_s11] sm:$0xff] }
 0x6dc   : > { %v11613_v39 = vpop.f32.mrf.mxu0 }
 0x6dd   : > { %v6080_v28 = vrot.slane %v11613_v39, 5  ;;  %v6171_v8 = vrot.slane %v11613_v39, 4  ;;  %v6268_v60 = vrot.slane %v11613_v39, 6  ;;  %v6366_v21 = vrot.slane %v11613_v39, 7 }
 0x6de   : > { %v7665_v11 = vpop.f32.mrf.mxu0 }
 0x6df   : > { %v6082_v37 = vsel %vm6081_vm13, %v6080_v28, %v6079_v1  ;;  %v6172_v32 = vsel %vm6081_vm13, %v6171_v8, %v6170_v10  ;;  %v6365_v11 = vsel %vm6078_vm12, %v11607_v41, %v6364_v38  ;;  %v6269_v25 = vsel %vm6081_vm13, %v6268_v60, %v6267_v34  ;;  %v7376_v8 = vld [vmem:[%s11985_s9 + $0x188] sm:$0xff] }
 0x6e0   : > { %v6367_v24 = vsel %vm6081_vm13, %v6366_v21, %v6365_v11 }
 0x6e4   : > { %v11616_v12 = vpop.f32.mrf.mxu1 }
 0x6e5   : > { %v6083_v42 = vrot.slane %v11616_v12, 4  ;;  %v6173_v9 = vrot.slane %v11616_v12, 3  ;;  %v6270_v45 = vrot.slane %v11616_v12, 5 }
 0x6e6   : > { %v7672_v43 = vpop.f32.mrf.mxu1 }
 0x6e7   : > { %v6085_v56 = vsel %vm6084_vm14, %v6083_v42, %v6082_v37  ;;  %v6174_v49 = vsel %vm6084_vm14, %v6173_v9, %v6172_v32  ;;  %v6368_v43 = vrot.slane %v11616_v12, 6  ;;  %v6271_v20 = vsel %vm6084_vm14, %v6270_v45, %v6269_v25  ;;  %v7375_v37 = vld [vmem:[%s11985_s9 + $0x180] sm:$0xff]  ;;  %v7374_v32 = vld [vmem:[%s11985_s9 + $0x178] sm:$0xff] }
 0x6e9   : > { %v6369_v10 = vsel %vm6084_vm14, %v6368_v43, %v6367_v24 }
 0x6ec   : > { %v11630_v22 = vpop.f32.mrf.mxu0 }
 0x6ed   : > { %v6086_v52 = vrot.slane %v11630_v22, 3  ;;  %v6175_v50 = vrot.slane %v11630_v22, 2  ;;  %v6272_v41 = vrot.slane %v11630_v22, 4  ;;  %v6370_v27 = vrot.slane %v11630_v22, 5 }
 0x6ee   : > { %v7679_v48 = vpop.f32.mrf.mxu0 }
 0x6ef   : > { %v6088_v59 = vsel %vm6087_vm15, %v6086_v52, %v6085_v56  ;;  %v6176_v51 = vsel %vm6087_vm15, %v6175_v50, %v6174_v49  ;;  %v6273_v1 = vsel %vm6087_vm15, %v6272_v41, %v6271_v20  ;;  %v7356_v48 = vld [vmem:[%s11985_s9 + $0xf0] sm:$0xff]  ;;  %v6371_v9 = vsel %vm6087_vm15, %v6370_v27, %v6369_v10  ;;  %v7370_v49 = vld [vmem:[%s11985_s9 + $0x158] sm:$0xff]  ;;  %v6655_v27 = vld [vmem:[%s11989_s13 + $0x20] sm:$0xff] }
 0x6f0   : > { %v6568_v50 = vld [vmem:[%s11987_s11 + $0x70] sm:$0xff]  ;;  %v6658_v20 = vld [vmem:[%s11989_s13 + $0x38] sm:$0xff]  ;;  %v7379_v10 = vld [vmem:[%s11988_s12] ss:$0 sm:$0xff] }
 0x6f1   : > { %v7373_v56 = vld [vmem:[%s11985_s9 + $0x170] sm:$0xff] }
 0x6f4   : > { %v11642_v30 = vpop.f32.mrf.mxu1 }
 0x6f5   : > { %v6089_v3 = vrot.slane %v11642_v30, 2  ;;  %v6177_v13 = vrot.slane %v11642_v30, 1  ;;  %v6274_v35 = vrot.slane %v11642_v30, 3  ;;  %v6372_v28 = vrot.slane %v11642_v30, 4 }
 0x6f6   : > { %v7686_v15 = vpop.f32.mrf.mxu1 }
 0x6f7   : > { %v6091_v6 = vsel %vm6090_vm0, %v6089_v3, %v6088_v59  ;;  %v6178_v47 = vsel %vm6090_vm0, %v6177_v13, %v6176_v51  ;;  %v6275_v42 = vsel %vm6090_vm0, %v6274_v35, %v6273_v1  ;;  %v6373_v52 = vsel %vm6090_vm0, %v6372_v28, %v6371_v9  ;;  %v7372_v3 = vld [vmem:[%s11985_s9 + $0x168] sm:$0xff]  ;;  %v7371_v13 = vld [vmem:[%s11985_s9 + $0x160] sm:$0xff]  ;;  %v7369_v51 = vld [vmem:[%s11985_s9 + $0x150] sm:$0xff] }
 0x6f8   : > { %7708 = vmatmul.mubr.msk.f32.vlgmr.msra.gmra.mxu0 %vm6092_vm1, %v6091_v6  ;;  %7731 = vmatmul.mubr.msk.f32.vlgmr.msra.gmra.mxu1 %vm6092_vm1, %v6178_v47  ;;  %v6466_v59 = vrot.slane %v11616_v12, 7  ;;  %v7368_v12 = vld [vmem:[%s11985_s9 + $0x148] sm:$0xff]  ;;  %v6470_v15 = vrot.slane %v11642_v30, 5  ;;  %v6565_v6 = vld [vmem:[%s11987_s11 + $0x58] sm:$0xff]  ;;  %v6564_v47 = vld [vmem:[%s11987_s11 + $0x50] sm:$0xff] }
 0x6f9   : > { %7734 = vmatpush3.msra.mxu0 %v7354_v33  ;;  %7757 = vmatpush3.msra.mxu1 %v7365_v5  ;;  %v6465_v33 = vsel %vm6081_vm13, %v11613_v39, %v11611_v14  ;;  %v6468_v5 = vrot.slane %v11630_v22, 6  ;;  %v7367_v39 = vld [vmem:[%s11985_s9 + $0x140] sm:$0xff]  ;;  %v6567_v30 = vld [vmem:[%s11987_s11 + $0x68] sm:$0xff]  ;;  %v6654_v28 = vld [vmem:[%s11989_s13 + $0x18] sm:$0xff] }
 0x6fa   : > { %7735 = vmatprep.subr.mxu0 %v12333_v23  ;;  %7753 = vmatprep.mubr.msk.f32.mxu0 %vm8192_vm8, %v12333_v23  ;;  %v6467_v14 = vsel %vm6084_vm14, %v6466_v59, %v6465_v33  ;;  %v6659_v35 = vld [vmem:[%s11989_s13 + $0x40] sm:$0xff]  ;;  %v6653_v1 = vld [vmem:[%s11989_s13 + $0x10] sm:$0xff] }
 0x6fb   : > { %7736 = vmatpush3.msra.mxu0 %v7353_v36  ;;  %7758 = vmatprep.subr.mxu1 %v12333_v23  ;;  %v6469_v22 = vsel %vm6087_vm15, %v6468_v5, %v6467_v14  ;;  %v6563_v36 = vld [vmem:[%s11987_s11 + $0x48] sm:$0xff] }
 0x6fc   : > { %7737 = vmatprep.subr.mxu0 %v12333_v23  ;;  %7759 = vmatpush3.msra.mxu1 %v7364_v46  ;;  %v6471_v31 = vsel %vm6090_vm0, %v6470_v15, %v6469_v22  ;;  %v6562_v46 = vld [vmem:[%s11987_s11 + $0x40] sm:$0xff] }
 0x6fd   : > { %7738 = vmatpush3.msra.mxu0 %v7352_v4  ;;  %7760 = vmatprep.subr.mxu1 %v12333_v23  ;;  %v6561_v4 = vld [vmem:[%s11987_s11 + $0x38] sm:$0xff] }
 0x6fe   : > { %7739 = vmatprep.subr.mxu0 %v12333_v23  ;;  %7761 = vmatpush3.msra.mxu1 %v7363_v57  ;;  %v6559_v57 = vld [vmem:[%s11987_s11 + $0x28] sm:$0xff] }
 0x6ff   : > { %7740 = vmatpush3.msra.mxu0 %v7351_v29  ;;  %7762 = vmatprep.subr.mxu1 %v12333_v23  ;;  %v6558_v29 = vld [vmem:[%s11987_s11 + $0x20] sm:$0xff] }
 0x700   : > { %7741 = vmatprep.subr.mxu0 %v12333_v23  ;;  %7763 = vmatpush3.msra.mxu1 %v7362_v18  ;;  %v6555_v18 = vld [vmem:[%s11987_s11 + $0x8] sm:$0xff] }
 0x701   : > { %7742 = vmatpush3.msra.mxu0 %v7350_v44  ;;  %7764 = vmatprep.subr.mxu1 %v12333_v23  ;;  %v6661_v44 = vld [vmem:[%s11989_s13 + $0x50] sm:$0xf] }
 0x702   : > { %7743 = vmatprep.subr.mxu0 %v12333_v23  ;;  %7765 = vmatpush3.msra.mxu1 %v7361_v63  ;;  %v6660_v63 = vld [vmem:[%s11989_s13 + $0x48] sm:$0xff] }
 0x703   : > { %7744 = vmatpush3.msra.mxu0 %v7349_v54  ;;  %7766 = vmatprep.subr.mxu1 %v12333_v23 }
 0x704   : > { %7745 = vmatprep.subr.mxu0 %v12333_v23  ;;  %7767 = vmatpush3.msra.mxu1 %v7360_v58 }
 0x705   : > { %7746 = vmatpush3.msra.mxu0 %v7348_v53  ;;  %7768 = vmatprep.subr.mxu1 %v12333_v23 }
 0x706   : > { %7747 = vmatprep.subr.mxu0 %v12333_v23  ;;  %7769 = vmatpush3.msra.mxu1 %v7359_v0 }
 0x707   : > { %7748 = vmatpush3.msra.mxu0 %v7347_v26  ;;  %7770 = vmatprep.subr.mxu1 %v12333_v23 }
 0x708   : > { %7749 = vmatprep.subr.mxu0 %v12333_v23  ;;  %7771 = vmatpush3.msra.mxu1 %v7358_v16  ;;  %v7378_v16 = vld [vmem:[%s11986_s10] ss:$0 sm:$0xff] }
 0x709   : > { %7750 = vmatpush3.msra.mxu0 %v7346_v17  ;;  %7772 = vmatprep.subr.mxu1 %v12333_v23 }
 0x70a   : > { %7751 = vmatprep.subr.mxu0 %v12333_v23  ;;  %7773 = vmatpush3.msra.mxu1 %v7357_v2  ;;  %v6657_v2 = vld [vmem:[%s11989_s13 + $0x30] sm:$0xff] }
 0x70b   : > { %7752 = vmatpush3.msra.mxu0 %v7345_v19  ;;  %7774 = vmatprep.subr.mxu1 %v12333_v23  ;;  %v6656_v19 = vld [vmem:[%s11989_s13 + $0x28] sm:$0xff] }
 0x70c   : > { %7779 = vmatprep.subr.mxu0 %v12333_v23  ;;  %7754 = vmatmul.mubr.msk.f32.vlgmr.msra.gmra.mxu0 %vm6092_vm1, %v6275_v42 }
 0x70d   : > { %7780 = vmatpush3.msra.mxu0 %v7376_v8  ;;  %7775 = vmatpush3.msra.mxu1 %v7356_v48  ;;  %v6652_v8 = vld [vmem:[%s11989_s13 + $0x8] sm:$0xff]  ;;  %v6651_v48 = vld [vmem:[%s11989_s13] sm:$0xff] }
 0x70e   : > { %7781 = vmatprep.subr.mxu0 %v12333_v23  ;;  %7776 = vmatprep.mubr.msk.f32.mxu1 %vm8192_vm8, %v12333_v23 }
 0x70f   : > { %7782 = vmatpush3.msra.mxu0 %v7375_v37  ;;  %7777 = vmatmul.mubr.msk.f32.vlgmr.msra.gmra.mxu1 %vm6092_vm1, %v6373_v52  ;;  %v7381_v52 = vld [vmem:[%s11990_s14] ss:$0 sm:$0xff] }
 0x710   : > { %7783 = vmatprep.subr.mxu0 %v12333_v23  ;;  %7799 = vmatprep.mubr.msk.f32.mxu0 %vm8192_vm8, %v12333_v23 }
 0x711   : > { %7784 = vmatpush3.msra.mxu0 %v7374_v32  ;;  %7802 = vmatprep.subr.mxu1 %v12333_v23 }
 0x712   : > { %7785 = vmatprep.subr.mxu0 %v12333_v23  ;;  %7803 = vmatpush3.msra.mxu1 %v6568_v50 }
 0x713   : > { %7786 = vmatpush3.msra.mxu0 %v7373_v56  ;;  %7804 = vmatprep.subr.mxu1 %v12333_v23 }
 0x714   : > { %7787 = vmatprep.subr.mxu0 %v12333_v23  ;;  %7832 = vmatprep.mubr.msk.f32.mxu1 %vm8192_vm8, %v12333_v23 }
 0x715   : > { %7788 = vmatpush3.msra.mxu0 %v7372_v3  ;;  %7805 = vmatpush3.msra.mxu1 %v6567_v30 }
 0x716   : > { %7789 = vmatprep.subr.mxu0 %v12333_v23  ;;  %7806 = vmatprep.subr.mxu1 %v12333_v23 }
 0x717   : > { %7790 = vmatpush3.msra.mxu0 %v7371_v13  ;;  %7807 = vmatpush3.msra.mxu1 %v6566_v61 }
 0x718   : > { %7791 = vmatprep.subr.mxu0 %v12333_v23  ;;  %7808 = vmatprep.subr.mxu1 %v12333_v23 }
 0x719   : > { %7792 = vmatpush3.msra.mxu0 %v7370_v49  ;;  %7809 = vmatpush3.msra.mxu1 %v6565_v6 }
 0x71a   : > { %7793 = vmatprep.subr.mxu0 %v12333_v23  ;;  %7810 = vmatprep.subr.mxu1 %v12333_v23 }
 0x71b   : > { %7794 = vmatpush3.msra.mxu0 %v7369_v51  ;;  %7811 = vmatpush3.msra.mxu1 %v6564_v47 }
 0x71c   : > { %7795 = vmatprep.subr.mxu0 %v12333_v23  ;;  %7812 = vmatprep.subr.mxu1 %v12333_v23 }
 0x71d   : > { %7796 = vmatpush3.msra.mxu0 %v7368_v12  ;;  %7813 = vmatpush3.msra.mxu1 %v6563_v36 }
 0x71e   : > { %7797 = vmatprep.subr.mxu0 %v12333_v23  ;;  %7814 = vmatprep.subr.mxu1 %v12333_v23 }
 0x71f   : > { %7798 = vmatpush3.msra.mxu0 %v7367_v39  ;;  %7815 = vmatpush3.msra.mxu1 %v6562_v46 }
 0x720   : > { %7800 = vmatmul.mubr.msk.f32.vlgmr.msra.gmra.mxu0 %vm6092_vm1, %v6471_v31  ;;  %7835 = vmatprep.subr.mxu0 %v12333_v23 }
 0x721   : > { %7857 = vmatprep.mubr.msk.f32.mxu0 %vm8192_vm8, %v12333_v23  ;;  %7816 = vmatprep.subr.mxu1 %v12333_v23 }
 0x722   : > { %7817 = vmatpush3.msra.mxu1 %v6561_v4  ;;  %7836 = vmatpush3.msk.msra.mxu0 %vm2295_vm4, %v6661_v44 }
 0x723   : > { %7818 = vmatprep.subr.mxu1 %v12333_v23  ;;  %7837 = vmatprep.subr.mxu0 %v12333_v23 }
 0x724   : > { %7819 = vmatpush3.msra.mxu1 %v6560_v40  ;;  %7838 = vmatpush3.msra.mxu0 %v6660_v63 }
 0x725   : > { %7820 = vmatprep.subr.mxu1 %v12333_v23  ;;  %7839 = vmatprep.subr.mxu0 %v12333_v23 }
 0x726   : > { %7821 = vmatpush3.msra.mxu1 %v6559_v57  ;;  %7840 = vmatpush3.msra.mxu0 %v6659_v35 }
 0x727   : > { %7822 = vmatprep.subr.mxu1 %v12333_v23  ;;  %7841 = vmatprep.subr.mxu0 %v12333_v23 }
 0x728   : > { %7823 = vmatpush3.msra.mxu1 %v6558_v29  ;;  %7842 = vmatpush3.msra.mxu0 %v6658_v20 }
 0x729   : > { %7824 = vmatprep.subr.mxu1 %v12333_v23  ;;  %7843 = vmatprep.subr.mxu0 %v12333_v23 }
 0x72a   : > { %7825 = vmatpush3.msra.mxu1 %v6557_v7  ;;  %7844 = vmatpush3.msra.mxu0 %v6657_v2 }
 0x72b   : > { %7826 = vmatprep.subr.mxu1 %v12333_v23  ;;  %7845 = vmatprep.subr.mxu0 %v12333_v23 }
 0x72c   : > { %7827 = vmatpush3.msra.mxu1 %v6556_v55  ;;  %7846 = vmatpush3.msra.mxu0 %v6656_v19 }
 0x72d   : > { %7828 = vmatprep.subr.mxu1 %v12333_v23  ;;  %7847 = vmatprep.subr.mxu0 %v12333_v23 }
 0x72e   : > { %7829 = vmatpush3.msra.mxu1 %v6555_v18  ;;  %7848 = vmatpush3.msra.mxu0 %v6655_v27 }
 0x72f   : > { %7830 = vmatprep.subr.mxu1 %v12333_v23  ;;  %7849 = vmatprep.subr.mxu0 %v12333_v23 }
 0x730   : > { %7831 = vmatpush3.msra.mxu1 %v6554_v62  ;;  %7850 = vmatpush3.msra.mxu0 %v6654_v28 }
 0x731   : > { %7851 = vmatprep.subr.mxu0 %v12333_v23 }
 0x732   : > { %7852 = vmatpush3.msra.mxu0 %v6653_v1 }
 0x733   : > { %7853 = vmatprep.subr.mxu0 %v12333_v23 }
 0x734   : > { %7854 = vmatpush3.msra.mxu0 %v6652_v8 }
 0x735   : > { %7855 = vmatprep.subr.mxu0 %v12333_v23 }
 0x736   : > { %7856 = vmatpush3.msra.mxu0 %v6651_v48 }
 0x7b8   : > { %v6161_v60 = vpop.f32.mrf.mxu0  ;;  %v6247_v54 = vpop.f32.mrf.mxu1 }
 0x7b9   : > { %v6248_v0 = vadd.f32 %v6247_v54, %v6161_v60 }
 0x7ba   : > { %v7709_v34 = vpop.f32.mrf.mxu0  ;;  %v7732_v38 = vpop.f32.mrf.mxu1 }
 0x7cc   : > { %v6344_v58 = vpop.f32.mrf.mxu0 }
 0x7cd   : > { %v6348_v11 = vadd.f32 %v6344_v58, %v6248_v0 }
 0x7ce   : > { %v7755_v53 = vpop.f32.mrf.mxu0 }
 0x7cf   : > { %v6442_v21 = vpop.f32.mrf.mxu1 }
 0x7d0   : > { %v6446_v25 = vadd.f32 %v6442_v21, %v6348_v11 }
 0x7d1   : > { %v7778_v45 = vpop.f32.mrf.mxu1 }
 0x7e0   : > { %v6540_v26 = vpop.f32.mrf.mxu0 }
 0x7e1   : > { %v6544_v43 = vadd.f32 %v6540_v26, %v6446_v25 }
 0x7e2   : > { %v7801_v41 = vpop.f32.mrf.mxu0 }
 0x7e3   : > { %v6552_v17 = vadd.f32 %v7378_v16, %v6544_v43 }
 0x7e5   : > { %8093 = vtanh.f32 %v6552_v17 }
 0x7f2   : > { %v8094_v24 = vpop.eup %8093 }
 0x7f3   : > { %7833 = vmatmul.mubr.msk.f32.vlgmr.msra.gmra.mxu1 %vm6576_vm2, %v8094_v24 }
 0x8b3   : > { %v6646_v42 = vpop.f32.mrf.mxu1 }
 0x8b4   : > { %v6647_v37 = vadd.f32 %v7379_v10, %v6646_v42 }
 0x8b5   : > { %v7834_v9 = vpop.f32.mrf.mxu1 }
 0x8b6   : > { %8095 = vtanh.f32 %v6647_v37 }
 0x8c3   : > { %v8096_v32 = vpop.eup %8095 }
 0x8c4   : > { %7858 = vmatmul.mubr.msk.f32.vlgmr.msra.gmra.mxu0 %vm3931_vm7, %v8096_v32 }
 0x984   : > { %v6741_v23 = vpop.f32.mrf.mxu0 }
 0x985   : > { %v6742_v50 = vadd.f32 %v7381_v52, %v6741_v23 }
 0x986   : > { %v7859_v56 = vpop.f32.mrf.mxu0 }
 0x987   : > { %6746 = vst.msk [vmem:[%s488_s18] sm:$0xff] %vm6745_vm3, %v6742_v50 }
 0x988   : > { %8142 = shalt.err (!%p8139_p3)
}
 0x989   : > { %s8143_s17 = scalar_lea.hbm %s11941_s20, 128  ;;  %s8147_s18 = scalar_lea.hbm %s11991_s15, 256 }
 0x98a   : > { %p8144_p4 = scmp.ne.s32.totalorder %s11941_s20, %s8143_s17  ;;  %p8148_p9 = scmp.lt.s32.totalorder %s11941_s20, %s11991_s15 }
 0x98b   : > { %p8149_p10 = scmp.lt.s32.totalorder %s8147_s18, %s8143_s17 }
 0x98c   : > { %p8145_p7 = pnand %p8144_p4, %p8312_p5 }
 0x98d   : > { %p8150_p11 = por %p8149_p10, %p8148_p9 }
 0x98e   : > { %p8146_p8 = pneg %p8145_p7 }
 0x990   : > { %p8151_p12 = pnand %p8150_p11, %p8146_p8 }
 0x992   : > { %8154 = shalt.err (!%p8151_p12)
}
 0x993   : > { %7860 = dma.vmem_to_hbm [thread:$0]  (%p8312_p5), %s6762_s26, 128, %s11941_s20, %s6748_s21  }
 0x994 PF: > { %s12334_s24 = sld [smem:[#allocation7_spill]] }
 0x995   : > { %s12335_s22 = sld [smem:[#allocation5_spill]] }
 0x99a   : > { %p7866_p13 = scmp.ge.s32.totalorder %s12334_s24, 2 }
 0x99b   : > { %s6773_s30 = sand.u32 1, %s12335_s22  }
 0x99c   : > { %p7863_p0 = pnand %p7866_p13, %p8316_p6  ;;  %s6774_s29 = scalar_lea.sflag [#allocation3], %s6773_s30 }
 0x99e   : > { %p7864_p1 = pneg %p7863_p0 }
 0x9a0   : > { %8172 = dma.done.wait (%p7864_p1), %s6774_s29, 128  }
 0x9a1   : > { %8174 = vsyncadd (%p7864_p1), %s6774_s29, 4294967168  ;;  %s12337_s21 = sld [smem:[#allocation8_spill]]  ;;  %s12340_s18 = smov %s8181_s19 }
 0x9a2   : > { %s12338_s17 = sld [smem:[#allocation6_spill]] }
 0x9a3   : > { %s12339_s20 = sld [smem:[#allocation9_spill]] }
 0x9a7   : > { %p25_p2 = scmp.ge.s32.totalorder %s12337_s21, 4  }
 0x9a8   : > { %s12341_s19 = smov %s12338_s17 }
 0x9a9   :  { %27 = sbr.rel (!%p25_p2) target bundleno = 3 (0x3), region = 127 }
 0x9ae   :  { %6779 = vsyncpa [#allocation3], 1 }
 0x9af   :  { %6781 = vsyncpa [#allocation3 + $0x1], 1 }

</bundles_post_ra>
